<compile_context>
chip_gen: v5e
topology: v5e:2x2
jax: 0.10.0
libtpu: 0.0.40
codegen_flags: <defaults>
</compile_context>

<pallas_src>
import functools

import jax
import jax.numpy as jnp
from jax import lax
from jax.experimental import pallas as pl
from jax.experimental.pallas import tpu as pltpu

MIB = 1024 * 1024


# ----------------------------------------------------------------------------
# Shared epilogue: masked log_softmax over the (padded) class lanes.
# ----------------------------------------------------------------------------
def _log_softmax_masked(z, num_classes):
    col = lax.broadcasted_iota(jnp.int32, z.shape, 1)
    z = jnp.where(col < num_classes, z, jnp.float32(-1e30))
    m = jnp.max(z, axis=1, keepdims=True)
    s = z - m
    return s - jnp.log(jnp.sum(jnp.exp(s), axis=1, keepdims=True))


# ----------------------------------------------------------------------------
# Fused single-call kernel (small graphs): everything VMEM-resident, one launch.
# ----------------------------------------------------------------------------
def gcn_fused_kernel(adj_ref, x_ref, w1_ref, b1_ref, w2_ref, b2_ref, out_ref,
                     *, num_classes):
    agg1 = jnp.dot(adj_ref[...], x_ref[...],
                   preferred_element_type=jnp.float32)                   # [N, Fin] f32
    h = jnp.dot(agg1.astype(jnp.bfloat16), w1_ref[...],
                preferred_element_type=jnp.float32) + b1_ref[...]        # [N, H]   f32
    h = jnp.maximum(h, 0.0)                                              # ReLU
    # dropout(p=0.5): identity in eval mode.
    hw2 = jnp.dot(h.astype(jnp.bfloat16), w2_ref[...],
                  preferred_element_type=jnp.float32)                    # [N, Cp]  f32
    z = jnp.dot(adj_ref[...], hw2.astype(jnp.bfloat16),
                preferred_element_type=jnp.float32) + b2_ref[...]        # [N, Cp]  f32
    out_ref[...] = _log_softmax_masked(z, num_classes)


# ----------------------------------------------------------------------------
# Tiled pass 1:  HW2 = relu( (A_hat @ X) @ W1 + b1 ) @ W2   (bf16 output)
#   grid = (N/tm rows "parallel", N/tk reduction "arbitrary").
#   X is VMEM-resident (grid-invariant spec) and sliced by k inside the kernel.
# ----------------------------------------------------------------------------
def gcn_layer1_kernel(adj_ref, x_ref, w1_ref, b1_ref, w2_ref, out_ref, acc_ref, *, tk):
    k = pl.program_id(1)

    @pl.when(k == 0)
    def _():
        acc_ref[...] = jnp.zeros_like(acc_ref)

    start = pl.multiple_of(k * tk, 128)
    xk = x_ref[pl.ds(start, tk), :]                                      # [tk, Fin] bf16
    # Aggregate first (Fin <= H): acc[tm, Fin] += A_hat[tm, tk] @ X[tk, Fin]
    acc_ref[...] += jnp.dot(adj_ref[...], xk,
                            preferred_element_type=jnp.float32)

    @pl.when(k == pl.num_programs(1) - 1)
    def _():
        agg = acc_ref[...]                                               # [tm, Fin] f32
        h = jnp.dot(agg.astype(jnp.bfloat16), w1_ref[...],
                    preferred_element_type=jnp.float32) + b1_ref[...]    # [tm, H]   f32
        h = jnp.maximum(h, 0.0)                                          # ReLU
        # dropout(p=0.5): identity in eval mode.
        hw2 = jnp.dot(h.astype(jnp.bfloat16), w2_ref[...],
                      preferred_element_type=jnp.float32)                # [tm, Cp]  f32
        out_ref[...] = hw2.astype(out_ref.dtype)                         # store bf16


# ----------------------------------------------------------------------------
# Tiled pass 2:  out = log_softmax( A_hat @ HW2 + b2 )
#   HW2 (bf16) is VMEM-resident; accumulator initialized with broadcast b2.
# ----------------------------------------------------------------------------
def gcn_layer2_kernel(adj_ref, hw2_ref, b2_ref, out_ref, acc_ref, *, tk, num_classes):
    k = pl.program_id(1)

    @pl.when(k == 0)
    def _():
        acc_ref[...] = b2_ref[...] + jnp.zeros_like(acc_ref)             # bias init

    start = pl.multiple_of(k * tk, 128)
    hk = hw2_ref[pl.ds(start, tk), :]                                    # [tk, Cp] bf16
    acc_ref[...] += jnp.dot(adj_ref[...], hk,
                            preferred_element_type=jnp.float32)

    @pl.when(k == pl.num_programs(1) - 1)
    def _():
        out_ref[...] = _log_softmax_masked(acc_ref[...], num_classes)


# ----------------------------------------------------------------------------
# Tile selection / VMEM budgeting helpers.
# ----------------------------------------------------------------------------
def _pick_row_tile(n):
    """Largest tile <=512 dividing n that keeps >=2 row blocks (v7x megacore)."""
    best = 128
    for cand in (256, 384, 512):
        if n % cand == 0 and n // cand >= 2:
            best = cand
    return best


def _pick_k_tile(n):
    """Largest reduction tile <=512 dividing n."""
    best = 128
    for cand in (256, 384, 512):
        if n % cand == 0:
            best = cand
    return best


def _mosaic_params(est_bytes, semantics):
    # Raise v5e's 16 MiB scoped-VMEM default when needed; stay under v7x's 64 MiB phys.
    limit = int(min(max(2 * est_bytes, 32 * MIB), 56 * MIB))
    return pltpu.CompilerParams(dimension_semantics=semantics,
                                vmem_limit_bytes=limit)


def _fused_vmem_bytes(np_, fp, hp, cp):
    return (2 * np_ * np_ * 2                          # A_hat (bf16, double-buffered)
            + np_ * fp * 2                             # X (bf16)
            + (fp * hp + hp * cp) * 2 + (hp + cp) * 4  # W1, W2, b1, b2
            + 2 * np_ * cp * 4                         # output (f32)
            + np_ * hp * 4                             # hidden activation (f32)
            + np_ * (fp + 2 * cp) * 4)                 # agg1 / hw2 / z intermediates


# ----------------------------------------------------------------------------
# Wrappers.
# ----------------------------------------------------------------------------
def gcn_forward_fused(adj, x, w1, b1, w2, b2, num_classes):
    np_, fp = x.shape
    hp = w1.shape[1]
    cp = w2.shape[1]
    est = _fused_vmem_bytes(np_, fp, hp, cp)
    return pl.pallas_call(
        functools.partial(gcn_fused_kernel, num_classes=num_classes),
        out_shape=jax.ShapeDtypeStruct((np_, cp), jnp.float32),
        grid_spec=pltpu.PrefetchScalarGridSpec(
            num_scalar_prefetch=0,
            grid=(1,),
            in_specs=[
                pl.BlockSpec((np_, np_), lambda i: (0, 0)),   # A_hat (resident)
                pl.BlockSpec((np_, fp), lambda i: (0, 0)),    # X
                pl.BlockSpec((fp, hp), lambda i: (0, 0)),     # W1
                pl.BlockSpec((1, hp), lambda i: (0, 0)),      # b1
                pl.BlockSpec((hp, cp), lambda i: (0, 0)),     # W2
                pl.BlockSpec((1, cp), lambda i: (0, 0)),      # b2
            ],
            out_specs=pl.BlockSpec((np_, cp), lambda i: (0, 0)),
        ),
        compiler_params=_mosaic_params(est, ("arbitrary",)),
    )(adj, x, w1, b1, w2, b2)


def gcn_forward_tiled(adj, x, w1, b1, w2, b2, num_classes):
    np_, fp = x.shape
    hp = w1.shape[1]
    cp = w2.shape[1]
    assert adj.shape == (np_, np_) and np_ % 128 == 0
    tm = _pick_row_tile(np_)
    tk = _pick_k_tile(np_)
    grid = (np_ // tm, np_ // tk)

    # ---- pass 1: HW2 = relu((A_hat @ X) @ W1 + b1) @ W2  (bf16 out) ----
    est1 = (2 * tm * tk * 2                            # A_hat tiles (bf16, double-buf)
            + 2 * np_ * fp * 2                         # resident X (bf16)
            + 2 * (fp * hp + hp * cp) * 2 + 2 * hp * 4 # W1, W2, b1
            + 2 * tm * cp * 2                          # HW2 output tile (bf16)
            + tm * fp * 4 + tm * hp * 4)               # accumulator + epilogue hidden
    hw2 = pl.pallas_call(
        functools.partial(gcn_layer1_kernel, tk=tk),
        out_shape=jax.ShapeDtypeStruct((np_, cp), jnp.bfloat16),
        grid_spec=pltpu.PrefetchScalarGridSpec(
            num_scalar_prefetch=0,
            grid=grid,
            in_specs=[
                pl.BlockSpec((tm, tk), lambda i, k: (i, k)),    # A_hat tile (streamed)
                pl.BlockSpec((np_, fp), lambda i, k: (0, 0)),   # X (VMEM-resident)
                pl.BlockSpec((fp, hp), lambda i, k: (0, 0)),    # W1 (resident)
                pl.BlockSpec((1, hp), lambda i, k: (0, 0)),     # b1 (resident)
                pl.BlockSpec((hp, cp), lambda i, k: (0, 0)),    # W2 (resident)
            ],
            out_specs=pl.BlockSpec((tm, cp), lambda i, k: (i, 0)),
            scratch_shapes=[pltpu.VMEM((tm, fp), jnp.float32)],
        ),
        compiler_params=_mosaic_params(est1, ("parallel", "arbitrary")),
    )(adj, x, w1, b1, w2)

    # ---- pass 2: out = log_softmax(A_hat @ HW2 + b2) ----
    est2 = (2 * tm * tk * 2                            # A_hat tiles
            + 2 * np_ * cp * 2                         # resident HW2 (bf16)
            + 2 * cp * 4                               # b2
            + 2 * tm * cp * 4 + tm * cp * 4)           # output tile + accumulator
    out = pl.pallas_call(
        functools.partial(gcn_layer2_kernel, tk=tk, num_classes=num_classes),
        out_shape=jax.ShapeDtypeStruct((np_, cp), jnp.float32),
        grid_spec=pltpu.PrefetchScalarGridSpec(
            num_scalar_prefetch=0,
            grid=grid,
            in_specs=[
                pl.BlockSpec((tm, tk), lambda i, k: (i, k)),    # A_hat tile (streamed)
                pl.BlockSpec((np_, cp), lambda i, k: (0, 0)),   # HW2 (bf16, resident)
                pl.BlockSpec((1, cp), lambda i, k: (0, 0)),     # b2 (resident)
            ],
            out_specs=pl.BlockSpec((tm, cp), lambda i, k: (i, 0)),
            scratch_shapes=[pltpu.VMEM((tm, cp), jnp.float32)],
        ),
        compiler_params=_mosaic_params(est2, ("parallel", "arbitrary")),
    )(adj, hw2, b2)
    return out


def gcn_classifier_forward(adj, x, w1, b1, w2, b2, num_classes):
    """Dispatch: fully-fused single launch when the whole problem fits VMEM."""
    np_, fp = x.shape
    hp = w1.shape[1]
    cp = w2.shape[1]
    if _fused_vmem_bytes(np_, fp, hp, cp) <= 20 * MIB:
        return gcn_forward_fused(adj, x, w1, b1, w2, b2, num_classes)
    return gcn_forward_tiled(adj, x, w1, b1, w2, b2, num_classes)


# ----------------------------------------------------------------------------
# Glue: symmetric-normalized adjacency (PyG GCN norm) + padding helpers.
# ----------------------------------------------------------------------------
def build_norm_adj(edge_index, num_nodes):
    src, dst = edge_index[0], edge_index[1]
    a = jnp.zeros((num_nodes, num_nodes), jnp.float32)
    a = a.at[dst, src].set(1.0)                    # message from src j to target i
    diag = jnp.arange(num_nodes)
    a = a.at[diag, diag].set(1.0)                  # add self-loops
    deg = jnp.sum(a, axis=1)
    d_inv_sqrt = jnp.where(deg > 0, lax.rsqrt(deg), 0.0)
    return d_inv_sqrt[:, None] * a * d_inv_sqrt[None, :]


def round_up(n, m):
    return ((n + m - 1) // m) * m


def pad_to(a, shape):
    return jnp.pad(a, [(0, s - d) for d, s in zip(a.shape, shape)])


def glorot(key, fan_in, fan_out):
    limit = jnp.sqrt(6.0 / (fan_in + fan_out))
    return jax.random.uniform(key, (fan_in, fan_out), jnp.float32, -limit, limit)


def reference_logits(adj_bf16, x_bf16, w1_bf16, b1_f32, w2_bf16, b2_f32):
    """Plain-JAX reference mirroring the kernels' dtype boundaries."""
    agg1 = jnp.dot(adj_bf16, x_bf16, preferred_element_type=jnp.float32)
    h = jnp.maximum(
        jnp.dot(agg1.astype(jnp.bfloat16), w1_bf16,
                preferred_element_type=jnp.float32) + b1_f32, 0.0)
    hw2 = jnp.dot(h.astype(jnp.bfloat16), w2_bf16, preferred_element_type=jnp.float32)
    return jnp.dot(adj_bf16, hw2.astype(jnp.bfloat16),
                   preferred_element_type=jnp.float32) + b2_f32


if __name__ == "__main__":
    # Shapes consistent with the module spec: input 128, hidden 1024, output 40.
    N_RAW = 200
    INPUT_DIM = 128
    HIDDEN_DIM = 1024
    OUTPUT_DIM = 40

    key = jax.random.PRNGKey(0)
    k_x, k_e1, k_e2, k_w1, k_w2 = jax.random.split(key, 5)

    # Deterministic node features and symmetric random edge list.
    x = jax.random.normal(k_x, (N_RAW, INPUT_DIM), dtype=jnp.float32)
    n_rand = 600
    src = jax.random.randint(k_e1, (n_rand,), 0, N_RAW)
    dst = jax.random.randint(k_e2, (n_rand,), 0, N_RAW)
    edge_index = jnp.stack([jnp.concatenate([src, dst]),
                            jnp.concatenate([dst, src])], axis=0)

    # GCNConv parameters (glorot weights, zero bias — PyG default init).
    w1 = glorot(k_w1, INPUT_DIM, HIDDEN_DIM)
    b1 = jnp.zeros((1, HIDDEN_DIM), jnp.float32)
    w2 = glorot(k_w2, HIDDEN_DIM, OUTPUT_DIM)
    b2 = jnp.zeros((1, OUTPUT_DIM), jnp.float32)

    adj = build_norm_adj(edge_index, N_RAW)

    # Pad to MXU/lane-friendly shapes (multiples of 128); zero padding is exact.
    NP = round_up(N_RAW, 128)
    FP = round_up(INPUT_DIM, 128)
    HP = round_up(HIDDEN_DIM, 128)
    CP = round_up(OUTPUT_DIM, 128)

    adj_p = pad_to(adj, (NP, NP)).astype(jnp.bfloat16)
    x_p = pad_to(x, (NP, FP)).astype(jnp.bfloat16)
    w1_p = pad_to(w1, (FP, HP)).astype(jnp.bfloat16)
    b1_p = pad_to(b1, (1, HP))                       # f32
    w2_p = pad_to(w2, (HP, CP)).astype(jnp.bfloat16)
    b2_p = pad_to(b2, (1, CP))                       # f32

    # Run both code paths (the dispatcher picks the fused one at this shape).
    out_fused = gcn_forward_fused(adj_p, x_p, w1_p, b1_p, w2_p, b2_p,
                                  OUTPUT_DIM)[:N_RAW, :OUTPUT_DIM]
    out_tiled = gcn_forward_tiled(adj_p, x_p, w1_p, b1_p, w2_p, b2_p,
                                  OUTPUT_DIM)[:N_RAW, :OUTPUT_DIM]
    out_fused, out_tiled = jax.block_until_ready((out_fused, out_tiled))

    # Reference (same bf16 boundaries, f32 accumulation).
    z_ref = reference_logits(adj_p, x_p, w1_p, b1_p, w2_p, b2_p)[:N_RAW, :OUTPUT_DIM]
    ref = jax.nn.log_softmax(z_ref, axis=1)

    for out in (out_fused, out_tiled):
        assert out.shape == (N_RAW, OUTPUT_DIM)
        assert bool(jnp.all(jnp.isfinite(out)))
        row_sums = jnp.sum(jnp.exp(out), axis=1)
        assert bool(jnp.all(jnp.abs(row_sums - 1.0) < 1e-4))
        assert float(jnp.max(jnp.abs(out - ref))) < 2e-2

    print("KERNEL_OK")
</pallas_src>

<mosaic_0001>
module attributes {stable_mosaic.version = 11 : i64} {
  func.func @gcn_fused_kernel(%arg0: i32, %arg1: memref<256x256xbf16, #tpu.memory_space<vmem>>, %arg2: memref<256x128xbf16, #tpu.memory_space<vmem>>, %arg3: memref<128x1024xbf16, #tpu.memory_space<vmem>>, %arg4: memref<1x1024xf32, #tpu.memory_space<vmem>>, %arg5: memref<1024x128xbf16, #tpu.memory_space<vmem>>, %arg6: memref<1x128xf32, #tpu.memory_space<vmem>>, %arg7: memref<256x128xf32, #tpu.memory_space<vmem>>) attributes {dimension_semantics = [#tpu.dimension_semantics<arbitrary>], iteration_bounds = array<i64: 1>, scalar_prefetch = 0 : i64, scratch_operands = 0 : i64, tpu.core_type = #tpu.core_type<tc>, window_params = [{pipeline_mode = #tpu.pipeline_mode<synchronous>, transform_indices = @transform_0, window_bounds = array<i64: 256, 256>}, {pipeline_mode = #tpu.pipeline_mode<synchronous>, transform_indices = @transform_1, window_bounds = array<i64: 256, 128>}, {pipeline_mode = #tpu.pipeline_mode<synchronous>, transform_indices = @transform_2, window_bounds = array<i64: 128, 1024>}, {pipeline_mode = #tpu.pipeline_mode<synchronous>, transform_indices = @transform_3, window_bounds = array<i64: 1, 1024>}, {pipeline_mode = #tpu.pipeline_mode<synchronous>, transform_indices = @transform_4, window_bounds = array<i64: 1024, 128>}, {pipeline_mode = #tpu.pipeline_mode<synchronous>, transform_indices = @transform_5, window_bounds = array<i64: 1, 128>}, {pipeline_mode = #tpu.pipeline_mode<synchronous>, transform_indices = @transform_6, window_bounds = array<i64: 256, 128>}]} {
    %c0 = arith.constant 0 : index
    %c0_0 = arith.constant 0 : index
    %0 = vector.load %arg1[%c0, %c0_0] : memref<256x256xbf16, #tpu.memory_space<vmem>>, vector<256x256xbf16>
    %c0_1 = arith.constant 0 : index
    %c0_2 = arith.constant 0 : index
    %1 = vector.load %arg2[%c0_1, %c0_2] : memref<256x128xbf16, #tpu.memory_space<vmem>>, vector<256x128xbf16>
    %cst = arith.constant dense<0.000000e+00> : vector<256x128xf32>
    %2 = tpu.matmul %0, %1, %cst {dimension_numbers = #tpu.dot_dimension_numbers<[1], [0], [0], [1], [0, 0, 1, 1], [], []>} : vector<256x256xbf16>, vector<256x128xbf16>, vector<256x128xf32> -> vector<256x128xf32>
    %3 = arith.truncf %2 : vector<256x128xf32> to vector<256x128xbf16>
    %c0_3 = arith.constant 0 : index
    %c0_4 = arith.constant 0 : index
    %4 = vector.load %arg3[%c0_3, %c0_4] : memref<128x1024xbf16, #tpu.memory_space<vmem>>, vector<128x1024xbf16>
    %cst_5 = arith.constant dense<0.000000e+00> : vector<256x1024xf32>
    %5 = tpu.matmul %3, %4, %cst_5 {dimension_numbers = #tpu.dot_dimension_numbers<[1], [0], [0], [1], [0, 0, 1, 1], [], []>} : vector<256x128xbf16>, vector<128x1024xbf16>, vector<256x1024xf32> -> vector<256x1024xf32>
    %c0_6 = arith.constant 0 : index
    %c0_7 = arith.constant 0 : index
    %6 = vector.load %arg4[%c0_6, %c0_7] : memref<1x1024xf32, #tpu.memory_space<vmem>>, vector<1x1024xf32>
    %7 = vector.broadcast %6 : vector<1x1024xf32> to vector<256x1024xf32>
    %8 = arith.addf %5, %7 : vector<256x1024xf32>
    %cst_8 = arith.constant 0.000000e+00 : f32
    %9 = vector.broadcast %cst_8 : f32 to vector<256x1024xf32>
    %10 = arith.maximumf %8, %9 : vector<256x1024xf32>
    %11 = arith.truncf %10 : vector<256x1024xf32> to vector<256x1024xbf16>
    %c0_9 = arith.constant 0 : index
    %c0_10 = arith.constant 0 : index
    %12 = vector.load %arg5[%c0_9, %c0_10] : memref<1024x128xbf16, #tpu.memory_space<vmem>>, vector<1024x128xbf16>
    %cst_11 = arith.constant dense<0.000000e+00> : vector<256x128xf32>
    %13 = tpu.matmul %11, %12, %cst_11 {dimension_numbers = #tpu.dot_dimension_numbers<[1], [0], [0], [1], [0, 0, 1, 1], [], []>} : vector<256x1024xbf16>, vector<1024x128xbf16>, vector<256x128xf32> -> vector<256x128xf32>
    %c0_12 = arith.constant 0 : index
    %c0_13 = arith.constant 0 : index
    %14 = vector.load %arg1[%c0_12, %c0_13] : memref<256x256xbf16, #tpu.memory_space<vmem>>, vector<256x256xbf16>
    %15 = arith.truncf %13 : vector<256x128xf32> to vector<256x128xbf16>
    %cst_14 = arith.constant dense<0.000000e+00> : vector<256x128xf32>
    %16 = tpu.matmul %14, %15, %cst_14 {dimension_numbers = #tpu.dot_dimension_numbers<[1], [0], [0], [1], [0, 0, 1, 1], [], []>} : vector<256x256xbf16>, vector<256x128xbf16>, vector<256x128xf32> -> vector<256x128xf32>
    %c0_15 = arith.constant 0 : index
    %c0_16 = arith.constant 0 : index
    %17 = vector.load %arg6[%c0_15, %c0_16] : memref<1x128xf32, #tpu.memory_space<vmem>>, vector<1x128xf32>
    %18 = vector.broadcast %17 : vector<1x128xf32> to vector<256x128xf32>
    %19 = arith.addf %16, %18 : vector<256x128xf32>
    %20 = tpu.iota {dimensions = array<i32: 1>} : vector<256x128xi32>
    %c40_i32 = arith.constant 40 : i32
    %21 = vector.broadcast %c40_i32 : i32 to vector<256x128xi32>
    %22 = arith.cmpi slt, %20, %21 : vector<256x128xi32>
    %cst_17 = arith.constant -1.000000e+30 : f32
    %23 = vector.broadcast %cst_17 : f32 to vector<256x128xf32>
    %24 = arith.select %22, %19, %23 : vector<256x128xi1>, vector<256x128xf32>
    %cst_18 = arith.constant dense<0xFF800000> : vector<256xf32>
    %25 = vector.multi_reduction <maximumf>, %24, %cst_18 [1] : vector<256x128xf32> to vector<256xf32>
    %26 = vector.shape_cast %25 : vector<256xf32> to vector<256x1xf32>
    %27 = vector.broadcast %26 : vector<256x1xf32> to vector<256x128xf32>
    %28 = arith.subf %24, %27 : vector<256x128xf32>
    %29 = math.exp %28 : vector<256x128xf32>
    %cst_19 = arith.constant dense<0.000000e+00> : vector<256xf32>
    %30 = vector.multi_reduction <add>, %29, %cst_19 [1] : vector<256x128xf32> to vector<256xf32>
    %31 = vector.shape_cast %30 : vector<256xf32> to vector<256x1xf32>
    %32 = math.log %31 : vector<256x1xf32>
    %33 = vector.broadcast %32 : vector<256x1xf32> to vector<256x128xf32>
    %34 = arith.subf %28, %33 : vector<256x128xf32>
    %c0_20 = arith.constant 0 : index
    %c0_21 = arith.constant 0 : index
    %35 = vector.load %arg7[%c0_20, %c0_21] : memref<256x128xf32, #tpu.memory_space<vmem>>, vector<256x128xf32>
    tpu.vector_store %arg7[%c0_20, %c0_21], %34 {strides = array<i32>} : memref<256x128xf32, #tpu.memory_space<vmem>>, vector<256x128xf32>,
    return
  }
  func.func @transform_0(%arg0: i32) -> (i32, i32) {
    %c0_i32 = arith.constant 0 : i32
    %c0_i32_0 = arith.constant 0 : i32
    %c0_i32_1 = arith.constant 0 : i32
    return %c0_i32, %c0_i32_0 : i32, i32
  }
  func.func @transform_1(%arg0: i32) -> (i32, i32) {
    %c0_i32 = arith.constant 0 : i32
    %c0_i32_0 = arith.constant 0 : i32
    %c0_i32_1 = arith.constant 0 : i32
    return %c0_i32, %c0_i32_0 : i32, i32
  }
  func.func @transform_2(%arg0: i32) -> (i32, i32) {
    %c0_i32 = arith.constant 0 : i32
    %c0_i32_0 = arith.constant 0 : i32
    %c0_i32_1 = arith.constant 0 : i32
    return %c0_i32, %c0_i32_0 : i32, i32
  }
  func.func @transform_3(%arg0: i32) -> (i32, i32) {
    %c0_i32 = arith.constant 0 : i32
    %c0_i32_0 = arith.constant 0 : i32
    %c0_i32_1 = arith.constant 0 : i32
    return %c0_i32, %c0_i32_0 : i32, i32
  }
  func.func @transform_4(%arg0: i32) -> (i32, i32) {
    %c0_i32 = arith.constant 0 : i32
    %c0_i32_0 = arith.constant 0 : i32
    %c0_i32_1 = arith.constant 0 : i32
    return %c0_i32, %c0_i32_0 : i32, i32
  }
  func.func @transform_5(%arg0: i32) -> (i32, i32) {
    %c0_i32 = arith.constant 0 : i32
    %c0_i32_0 = arith.constant 0 : i32
    %c0_i32_1 = arith.constant 0 : i32
    return %c0_i32, %c0_i32_0 : i32, i32
  }
  func.func @transform_6(%arg0: i32) -> (i32, i32) {
    %c0_i32 = arith.constant 0 : i32
    %c0_i32_0 = arith.constant 0 : i32
    %c0_i32_1 = arith.constant 0 : i32
    return %c0_i32, %c0_i32_0 : i32, i32
  }
}

</mosaic_0001>

<bundles_post_ra>
// kernel: tpu_custom_call.1
= control target key start
LH: loop header
LB: loop body
LE: loop exit
PB: predicated region body
PF: predicated region fallthrough
CT: control target
= control target key end

     0   :  { %11 = vsyncpa [#allocation3], 0  ;;  %s6893_s0 = inlined_call_operand.hbm [shape: bf16[256,256], index: 0, kind: input, shape index: {}]   ;;  %s6894_s1 = inlined_call_operand.hbm [shape: bf16[256,128], index: 1, kind: input, shape index: {}]   ;;  %s6895_s2 = inlined_call_operand.hbm [shape: bf16[128,1024], index: 2, kind: input, shape index: {}]   ;;  %s6896_s3 = inlined_call_operand.hbm [shape: f32[1,1024], index: 3, kind: input, shape index: {}]   ;;  %s6897_s4 = inlined_call_operand.hbm [shape: bf16[1024,128], index: 4, kind: input, shape index: {}]   ;;  %s6898_s5 = inlined_call_operand.vmem [shape: f32[1,128], index: 5, kind: input, shape index: {}]   ;;  %s6899_s6 = inlined_call_operand.hbm [shape: f32[256,128], index: 6, kind: output, shape index: {}]  }
   0x1   :  { %12 = vsyncpa [#allocation6], 0 }
   0x2   :  { %13 = vsyncpa [#allocation9], 0  ;;  %s32_s23 = sshll.u32 %s6894_s1, 4  ;;  %s33_s23 = int_to_ptr.hbm [resolvable:$true] %s32_s23 }
   0x3   :  { %14 = vsyncpa [#allocation4], 0  ;;  %s5116_s24 = smov [#allocation5]   ;;  %s59_s28 = sshll.u32 %s6896_s3, 4  ;;  %s60_s28 = int_to_ptr.hbm [resolvable:$true] %s59_s28 }
   0x4   :  { %s34_s25 = sshll.u32 %s5116_s24, 4  ;;  %s5117_s29 = smov 64   ;;  %s35_s25 = int_to_ptr.vmem [resolvable:$true] %s34_s25 }
   0x5   :  { %s5118_s30 = smov 4   ;;  %s5119_s7 = smov [#allocation8]  }
   0x6   :  { %40 = dma.hbm_to_vmem [thread:$0]  %s33_s23, 2048, %s35_s25, [#allocation6], %s5117_s29, %s5117_s29, %s5118_s30  }
   0x7   :  { %s61_s8 = sshll.u32 %s5119_s7, 4  ;;  %s19_s10 = sshll.u32 %s6893_s0, 4  ;;  %s62_s8 = int_to_ptr.vmem [resolvable:$true] %s61_s8  ;;  %s20_s10 = int_to_ptr.hbm [resolvable:$true] %s19_s10 }
   0x8   :  { %64 = dma.hbm_to_vmem [thread:$0]  %s60_s28, 128, %s62_s8, [#allocation9]  }
   0x9   :  { %s5120_s11 = smov [#allocation2]   ;;  %s45_s14 = sshll.u32 %s6895_s2, 4  ;;  %s46_s14 = int_to_ptr.hbm [resolvable:$true] %s45_s14 }
   0xa   :  { %s21_s12 = sshll.u32 %s5120_s11, 4  ;;  %s5121_s15 = smov 128   ;;  %s22_s12 = int_to_ptr.vmem [resolvable:$true] %s21_s12 }
   0xb   :  { %s5122_s16 = smov 8   ;;  %s5123_s17 = smov [#allocation7]  }
   0xc   :  { %27 = dma.hbm_to_vmem [thread:$0]  %s20_s10, 4096, %s22_s12, [#allocation3], %s5121_s15, %s5121_s15, %s5122_s16  }
   0xd   :  { %s47_s18 = sshll.u32 %s5123_s17, 4  ;;  %s5124_s0 = smov 512   ;;  %s48_s18 = int_to_ptr.vmem [resolvable:$true] %s47_s18 }
   0xe   :  { %s5125_s19 = smov 32   ;;  %s69_s22 = sshll.u32 %s6897_s4, 4  ;;  %s70_s22 = int_to_ptr.hbm [resolvable:$true] %s69_s22 }
   0xf   :  { %53 = dma.hbm_to_vmem [thread:$0]  %s46_s14, 8192, %s48_s18, [#allocation6], %s5124_s0, %s5124_s0, %s5125_s19  }
  0x10   :  { %s5126_s23 = smov [#allocation10]  }
  0x11   :  { %s71_s2 = sshll.u32 %s5126_s23, 4  ;;  %s72_s2 = int_to_ptr.vmem [resolvable:$true] %s71_s2 }
  0x12   :  { %77 = dma.hbm_to_vmem [thread:$0]  %s70_s22, 8192, %s72_s2, [#allocation9], %s5117_s29, %s5117_s29, %s5118_s30  }
  0x13   :  { %5108 = dma.done.wait [#allocation3], 4096  }
  0x14   :  { %5109 = vsyncadd [#allocation3], 4294963200 }
  0x15   :  { %5110 = dma.done.wait [#allocation6], 10240  }
  0x16   :  { %5111 = vsyncadd [#allocation6], 4294957056 }
  0x17   :  { %5112 = dma.done.wait [#allocation9], 8320  }
  0x18   :  { %5113 = vsyncadd [#allocation9], 4294958976  ;;  %v4685_v0 = vld [vmem:[#allocation5 + $0x38] sm:$0xff]  ;;  %v4684_v2 = vld [vmem:[#allocation5 + $0x30] sm:$0xff]  ;;  %s3927_s28 = sshll.u32 %s6899_s6, 4  ;;  %s3928_s28 = int_to_ptr.hbm [resolvable:$true] %s3927_s28 }
  0x19   :  { %v4693_v1 = vld [vmem:[#allocation5 + $0x78] sm:$0xff]  ;;  %420 = vmatpush.bf16.msra.mxu0 %v4685_v0  ;;  %v4692_v3 = vld [vmem:[#allocation5 + $0x70] sm:$0xff]  ;;  %v4683_v4 = vld [vmem:[#allocation5 + $0x28] sm:$0xff] }
  0x1a   :  { %509 = vmatpush.bf16.msra.mxu1 %v4693_v1  ;;  %v4691_v5 = vld [vmem:[#allocation5 + $0x68] sm:$0xff]  ;;  %v4682_v6 = vld [vmem:[#allocation5 + $0x20] sm:$0xff]  ;;  %v4681_v8 = vld [vmem:[#allocation5 + $0x18] sm:$0xff] }
  0x1b   :  { %v4690_v7 = vld [vmem:[#allocation5 + $0x60] sm:$0xff]  ;;  %v4689_v9 = vld [vmem:[#allocation5 + $0x58] sm:$0xff]  ;;  %v4680_v10 = vld [vmem:[#allocation5 + $0x10] sm:$0xff] }
  0x1c   :  { %v4688_v11 = vld [vmem:[#allocation5 + $0x50] sm:$0xff]  ;;  %v4679_v12 = vld [vmem:[#allocation5 + $0x8] sm:$0xff]  ;;  %v4678_v14 = vld [vmem:[#allocation5] sm:$0xff] }
  0x1d   :  { %421 = vmatpush.bf16.msra.mxu0 %v4684_v2  ;;  %v4687_v13 = vld [vmem:[#allocation5 + $0x48] sm:$0xff]  ;;  %v4686_v15 = vld [vmem:[#allocation5 + $0x40] sm:$0xff]  ;;  %v3952_v22 = vld [vmem:[#allocation2 + $0x10] sm:$0xf] }
  0x1e   :  { %510 = vmatpush.bf16.msra.mxu1 %v4692_v3  ;;  %v3944_v16 = vld [vmem:[#allocation2] sm:$0xf]  ;;  %v4647_v17 = vld [vmem:[#allocation2 + $0x4] sm:$0xf0]  ;;  %v4646_v18 = vld [vmem:[#allocation2 + $0x4] sm:$0xf] }
  0x1f   :  { %v3946_v19 = vld [vmem:[#allocation2 + $0x8] sm:$0xf0]  ;;  %v5187_v20 = vor.u32 %v4647_v17, %v3944_v16  ;;  %v4649_v23 = vld [vmem:[#allocation2 + $0x14] sm:$0xf0]  ;;  %v4648_v24 = vld [vmem:[#allocation2 + $0x14] sm:$0xf] }
  0x20   :  { %v5189_v21 = vor.u32 %v4646_v18, %v3946_v19  ;;  %v3954_v25 = vld [vmem:[#allocation2 + $0x18] sm:$0xf0]  ;;  %v5193_v26 = vor.u32 %v4649_v23, %v3952_v22  ;;  %v3960_v28 = vld [vmem:[#allocation2 + $0x20] sm:$0xf]  ;;  %v4651_v29 = vld [vmem:[#allocation2 + $0x24] sm:$0xf0] }
  0x21   :  { %422 = vmatpush.bf16.msra.mxu0 %v4683_v4  ;;  %6932 = vst [vmem:[#allocation16_spill] sm:$0xff] %v5187_v20  ;;  %v5195_v27 = vor.u32 %v4648_v24, %v3954_v25  ;;  %v4650_v30 = vld [vmem:[#allocation2 + $0x24] sm:$0xf]  ;;  %v3962_v31 = vld [vmem:[#allocation2 + $0x28] sm:$0xf0]  ;;  %v5199_v32 = vor.u32 %v4651_v29, %v3960_v28 }
  0x22   :  { %511 = vmatpush.bf16.msra.mxu1 %v4691_v5  ;;  %6933 = vst [vmem:[#allocation17_spill] sm:$0xff] %v5189_v21  ;;  %v5201_v33 = vor.u32 %v4650_v30, %v3962_v31  ;;  %v3968_v34 = vld [vmem:[#allocation2 + $0x30] sm:$0xf]  ;;  %v4653_v35 = vld [vmem:[#allocation2 + $0x34] sm:$0xf0] }
  0x23   :  { %6934 = vst [vmem:[#allocation18_spill] sm:$0xff] %v5193_v26  ;;  %v4652_v36 = vld [vmem:[#allocation2 + $0x34] sm:$0xf]  ;;  %v3970_v37 = vld [vmem:[#allocation2 + $0x38] sm:$0xf0]  ;;  %v5205_v38 = vor.u32 %v4653_v35, %v3968_v34 }
  0x24   :  { %6935 = vst [vmem:[#allocation19_spill] sm:$0xff] %v5195_v27  ;;  %v5207_v39 = vor.u32 %v4652_v36, %v3970_v37  ;;  %v3976_v40 = vld [vmem:[#allocation2 + $0x40] sm:$0xf]  ;;  %v4655_v41 = vld [vmem:[#allocation2 + $0x44] sm:$0xf0] }
  0x25   :  { %423 = vmatpush.bf16.msra.mxu0 %v4682_v6  ;;  %6936 = vst [vmem:[#allocation20_spill] sm:$0xff] %v5199_v32  ;;  %v4654_v42 = vld [vmem:[#allocation2 + $0x44] sm:$0xf]  ;;  %v3978_v43 = vld [vmem:[#allocation2 + $0x48] sm:$0xf0]  ;;  %v5211_v44 = vor.u32 %v4655_v41, %v3976_v40 }
  0x26   :  { %512 = vmatpush.bf16.msra.mxu1 %v4690_v7  ;;  %6937 = vst [vmem:[#allocation21_spill] sm:$0xff] %v5201_v33  ;;  %v5213_v45 = vor.u32 %v4654_v42, %v3978_v43  ;;  %v4360_v46 = vld [vmem:[#allocation7 + $0x1c0] sm:$0xf]  ;;  %v4750_v48 = vld [vmem:[#allocation7 + $0x1c4] sm:$0xf] }
  0x27   :  { %6938 = vst [vmem:[#allocation22_spill] sm:$0xff] %v5205_v38  ;;  %v4754_v47 = vld [vmem:[#allocation7 + $0x1dc] sm:$0xf0]  ;;  %v4362_v50 = vld [vmem:[#allocation7 + $0x1e0] sm:$0xf0] }
  0x28   :  { %6939 = vst [vmem:[#allocation23_spill] sm:$0xff] %v5207_v39  ;;  %v4361_v49 = vor.u32 %v4754_v47, %v4360_v46  ;;  %v4328_v51 = vld [vmem:[#allocation7 + $0x180] sm:$0xf]  ;;  %v4365_v53 = vor.u32 %v4750_v48, %v4362_v50  ;;  %v4742_v54 = vld [vmem:[#allocation7 + $0x184] sm:$0xf] }
  0x29   :  { %424 = vmatpush.bf16.msra.mxu0 %v4681_v8  ;;  %6940 = vst [vmem:[#allocation24_spill] sm:$0xff] %v5211_v44  ;;  %v4746_v52 = vld [vmem:[#allocation7 + $0x19c] sm:$0xf0]  ;;  %v4330_v55 = vld [vmem:[#allocation7 + $0x1a0] sm:$0xf0] }
  0x2a   :  { %513 = vmatpush.bf16.msra.mxu1 %v4689_v9  ;;  %6941 = vst [vmem:[#allocation25_spill] sm:$0xff] %v5213_v45  ;;  %1016 = vmatpush.bf16.msra.mxu2 %v4361_v49  ;;  %v4329_v56 = vor.u32 %v4746_v52, %v4328_v51  ;;  %v4333_v57 = vor.u32 %v4742_v54, %v4330_v55  ;;  %v3984_v58 = vld [vmem:[#allocation2 + $0x50] sm:$0xf]  ;;  %v4657_v59 = vld [vmem:[#allocation2 + $0x54] sm:$0xf0] }
  0x2b   :  { %1105 = vmatpush.bf16.msra.mxu3 %v4365_v53  ;;  %v4656_v60 = vld [vmem:[#allocation2 + $0x54] sm:$0xf]  ;;  %v3986_v61 = vld [vmem:[#allocation2 + $0x58] sm:$0xf0]  ;;  %v5217_v62 = vor.u32 %v4657_v59, %v3984_v58  ;;  %v4296_v0 = vld [vmem:[#allocation7 + $0x140] sm:$0xf] }
  0x2c   :  { %v5219_v63 = vor.u32 %v4656_v60, %v3986_v61  ;;  %v4738_v1 = vld [vmem:[#allocation7 + $0x15c] sm:$0xf0]  ;;  %v4734_v2 = vld [vmem:[#allocation7 + $0x144] sm:$0xf]  ;;  %v4659_v19 = vld [vmem:[#allocation2 + $0x64] sm:$0xf0] }
  0x2d   :  { %425 = vmatpush.bf16.msra.mxu0 %v4680_v10  ;;  %6942 = vst [vmem:[#allocation26_spill] sm:$0xff] %v5217_v62  ;;  %v4297_v3 = vor.u32 %v4738_v1, %v4296_v0  ;;  %v4298_v4 = vld [vmem:[#allocation7 + $0x160] sm:$0xf0]  ;;  %v4264_v5 = vld [vmem:[#allocation7 + $0x100] sm:$0xf] }
  0x2e   :  { %514 = vmatpush.bf16.msra.mxu1 %v4688_v11  ;;  %1017 = vmatpush.bf16.msra.mxu2 %v4329_v56  ;;  %6943 = vst [vmem:[#allocation27_spill] sm:$0xff] %v5219_v63  ;;  %v4730_v6 = vld [vmem:[#allocation7 + $0x11c] sm:$0xf0]  ;;  %v4301_v7 = vor.u32 %v4734_v2, %v4298_v4  ;;  %v4726_v8 = vld [vmem:[#allocation7 + $0x104] sm:$0xf] }
  0x2f   :  { %1106 = vmatpush.bf16.msra.mxu3 %v4333_v57  ;;  %v4266_v9 = vld [vmem:[#allocation7 + $0x120] sm:$0xf0]  ;;  %v4265_v10 = vor.u32 %v4730_v6, %v4264_v5  ;;  %v3992_v17 = vld [vmem:[#allocation2 + $0x60] sm:$0xf]  ;;  %v3994_v23 = vld [vmem:[#allocation2 + $0x68] sm:$0xf0] }
  0x30   :  { %v4269_v11 = vor.u32 %v4726_v8, %v4266_v9  ;;  %v4658_v22 = vld [vmem:[#allocation2 + $0x64] sm:$0xf]  ;;  %v5223_v24 = vor.u32 %v4659_v19, %v3992_v17  ;;  %v4200_v28 = vld [vmem:[#allocation7 + $0x80] sm:$0xf]  ;;  %v4000_v52 = vld [vmem:[#allocation2 + $0x70] sm:$0xf] }
  0x31   :  { %426 = vmatpush.bf16.msra.mxu0 %v4679_v12  ;;  %v4232_v12 = vld [vmem:[#allocation7 + $0xc0] sm:$0xf]  ;;  %v5225_v25 = vor.u32 %v4658_v22, %v3994_v23  ;;  %v4710_v30 = vld [vmem:[#allocation7 + $0x84] sm:$0xf]  ;;  %v4661_v53 = vld [vmem:[#allocation2 + $0x74] sm:$0xf0] }
  0x32   :  { %515 = vmatpush.bf16.msra.mxu1 %v4687_v13  ;;  %1018 = vmatpush.bf16.msra.mxu2 %v4297_v3  ;;  %v4722_v13 = vld [vmem:[#allocation7 + $0xdc] sm:$0xf0]  ;;  %6944 = vst [vmem:[#allocation28_spill] sm:$0xff] %v5223_v24  ;;  %v4202_v34 = vld [vmem:[#allocation7 + $0xa0] sm:$0xf0]  ;;  %v5229_v56 = vor.u32 %v4661_v53, %v4000_v52 }
  0x33   :  { %1107 = vmatpush.bf16.msra.mxu3 %v4301_v7  ;;  %v4233_v16 = vor.u32 %v4722_v13, %v4232_v12  ;;  %6945 = vst [vmem:[#allocation29_spill] sm:$0xff] %v5225_v25  ;;  %v4714_v29 = vld [vmem:[#allocation7 + $0x9c] sm:$0xf0]  ;;  %v4205_v35 = vor.u32 %v4710_v30, %v4202_v34  ;;  %v4702_v40 = vld [vmem:[#allocation7 + $0x44] sm:$0xf] }
  0x34   :  { %v4201_v31 = vor.u32 %v4714_v29, %v4200_v28  ;;  %v4168_v36 = vld [vmem:[#allocation7 + $0x40] sm:$0xf]  ;;  %v4170_v42 = vld [vmem:[#allocation7 + $0x60] sm:$0xf0]  ;;  %v4660_v54 = vld [vmem:[#allocation2 + $0x74] sm:$0xf] }
  0x35   :  { %427 = vmatpush.bf16.msra.mxu0 %v4678_v14  ;;  %v4718_v14 = vld [vmem:[#allocation7 + $0xc4] sm:$0xf]  ;;  %v4706_v37 = vld [vmem:[#allocation7 + $0x5c] sm:$0xf0]  ;;  %v4173_v43 = vor.u32 %v4702_v40, %v4170_v42  ;;  %v4002_v55 = vld [vmem:[#allocation2 + $0x78] sm:$0xf0] }
  0x36   :  { %516 = vmatpush.bf16.msra.mxu1 %v4686_v15  ;;  %v4234_v15 = vld [vmem:[#allocation7 + $0xe0] sm:$0xf0]  ;;  %1019 = vmatpush.bf16.msra.mxu2 %v4265_v10  ;;  %v4169_v41 = vor.u32 %v4706_v37, %v4168_v36  ;;  %v4136_v46 = vld [vmem:[#allocation7] sm:$0xf]  ;;  %6946 = vst [vmem:[#allocation30_spill] sm:$0xff] %v5229_v56  ;;  %v5231_v57 = vor.u32 %v4660_v54, %v4002_v55 }
  0x37   :  { %1108 = vmatpush.bf16.msra.mxu3 %v4269_v11  ;;  %v4237_v18 = vor.u32 %v4718_v14, %v4234_v15  ;;  %v4698_v47 = vld [vmem:[#allocation7 + $0x1c] sm:$0xf0]  ;;  %v4694_v48 = vld [vmem:[#allocation7 + $0x4] sm:$0xf]  ;;  %v4663_v59 = vld [vmem:[#allocation2 + $0x84] sm:$0xf0] }
  0x38   :  { %428 = vmatmul.bf16.vlgmr.msra.gmra.mxu0 %v5187_v20  ;;  %v4137_v49 = vor.u32 %v4698_v47, %v4136_v46  ;;  %v4138_v50 = vld [vmem:[#allocation7 + $0x20] sm:$0xf0]  ;;  %6947 = vst [vmem:[#allocation31_spill] sm:$0xff] %v5231_v57  ;;  %v4008_v58 = vld [vmem:[#allocation2 + $0x80] sm:$0xf] }
  0x39   :  { %517 = vmatmul.bf16.vlgmr.msra.gmra.mxu1 %v5189_v21  ;;  %v4141_v51 = vor.u32 %v4694_v48, %v4138_v50  ;;  %v4662_v60 = vld [vmem:[#allocation2 + $0x84] sm:$0xf]  ;;  %v4010_v61 = vld [vmem:[#allocation2 + $0x88] sm:$0xf0]  ;;  %v5235_v0 = vor.u32 %v4663_v59, %v4008_v58  ;;  %v4016_v9 = vld [vmem:[#allocation2 + $0x90] sm:$0xf] }
  0x3a   :  { %1020 = vmatpush.bf16.msra.mxu2 %v4233_v16  ;;  %v5237_v1 = vor.u32 %v4662_v60, %v4010_v61  ;;  %v4665_v10 = vld [vmem:[#allocation2 + $0x94] sm:$0xf0]  ;;  %v4664_v11 = vld [vmem:[#allocation2 + $0x94] sm:$0xf]  ;;  %v4018_v12 = vld [vmem:[#allocation2 + $0x98] sm:$0xf0] }
  0x3b   :  { %1109 = vmatpush.bf16.msra.mxu3 %v4237_v18  ;;  %6948 = vst [vmem:[#allocation32_spill] sm:$0xff] %v5235_v0  ;;  %v5245_v13 = vor.u32 %v4665_v10, %v4016_v9  ;;  %v5247_v14 = vor.u32 %v4664_v11, %v4018_v12  ;;  %v4024_v28 = vld [vmem:[#allocation2 + $0xa0] sm:$0xf]  ;;  %v4667_v29 = vld [vmem:[#allocation2 + $0xa4] sm:$0xf0] }
  0x3c   :  { %6949 = vst [vmem:[#allocation33_spill] sm:$0xff] %v5237_v1  ;;  %v4666_v30 = vld [vmem:[#allocation2 + $0xa4] sm:$0xf]  ;;  %v5255_v34 = vor.u32 %v4667_v29, %v4024_v28  ;;  %v4032_v47 = vld [vmem:[#allocation2 + $0xb0] sm:$0xf] }
  0x3d   :  { %6950 = vst [vmem:[#allocation34_spill] sm:$0xff] %v5245_v13  ;;  %v4669_v48 = vld [vmem:[#allocation2 + $0xb4] sm:$0xf0]  ;;  %v4034_v50 = vld [vmem:[#allocation2 + $0xb8] sm:$0xf0] }
  0x3e   :  { %1021 = vmatpush.bf16.msra.mxu2 %v4201_v31  ;;  %6951 = vst [vmem:[#allocation35_spill] sm:$0xff] %v5247_v14  ;;  %v4026_v31 = vld [vmem:[#allocation2 + $0xa8] sm:$0xf0]  ;;  %v4368_v11 = vld [vmem:[#allocation7 + $0x1c8] sm:$0xf] }
  0x3f   :  { %1110 = vmatpush.bf16.msra.mxu3 %v4205_v35  ;;  %6952 = vst [vmem:[#allocation36_spill] sm:$0xff] %v5255_v34  ;;  %v5257_v35 = vor.u32 %v4666_v30, %v4026_v31  ;;  %v4755_v12 = vld [vmem:[#allocation7 + $0x1e4] sm:$0xf0]  ;;  %v4743_v28 = vld [vmem:[#allocation7 + $0x18c] sm:$0xf] }
  0x40   :  { %v4338_v30 = vld [vmem:[#allocation7 + $0x1a8] sm:$0xf0] }
  0x41   :  { %6953 = vst [vmem:[#allocation37_spill] sm:$0xff] %v5257_v35  ;;  %v4341_v31 = vor.u32 %v4743_v28, %v4338_v30  ;;  %v4715_v30 = vld [vmem:[#allocation7 + $0xa4] sm:$0xf0] }
  0x42   :  { %1022 = vmatpush.bf16.msra.mxu2 %v4169_v41 }
  0x43   :  { %1111 = vmatpush.bf16.msra.mxu3 %v4173_v43 }
  0x46   :  { %1023 = vmatpush.bf16.msra.mxu2 %v4137_v49  ;;  %v4668_v49 = vld [vmem:[#allocation2 + $0xb4] sm:$0xf] }
  0x47   :  { %1112 = vmatpush.bf16.msra.mxu3 %v4141_v51  ;;  %v5265_v51 = vor.u32 %v4669_v48, %v4032_v47  ;;  %v5267_v52 = vor.u32 %v4668_v49, %v4034_v50  ;;  %v4735_v47 = vld [vmem:[#allocation7 + $0x14c] sm:$0xf] }
  0x48   :  { %433 = vmatmul.bf16.gmra.mxu0 %v5193_v26  ;;  %v4306_v49 = vld [vmem:[#allocation7 + $0x168] sm:$0xf0] }
  0x49   :  { %522 = vmatmul.bf16.gmra.mxu1 %v5195_v27  ;;  %6954 = vst [vmem:[#allocation38_spill] sm:$0xff] %v5265_v51 }
  0x4a   :  { %6955 = vst [vmem:[#allocation39_spill] sm:$0xff] %v5267_v52 }
  0x58   :  { %438 = vmatmul.bf16.gmra.mxu0 %v5199_v32 }
  0x59   :  { %527 = vmatmul.bf16.gmra.mxu1 %v5201_v33 }
  0x68   :  { %443 = vmatmul.bf16.gmra.mxu0 %v5205_v38 }
  0x69   :  { %532 = vmatmul.bf16.gmra.mxu1 %v5207_v39 }
  0x78   :  { %448 = vmatmul.bf16.gmra.mxu0 %v5211_v44 }
  0x79   :  { %537 = vmatmul.bf16.gmra.mxu1 %v5213_v45  ;;  %v4248_v45 = vld [vmem:[#allocation7 + $0xd0] sm:$0xf] }
  0x88   :  { %453 = vmatmul.bf16.gmra.mxu0 %v5217_v62 }
  0x89   :  { %542 = vmatmul.bf16.gmra.mxu1 %v5219_v63 }
  0x98   :  { %458 = vmatmul.bf16.gmra.mxu0 %v5223_v24 }
  0x99   :  { %547 = vmatmul.bf16.gmra.mxu1 %v5225_v25 }
  0xa8   :  { %463 = vmatmul.bf16.gmra.mxu0 %v5229_v56 }
  0xa9   :  { %552 = vmatmul.bf16.gmra.mxu1 %v5231_v57 }
  0xb5   :  { %v429_v2 = vpop.f32.mrf.mxu0 }
  0xb6   :  { %v518_v3 = vpop.f32.mrf.mxu1 }
  0xb7   :  { %v519_v6 = vadd.f32 %v518_v3, %v429_v2  ;;  %v4040_v2 = vld [vmem:[#allocation2 + $0xc0] sm:$0xf]  ;;  %v4671_v3 = vld [vmem:[#allocation2 + $0xc4] sm:$0xf0] }
  0xb8   :  { %468 = vmatmul.bf16.gmra.mxu0 %v5235_v0 }
  0xb9   :  { %557 = vmatmul.bf16.gmra.mxu1 %v5237_v1 }
  0xbd   :  { %v431_v4 = vpop.f32.mrf.mxu0 }
  0xbe   :  { %v520_v5 = vpop.f32.mrf.mxu1 }
  0xbf   :  { %v521_v7 = vadd.f32 %v520_v5, %v431_v4  ;;  %v4670_v4 = vld [vmem:[#allocation2 + $0xc4] sm:$0xf]  ;;  %v4042_v5 = vld [vmem:[#allocation2 + $0xc8] sm:$0xf0] }
  0xc1   :  { %v5241_v8 = vpack.c.bf16 %v521_v7, %v519_v6  ;;  %v5275_v6 = vor.u32 %v4671_v3, %v4040_v2  ;;  %v5277_v7 = vor.u32 %v4670_v4, %v4042_v5  ;;  %v4731_v2 = vld [vmem:[#allocation7 + $0x124] sm:$0xf0]  ;;  %v4727_v3 = vld [vmem:[#allocation7 + $0x10c] sm:$0xf] }
  0xc2   :  { %v4274_v5 = vld [vmem:[#allocation7 + $0x128] sm:$0xf0] }
  0xc3   :  { %1024 = vmatmul.bf16.vlgmr.msra.gmra.mxu2 %v5241_v8  ;;  %1113 = vmatmul.bf16.vlgmr.msra.gmra.mxu3 %v5241_v8  ;;  %6956 = vst [vmem:[#allocation40_spill] sm:$0xff] %v5275_v6 }
  0xc4   :  { %6957 = vst [vmem:[#allocation41_spill] sm:$0xff] %v5277_v7 }
  0xc5   :  { %v434_v15 = vpop.f32.mrf.mxu0 }
  0xc6   :  { %v523_v16 = vpop.f32.mrf.mxu1 }
  0xc7   :  { %v524_v19 = vadd.f32 %v523_v16, %v434_v15  ;;  %v4369_v15 = vor.u32 %v4755_v12, %v4368_v11  ;;  %v4751_v16 = vld [vmem:[#allocation7 + $0x1cc] sm:$0xf]  ;;  %v4277_v11 = vor.u32 %v4727_v3, %v4274_v5  ;;  %v4674_v3 = vld [vmem:[#allocation2 + $0xe4] sm:$0xf]  ;;  %v4144_v5 = vld [vmem:[#allocation7 + $0x8] sm:$0xf] }
  0xc8   :  { %473 = vmatmul.bf16.gmra.mxu0 %v5245_v13 }
  0xc9   :  { %562 = vmatmul.bf16.gmra.mxu1 %v5247_v14  ;;  %1194 = vmatpush.bf16.msrb.mxu0 %v4369_v15 }
  0xcd   :  { %v436_v17 = vpop.f32.mrf.mxu0 }
  0xce   :  { %v525_v18 = vpop.f32.mrf.mxu1 }
  0xcf   :  { %v526_v22 = vadd.f32 %v525_v18, %v436_v17  ;;  %v4370_v17 = vld [vmem:[#allocation7 + $0x1e8] sm:$0xf0] }
  0xd0   :  { %v4373_v18 = vor.u32 %v4751_v16, %v4370_v17  ;;  %v4240_v16 = vld [vmem:[#allocation7 + $0xc8] sm:$0xf] }
  0xd1   :  { %v5251_v23 = vpack.c.bf16 %v526_v22, %v524_v19  ;;  %v4336_v19 = vld [vmem:[#allocation7 + $0x188] sm:$0xf] }
  0xd2   :  { %1283 = vmatpush.bf16.msrb.mxu1 %v4373_v18  ;;  %v4747_v22 = vld [vmem:[#allocation7 + $0x1a4] sm:$0xf0] }
  0xd3   :  { %1029 = vmatmul.bf16.gmra.mxu2 %v5251_v23  ;;  %1118 = vmatmul.bf16.gmra.mxu3 %v5251_v23  ;;  %v4337_v29 = vor.u32 %v4747_v22, %v4336_v19  ;;  %v4723_v17 = vld [vmem:[#allocation7 + $0xe4] sm:$0xf0]  ;;  %v4719_v19 = vld [vmem:[#allocation7 + $0xcc] sm:$0xf] }
  0xd4   :  { %v4241_v18 = vor.u32 %v4723_v17, %v4240_v16  ;;  %v4242_v22 = vld [vmem:[#allocation7 + $0xe8] sm:$0xf0] }
  0xd5   :  { %v439_v36 = vpop.f32.mrf.mxu0  ;;  %1195 = vmatpush.bf16.msrb.mxu0 %v4337_v29  ;;  %v4245_v28 = vor.u32 %v4719_v19, %v4242_v22  ;;  %v4208_v29 = vld [vmem:[#allocation7 + $0x88] sm:$0xf]  ;;  %v4146_v16 = vld [vmem:[#allocation7 + $0x28] sm:$0xf0] }
  0xd6   :  { %v528_v37 = vpop.f32.mrf.mxu1  ;;  %1284 = vmatpush.bf16.msrb.mxu1 %v4341_v31  ;;  %v4711_v31 = vld [vmem:[#allocation7 + $0x8c] sm:$0xf] }
  0xd7   :  { %v529_v42 = vadd.f32 %v528_v37, %v439_v36 }
  0xd8   :  { %478 = vmatmul.bf16.gmra.mxu0 %v5255_v34 }
  0xd9   :  { %567 = vmatmul.bf16.gmra.mxu1 %v5257_v35 }
  0xdd   :  { %v441_v40 = vpop.f32.mrf.mxu0 }
  0xde   :  { %v530_v41 = vpop.f32.mrf.mxu1 }
  0xdf   :  { %v531_v43 = vadd.f32 %v530_v41, %v441_v40 }
  0xe1   :  { %v5261_v46 = vpack.c.bf16 %v531_v43, %v529_v42  ;;  %v4304_v42 = vld [vmem:[#allocation7 + $0x148] sm:$0xf] }
  0xe2   :  { %v4739_v43 = vld [vmem:[#allocation7 + $0x164] sm:$0xf0] }
  0xe3   :  { %1034 = vmatmul.bf16.gmra.mxu2 %v5261_v46  ;;  %1123 = vmatmul.bf16.gmra.mxu3 %v5261_v46  ;;  %v4305_v48 = vor.u32 %v4739_v43, %v4304_v42 }
  0xe5   :  { %v444_v53 = vpop.f32.mrf.mxu0  ;;  %1196 = vmatpush.bf16.msrb.mxu0 %v4305_v48  ;;  %v4176_v48 = vld [vmem:[#allocation7 + $0x48] sm:$0xf] }
  0xe6   :  { %v533_v54 = vpop.f32.mrf.mxu1 }
  0xe7   :  { %v534_v59 = vadd.f32 %v533_v54, %v444_v53  ;;  %v4048_v53 = vld [vmem:[#allocation2 + $0xd0] sm:$0xf]  ;;  %v4309_v54 = vor.u32 %v4735_v47, %v4306_v49  ;;  %v4707_v49 = vld [vmem:[#allocation7 + $0x64] sm:$0xf0] }
  0xe8   :  { %483 = vmatmul.bf16.gmra.mxu0 %v5265_v51 }
  0xe9   :  { %572 = vmatmul.bf16.gmra.mxu1 %v5267_v52 }
  0xea   :  { %1285 = vmatpush.bf16.msrb.mxu1 %v4309_v54  ;;  %v4177_v54 = vor.u32 %v4707_v49, %v4176_v48 }
  0xed   :  { %v446_v55 = vpop.f32.mrf.mxu0 }
  0xee   :  { %v535_v58 = vpop.f32.mrf.mxu1  ;;  %1286 = vmatpush.bf16.msrb.mxu1 %v4277_v11  ;;  %v4699_v11 = vld [vmem:[#allocation7 + $0x24] sm:$0xf0] }
  0xef   :  { %v536_v60 = vadd.f32 %v535_v58, %v446_v55  ;;  %v4673_v55 = vld [vmem:[#allocation2 + $0xd4] sm:$0xf0]  ;;  %v4672_v58 = vld [vmem:[#allocation2 + $0xd4] sm:$0xf] }
  0xf1   :  { %v5271_v61 = vpack.c.bf16 %v536_v60, %v534_v59  ;;  %v4050_v59 = vld [vmem:[#allocation2 + $0xd8] sm:$0xf0]  ;;  %v4272_v60 = vld [vmem:[#allocation7 + $0x108] sm:$0xf] }
  0xf2   :  { %v4273_v4 = vor.u32 %v4731_v2, %v4272_v60  ;;  %1287 = vmatpush.bf16.msrb.mxu1 %v4245_v28  ;;  %v4675_v2 = vld [vmem:[#allocation2 + $0xe4] sm:$0xf0] }
  0xf3   :  { %1039 = vmatmul.bf16.gmra.mxu2 %v5271_v61  ;;  %1128 = vmatmul.bf16.gmra.mxu3 %v5271_v61 }
  0xf4   :  { %1197 = vmatpush.bf16.msrb.mxu0 %v4273_v4  ;;  %v4058_v4 = vld [vmem:[#allocation2 + $0xe8] sm:$0xf0] }
  0xf5   :  { %v449_v9 = vpop.f32.mrf.mxu0 }
  0xf6   :  { %v538_v10 = vpop.f32.mrf.mxu1 }
  0xf7   :  { %v539_v40 = vadd.f32 %v538_v10, %v449_v9  ;;  %v5285_v9 = vor.u32 %v4673_v55, %v4048_v53  ;;  %v5287_v10 = vor.u32 %v4672_v58, %v4050_v59  ;;  %v4703_v53 = vld [vmem:[#allocation7 + $0x4c] sm:$0xf]  ;;  %v4056_v59 = vld [vmem:[#allocation2 + $0xe0] sm:$0xf] }
  0xf8   :  { %488 = vmatmul.bf16.gmra.mxu0 %v5275_v6  ;;  %v4178_v55 = vld [vmem:[#allocation7 + $0x68] sm:$0xf0]  ;;  %v5295_v17 = vor.u32 %v4675_v2, %v4056_v59 }
  0xf9   :  { %577 = vmatmul.bf16.gmra.mxu1 %v5277_v7  ;;  %6958 = vst [vmem:[#allocation42_spill] sm:$0xff] %v5285_v9  ;;  %1198 = vmatpush.bf16.msrb.mxu0 %v4241_v18  ;;  %v4181_v60 = vor.u32 %v4703_v53, %v4178_v55  ;;  %v5297_v18 = vor.u32 %v4674_v3, %v4058_v4 }
  0xfa   :  { %6959 = vst [vmem:[#allocation43_spill] sm:$0xff] %v5287_v10 }
  0xfb   :  { %6960 = vst [vmem:[#allocation44_spill] sm:$0xff] %v5295_v17 }
  0xfc   :  { %6961 = vst [vmem:[#allocation45_spill] sm:$0xff] %v5297_v18 }
  0xfd   :  { %v451_v36 = vpop.f32.mrf.mxu0 }
  0xfe   :  { %v540_v37 = vpop.f32.mrf.mxu1 }
  0xff   :  { %v541_v41 = vadd.f32 %v540_v37, %v451_v36  ;;  %v4209_v36 = vor.u32 %v4715_v30, %v4208_v29  ;;  %v4210_v37 = vld [vmem:[#allocation7 + $0xa8] sm:$0xf0] }
 0x101   :  { %v5281_v50 = vpack.c.bf16 %v541_v41, %v539_v40  ;;  %v4213_v40 = vor.u32 %v4711_v31, %v4210_v37  ;;  %1199 = vmatpush.bf16.msrb.mxu0 %v4209_v36 }
 0x103   :  { %1044 = vmatmul.bf16.gmra.mxu2 %v5281_v50  ;;  %1133 = vmatmul.bf16.gmra.mxu3 %v5281_v50 }
 0x104   :  { %1288 = vmatpush.bf16.msrb.mxu1 %v4213_v40  ;;  %v4064_v40 = vld [vmem:[#allocation2 + $0xf0] sm:$0xf] }
 0x105   :  { %v454_v12 = vpop.f32.mrf.mxu0  ;;  %1200 = vmatpush.bf16.msrb.mxu0 %v4177_v54 }
 0x106   :  { %v543_v15 = vpop.f32.mrf.mxu1 }
 0x107   :  { %v544_v43 = vadd.f32 %v543_v15, %v454_v12  ;;  %v4695_v12 = vld [vmem:[#allocation7 + $0xc] sm:$0xf]  ;;  %v4145_v15 = vor.u32 %v4699_v11, %v4144_v5 }
 0x108   :  { %493 = vmatmul.bf16.gmra.mxu0 %v5285_v9  ;;  %1289 = vmatpush.bf16.msrb.mxu1 %v4181_v60  ;;  %v4149_v19 = vor.u32 %v4695_v12, %v4146_v16  ;;  %v4346_v9 = vld [vmem:[#allocation7 + $0x1b0] sm:$0xf0] }
 0x109   :  { %582 = vmatmul.bf16.gmra.mxu1 %v5287_v10  ;;  %1201 = vmatpush.bf16.msrb.mxu0 %v4145_v15 }
 0x10c   :  { %1290 = vmatpush.bf16.msrb.mxu1 %v4149_v19 }
 0x10d   :  { %v456_v41 = vpop.f32.mrf.mxu0 }
 0x10e   :  { %v545_v42 = vpop.f32.mrf.mxu1 }
 0x10f   :  { %v546_v47 = vadd.f32 %v545_v42, %v456_v41  ;;  %v4677_v41 = vld [vmem:[#allocation2 + $0xf4] sm:$0xf0]  ;;  %v4676_v42 = vld [vmem:[#allocation2 + $0xf4] sm:$0xf] }
 0x111   :  { %v5291_v58 = vpack.c.bf16 %v546_v47, %v544_v43  ;;  %v4066_v43 = vld [vmem:[#allocation2 + $0xf8] sm:$0xf0]  ;;  %v5305_v47 = vor.u32 %v4677_v41, %v4064_v40 }
 0x112   :  { %v5307_v48 = vor.u32 %v4676_v42, %v4066_v43 }
 0x113   :  { %1049 = vmatmul.bf16.gmra.mxu2 %v5291_v58  ;;  %1138 = vmatmul.bf16.gmra.mxu3 %v5291_v58  ;;  %6962 = vst [vmem:[#allocation46_spill] sm:$0xff] %v5305_v47 }
 0x114   :  { %6963 = vst [vmem:[#allocation47_spill] sm:$0xff] %v5307_v48 }
 0x115   :  { %v459_v22 = vpop.f32.mrf.mxu0 }
 0x116   :  { %v548_v28 = vpop.f32.mrf.mxu1 }
 0x117   :  { %v549_v31 = vadd.f32 %v548_v28, %v459_v22  ;;  %v5321_v28 = vld [vmem:[#allocation8] sm:$0xff] }
 0x118   :  { %498 = vmatmul.bf16.gmra.mxu0 %v5295_v17  ;;  %v4376_v17 = vld [vmem:[#allocation7 + $0x1d0] sm:$0xf] }
 0x119   :  { %587 = vmatmul.bf16.gmra.mxu1 %v5297_v18 }
 0x11d   :  { %v461_v29 = vpop.f32.mrf.mxu0 }
 0x11e   :  { %v550_v30 = vpop.f32.mrf.mxu1 }
 0x11f   :  { %v551_v36 = vadd.f32 %v550_v30, %v461_v29 }
 0x121   :  { %v5301_v37 = vpack.c.bf16 %v551_v36, %v549_v31  ;;  %v5326_v31 = vperm.slane %v5321_v28, 0  ;;  %v5329_v36 = vperm.slane %v5321_v28, 1 }
 0x123   :  { %1054 = vmatmul.bf16.gmra.mxu2 %v5301_v37  ;;  %1143 = vmatmul.bf16.gmra.mxu3 %v5301_v37 }
 0x125   :  { %v464_v49 = vpop.f32.mrf.mxu0 }
 0x126   :  { %v553_v53 = vpop.f32.mrf.mxu1 }
 0x127   :  { %v554_v59 = vadd.f32 %v553_v53, %v464_v49 }
 0x128   :  { %503 = vmatmul.bf16.gmra.mxu0 %v5305_v47 }
 0x129   :  { %592 = vmatmul.bf16.gmra.mxu1 %v5307_v48 }
 0x12d   :  { %v466_v54 = vpop.f32.mrf.mxu0 }
 0x12e   :  { %v555_v55 = vpop.f32.mrf.mxu1 }
 0x12f   :  { %v556_v60 = vadd.f32 %v555_v55, %v466_v54 }
 0x131   :  { %v5311_v2 = vpack.c.bf16 %v556_v60, %v554_v59 }
 0x133   :  { %1059 = vmatmul.bf16.gmra.mxu2 %v5311_v2  ;;  %1148 = vmatmul.bf16.gmra.mxu3 %v5311_v2 }
 0x135   :  { %v469_v3 = vpop.f32.mrf.mxu0 }
 0x136   :  { %v558_v4 = vpop.f32.mrf.mxu1 }
 0x137   :  { %v559_v12 = vadd.f32 %v558_v4, %v469_v3 }
 0x138   :  { %1202 = vmatmul.bf16.vlgmr.msrb.gmra.mxu0 %v5241_v8 }
 0x139   :  { %1291 = vmatmul.bf16.vlgmr.msrb.gmra.mxu1 %v5241_v8 }
 0x13d   :  { %v471_v5 = vpop.f32.mrf.mxu0 }
 0x13e   :  { %v560_v11 = vpop.f32.mrf.mxu1 }
 0x13f   :  { %v561_v15 = vadd.f32 %v560_v11, %v471_v5 }
 0x141   :  { %v5317_v16 = vpack.c.bf16 %v561_v15, %v559_v12 }
 0x143   :  { %1064 = vmatmul.bf16.gmra.mxu2 %v5317_v16  ;;  %1153 = vmatmul.bf16.gmra.mxu3 %v5317_v16 }
 0x145   :  { %v474_v19 = vpop.f32.mrf.mxu0 }
 0x146   :  { %v563_v22 = vpop.f32.mrf.mxu1  ;;  %v1025_v29 = vpop.f32.mrf.mxu2 }
 0x147   :  { %v1114_v30 = vpop.f32.mrf.mxu3  ;;  %v1026_v40 = vadd.f32 %v1025_v29, %v5326_v31  ;;  %v564_v49 = vadd.f32 %v563_v22, %v474_v19 }
 0x148   :  { %1207 = vmatmul.bf16.gmra.mxu0 %v5251_v23  ;;  %v1115_v41 = vadd.f32 %v1114_v30, %v5329_v36 }
 0x149   :  { %1296 = vmatmul.bf16.gmra.mxu1 %v5251_v23  ;;  %v1728_v4 = vmax.f32 %v1026_v40, 0.0 }
 0x14a   :  { %v1729_v5 = vmax.f32 %v1115_v41, 0.0 }
 0x14d   :  { %v476_v42 = vpop.f32.mrf.mxu0 }
 0x14e   :  { %v565_v43 = vpop.f32.mrf.mxu1  ;;  %v1027_v54 = vpop.f32.mrf.mxu2 }
 0x14f   :  { %v566_v53 = vadd.f32 %v565_v43, %v476_v42  ;;  %v1116_v55 = vpop.f32.mrf.mxu3  ;;  %v1028_v59 = vadd.f32 %v1027_v54, %v5326_v31 }
 0x150   :  { %v1117_v60 = vadd.f32 %v1116_v55, %v5329_v36 }
 0x151   :  { %v5335_v3 = vpack.c.bf16 %v566_v53, %v564_v49  ;;  %v1736_v11 = vmax.f32 %v1028_v59, 0.0 }
 0x152   :  { %v1737_v12 = vmax.f32 %v1117_v60, 0.0 }
 0x153   :  { %1069 = vmatmul.bf16.gmra.mxu2 %v5335_v3  ;;  %1158 = vmatmul.bf16.gmra.mxu3 %v5335_v3  ;;  %v5339_v15 = vpack.c.bf16 %v1736_v11, %v1728_v4 }
 0x154   :  { %v5341_v19 = vpack.c.bf16 %v1737_v12, %v1729_v5 }
 0x155   :  { %v479_v22 = vpop.f32.mrf.mxu0 }
 0x156   :  { %v568_v29 = vpop.f32.mrf.mxu1  ;;  %v1030_v30 = vpop.f32.mrf.mxu2 }
 0x157   :  { %v1119_v42 = vpop.f32.mrf.mxu3  ;;  %v1031_v40 = vadd.f32 %v1030_v30, %v5326_v31  ;;  %v569_v53 = vadd.f32 %v568_v29, %v479_v22 }
 0x158   :  { %1212 = vmatmul.bf16.gmra.mxu0 %v5261_v46  ;;  %v1120_v41 = vadd.f32 %v1119_v42, %v5329_v36 }
 0x159   :  { %1301 = vmatmul.bf16.gmra.mxu1 %v5261_v46  ;;  %v1744_v11 = vmax.f32 %v1031_v40, 0.0 }
 0x15a   :  { %v1745_v12 = vmax.f32 %v1120_v41, 0.0 }
 0x15d   :  { %v481_v43 = vpop.f32.mrf.mxu0 }
 0x15e   :  { %v570_v49 = vpop.f32.mrf.mxu1  ;;  %v1032_v55 = vpop.f32.mrf.mxu2 }
 0x15f   :  { %v571_v54 = vadd.f32 %v570_v49, %v481_v43  ;;  %v1121_v59 = vpop.f32.mrf.mxu3  ;;  %v1033_v60 = vadd.f32 %v1032_v55, %v5326_v31 }
 0x160   :  { %v1122_v4 = vadd.f32 %v1121_v59, %v5329_v36 }
 0x161   :  { %v5349_v5 = vpack.c.bf16 %v571_v54, %v569_v53  ;;  %v1752_v48 = vmax.f32 %v1033_v60, 0.0 }
 0x162   :  { %v1753_v18 = vmax.f32 %v1122_v4, 0.0 }
 0x163   :  { %1074 = vmatmul.bf16.gmra.mxu2 %v5349_v5  ;;  %1163 = vmatmul.bf16.gmra.mxu3 %v5349_v5  ;;  %v5353_v30 = vpack.c.bf16 %v1752_v48, %v1744_v11 }
 0x164   :  { %v5355_v22 = vpack.c.bf16 %v1753_v18, %v1745_v12 }
 0x165   :  { %v484_v29 = vpop.f32.mrf.mxu0 }
 0x166   :  { %v573_v42 = vpop.f32.mrf.mxu1  ;;  %v1035_v43 = vpop.f32.mrf.mxu2 }
 0x167   :  { %v1124_v49 = vpop.f32.mrf.mxu3  ;;  %v1036_v40 = vadd.f32 %v1035_v43, %v5326_v31  ;;  %v574_v55 = vadd.f32 %v573_v42, %v484_v29 }
 0x168   :  { %1217 = vmatmul.bf16.gmra.mxu0 %v5271_v61  ;;  %v1125_v41 = vadd.f32 %v1124_v49, %v5329_v36 }
 0x169   :  { %1306 = vmatmul.bf16.gmra.mxu1 %v5271_v61  ;;  %v1760_v12 = vmax.f32 %v1036_v40, 0.0 }
 0x16a   :  { %v1761_v10 = vmax.f32 %v1125_v41, 0.0 }
 0x16d   :  { %v486_v53 = vpop.f32.mrf.mxu0 }
 0x16e   :  { %v575_v54 = vpop.f32.mrf.mxu1  ;;  %v1037_v48 = vpop.f32.mrf.mxu2 }
 0x16f   :  { %v576_v59 = vadd.f32 %v575_v54, %v486_v53  ;;  %v1126_v60 = vpop.f32.mrf.mxu3  ;;  %v1038_v18 = vadd.f32 %v1037_v48, %v5326_v31 }
 0x170   :  { %v1127_v4 = vadd.f32 %v1126_v60, %v5329_v36 }
 0x171   :  { %v5363_v11 = vpack.c.bf16 %v576_v59, %v574_v55  ;;  %v1768_v7 = vmax.f32 %v1038_v18, 0.0 }
 0x172   :  { %v1769_v52 = vmax.f32 %v1127_v4, 0.0 }
 0x173   :  { %1079 = vmatmul.bf16.gmra.mxu2 %v5363_v11  ;;  %1168 = vmatmul.bf16.gmra.mxu3 %v5363_v11  ;;  %v5367_v43 = vpack.c.bf16 %v1768_v7, %v1760_v12 }
 0x174   :  { %v5369_v29 = vpack.c.bf16 %v1769_v52, %v1761_v10 }
 0x175   :  { %v489_v42 = vpop.f32.mrf.mxu0 }
 0x176   :  { %v578_v49 = vpop.f32.mrf.mxu1  ;;  %v1040_v53 = vpop.f32.mrf.mxu2 }
 0x177   :  { %v1129_v54 = vpop.f32.mrf.mxu3  ;;  %v1041_v40 = vadd.f32 %v1040_v53, %v5326_v31  ;;  %v579_v48 = vadd.f32 %v578_v49, %v489_v42  ;;  %v4756_v53 = vld [vmem:[#allocation7 + $0x1ec] sm:$0xf0]  ;;  %v4752_v49 = vld [vmem:[#allocation7 + $0x1d4] sm:$0xf] }
 0x178   :  { %1222 = vmatmul.bf16.gmra.mxu0 %v5281_v50  ;;  %v1130_v41 = vadd.f32 %v1129_v54, %v5329_v36  ;;  %v4377_v42 = vor.u32 %v4756_v53, %v4376_v17  ;;  %v4378_v54 = vld [vmem:[#allocation7 + $0x1f0] sm:$0xf0]  ;;  %v4740_v17 = vld [vmem:[#allocation7 + $0x16c] sm:$0xf0] }
 0x179   :  { %1311 = vmatmul.bf16.gmra.mxu1 %v5281_v50  ;;  %v1776_v4 = vmax.f32 %v1041_v40, 0.0 }
 0x17a   :  { %v1777_v12 = vmax.f32 %v1130_v41, 0.0  ;;  %1372 = vmatpush.bf16.msrb.mxu2 %v4377_v42 }
 0x17d   :  { %v491_v55 = vpop.f32.mrf.mxu0 }
 0x17e   :  { %v580_v59 = vpop.f32.mrf.mxu1  ;;  %v1042_v7 = vpop.f32.mrf.mxu2 }
 0x17f   :  { %v581_v60 = vadd.f32 %v580_v59, %v491_v55  ;;  %v1131_v18 = vpop.f32.mrf.mxu3  ;;  %v1043_v52 = vadd.f32 %v1042_v7, %v5326_v31  ;;  %v4381_v55 = vor.u32 %v4752_v49, %v4378_v54 }
 0x180   :  { %v1132_v10 = vadd.f32 %v1131_v18, %v5329_v36  ;;  %v4744_v18 = vld [vmem:[#allocation7 + $0x194] sm:$0xf] }
 0x181   :  { %v5377_v35 = vpack.c.bf16 %v581_v60, %v579_v48  ;;  %v1784_v47 = vmax.f32 %v1043_v52, 0.0  ;;  %1461 = vmatpush.bf16.msrb.mxu3 %v4381_v55  ;;  %v4344_v48 = vld [vmem:[#allocation7 + $0x190] sm:$0xf]  ;;  %v4349_v57 = vor.u32 %v4744_v18, %v4346_v9 }
 0x182   :  { %v1785_v14 = vmax.f32 %v1132_v10, 0.0  ;;  %v4748_v60 = vld [vmem:[#allocation7 + $0x1ac] sm:$0xf0] }
 0x183   :  { %1084 = vmatmul.bf16.gmra.mxu2 %v5377_v35  ;;  %1173 = vmatmul.bf16.gmra.mxu3 %v5377_v35  ;;  %v5381_v59 = vpack.c.bf16 %v1784_v47, %v1776_v4  ;;  %v4345_v1 = vor.u32 %v4748_v60, %v4344_v48  ;;  %v4736_v4 = vld [vmem:[#allocation7 + $0x154] sm:$0xf]  ;;  %v4280_v9 = vld [vmem:[#allocation7 + $0x110] sm:$0xf] }
 0x184   :  { %v5383_v7 = vpack.c.bf16 %v1785_v14, %v1777_v12  ;;  %v4312_v14 = vld [vmem:[#allocation7 + $0x150] sm:$0xf]  ;;  %v4314_v12 = vld [vmem:[#allocation7 + $0x170] sm:$0xf0] }
 0x185   :  { %v494_v40 = vpop.f32.mrf.mxu0  ;;  %1373 = vmatpush.bf16.msrb.mxu2 %v4345_v1  ;;  %1462 = vmatpush.bf16.msrb.mxu3 %v4349_v57  ;;  %v4313_v47 = vor.u32 %v4740_v17, %v4312_v14  ;;  %v4317_v53 = vor.u32 %v4736_v4, %v4314_v12  ;;  %v4732_v48 = vld [vmem:[#allocation7 + $0x12c] sm:$0xf0]  ;;  %v4728_v60 = vld [vmem:[#allocation7 + $0x114] sm:$0xf] }
 0x186   :  { %v583_v41 = vpop.f32.mrf.mxu1  ;;  %v1045_v52 = vpop.f32.mrf.mxu2  ;;  %v4281_v25 = vor.u32 %v4732_v48, %v4280_v9  ;;  %v4282_v14 = vld [vmem:[#allocation7 + $0x130] sm:$0xf0] }
 0x187   :  { %v1134_v10 = vpop.f32.mrf.mxu3  ;;  %v1046_v42 = vadd.f32 %v1045_v52, %v5326_v31  ;;  %v584_v18 = vadd.f32 %v583_v41, %v494_v40  ;;  %v4285_v52 = vor.u32 %v4728_v60, %v4282_v14  ;;  %v4724_v40 = vld [vmem:[#allocation7 + $0xec] sm:$0xf0]  ;;  %v4712_v14 = vld [vmem:[#allocation7 + $0x94] sm:$0xf] }
 0x188   :  { %1227 = vmatmul.bf16.gmra.mxu0 %v5291_v58  ;;  %v1135_v49 = vadd.f32 %v1134_v10, %v5329_v36  ;;  %v4249_v41 = vor.u32 %v4724_v40, %v4248_v45  ;;  %v4716_v60 = vld [vmem:[#allocation7 + $0xac] sm:$0xf0] }
 0x189   :  { %1316 = vmatmul.bf16.gmra.mxu1 %v5291_v58  ;;  %1374 = vmatpush.bf16.msrb.mxu2 %v4313_v47  ;;  %v1792_v12 = vmax.f32 %v1046_v42, 0.0  ;;  %v4184_v45 = vld [vmem:[#allocation7 + $0x50] sm:$0xf] }
 0x18a   :  { %1463 = vmatpush.bf16.msrb.mxu3 %v4317_v53  ;;  %v1793_v10 = vmax.f32 %v1135_v49, 0.0 }
 0x18d   :  { %v496_v54 = vpop.f32.mrf.mxu0  ;;  %1375 = vmatpush.bf16.msrb.mxu2 %v4281_v25  ;;  %v4216_v25 = vld [vmem:[#allocation7 + $0x90] sm:$0xf] }
 0x18e   :  { %v585_v55 = vpop.f32.mrf.mxu1  ;;  %v1047_v57 = vpop.f32.mrf.mxu2  ;;  %1464 = vmatpush.bf16.msrb.mxu3 %v4285_v52  ;;  %v4708_v52 = vld [vmem:[#allocation7 + $0x6c] sm:$0xf0] }
 0x18f   :  { %v586_v1 = vadd.f32 %v585_v55, %v496_v54  ;;  %v1136_v6 = vpop.f32.mrf.mxu3  ;;  %v1048_v17 = vadd.f32 %v1047_v57, %v5326_v31  ;;  %v4720_v54 = vld [vmem:[#allocation7 + $0xd4] sm:$0xf]  ;;  %v4217_v57 = vor.u32 %v4716_v60, %v4216_v25  ;;  %v4700_v25 = vld [vmem:[#allocation7 + $0x2c] sm:$0xf0] }
 0x190   :  { %v1137_v4 = vadd.f32 %v1136_v6, %v5329_v36  ;;  %v4250_v55 = vld [vmem:[#allocation7 + $0xf0] sm:$0xf0] }
 0x191   :  { %v5391_v63 = vpack.c.bf16 %v586_v1, %v584_v18  ;;  %v1800_v47 = vmax.f32 %v1048_v17, 0.0  ;;  %v4253_v9 = vor.u32 %v4720_v54, %v4250_v55  ;;  %1376 = vmatpush.bf16.msrb.mxu2 %v4249_v41  ;;  %v4218_v17 = vld [vmem:[#allocation7 + $0xb0] sm:$0xf0] }
 0x192   :  { %v1801_v53 = vmax.f32 %v1137_v4, 0.0  ;;  %v4221_v4 = vor.u32 %v4712_v14, %v4218_v17  ;;  %v4696_v60 = vld [vmem:[#allocation7 + $0x14] sm:$0xf] }
 0x193   :  { %1089 = vmatmul.bf16.gmra.mxu2 %v5391_v63  ;;  %1178 = vmatmul.bf16.gmra.mxu3 %v5391_v63  ;;  %v5395_v6 = vpack.c.bf16 %v1800_v47, %v1792_v12  ;;  %v4185_v12 = vor.u32 %v4708_v52, %v4184_v45  ;;  %v4186_v47 = vld [vmem:[#allocation7 + $0x70] sm:$0xf0] }
 0x194   :  { %v5397_v42 = vpack.c.bf16 %v1801_v53, %v1793_v10  ;;  %1465 = vmatpush.bf16.msrb.mxu3 %v4253_v9  ;;  %v4704_v10 = vld [vmem:[#allocation7 + $0x54] sm:$0xf]  ;;  %v4152_v9 = vld [vmem:[#allocation7 + $0x10] sm:$0xf] }
 0x195   :  { %v499_v49 = vpop.f32.mrf.mxu0  ;;  %1377 = vmatpush.bf16.msrb.mxu2 %v4217_v57  ;;  %v4189_v53 = vor.u32 %v4704_v10, %v4186_v47  ;;  %v4153_v51 = vor.u32 %v4700_v25, %v4152_v9  ;;  %v4154_v45 = vld [vmem:[#allocation7 + $0x30] sm:$0xf0] }
 0x196   :  { %v588_v48 = vpop.f32.mrf.mxu1  ;;  %v1050_v18 = vpop.f32.mrf.mxu2 }
 0x197   :  { %v1139_v1 = vpop.f32.mrf.mxu3  ;;  %v1051_v40 = vadd.f32 %v1050_v18, %v5326_v31  ;;  %v589_v14 = vadd.f32 %v588_v48, %v499_v49  ;;  %v4157_v18 = vor.u32 %v4696_v60, %v4154_v45 }
 0x198   :  { %1232 = vmatmul.bf16.gmra.mxu0 %v5301_v37  ;;  %1466 = vmatpush.bf16.msrb.mxu3 %v4221_v4  ;;  %v1140_v41 = vadd.f32 %v1139_v1, %v5329_v36 }
 0x199   :  { %1321 = vmatmul.bf16.gmra.mxu1 %v5301_v37  ;;  %1378 = vmatpush.bf16.msrb.mxu2 %v4185_v12  ;;  %v1808_v1 = vmax.f32 %v1051_v40, 0.0 }
 0x19a   :  { %v1809_v39 = vmax.f32 %v1140_v41, 0.0 }
 0x19c   :  { %1467 = vmatpush.bf16.msrb.mxu3 %v4189_v53 }
 0x19d   :  { %v501_v54 = vpop.f32.mrf.mxu0  ;;  %1379 = vmatpush.bf16.msrb.mxu2 %v4153_v51 }
 0x19e   :  { %v590_v55 = vpop.f32.mrf.mxu1  ;;  %v1052_v17 = vpop.f32.mrf.mxu2 }
 0x19f   :  { %v591_v57 = vadd.f32 %v590_v55, %v501_v54  ;;  %v1141_v4 = vpop.f32.mrf.mxu3  ;;  %v1053_v52 = vadd.f32 %v1052_v17, %v5326_v31 }
 0x1a0   :  { %v1142_v10 = vadd.f32 %v1141_v4, %v5329_v36  ;;  %1468 = vmatpush.bf16.msrb.mxu3 %v4157_v18 }
 0x1a1   :  { %v5405_v47 = vpack.c.bf16 %v591_v57, %v589_v14  ;;  %v1816_v12 = vmax.f32 %v1053_v52, 0.0 }
 0x1a2   :  { %v1817_v53 = vmax.f32 %v1142_v10, 0.0 }
 0x1a3   :  { %1094 = vmatmul.bf16.gmra.mxu2 %v5405_v47  ;;  %1183 = vmatmul.bf16.gmra.mxu3 %v5405_v47  ;;  %v5409_v49 = vpack.c.bf16 %v1816_v12, %v1808_v1 }
 0x1a4   :  { %v5411_v48 = vpack.c.bf16 %v1817_v53, %v1809_v39 }
 0x1a5   :  { %v504_v54 = vpop.f32.mrf.mxu0 }
 0x1a6   :  { %v593_v55 = vpop.f32.mrf.mxu1  ;;  %v1055_v9 = vpop.f32.mrf.mxu2 }
 0x1a7   :  { %v1144_v25 = vpop.f32.mrf.mxu3  ;;  %v1056_v40 = vadd.f32 %v1055_v9, %v5326_v31  ;;  %v594_v14 = vadd.f32 %v593_v55, %v504_v54 }
 0x1a8   :  { %1237 = vmatmul.bf16.gmra.mxu0 %v5311_v2  ;;  %v1145_v51 = vadd.f32 %v1144_v25, %v5329_v36 }
 0x1a9   :  { %1326 = vmatmul.bf16.gmra.mxu1 %v5311_v2  ;;  %v1824_v10 = vmax.f32 %v1056_v40, 0.0  ;;  %v5431_v40 = vperm.slane %v5321_v28, 3 }
 0x1aa   :  { %v1825_v18 = vmax.f32 %v1145_v51, 0.0 }
 0x1ad   :  { %v506_v41 = vpop.f32.mrf.mxu0 }
 0x1ae   :  { %v595_v60 = vpop.f32.mrf.mxu1  ;;  %v1057_v17 = vpop.f32.mrf.mxu2 }
 0x1af   :  { %v596_v57 = vadd.f32 %v595_v60, %v506_v41  ;;  %v1146_v4 = vpop.f32.mrf.mxu3  ;;  %v1058_v39 = vadd.f32 %v1057_v17, %v5326_v31  ;;  %v5428_v60 = vperm.slane %v5321_v28, 2 }
 0x1b0   :  { %v1147_v45 = vadd.f32 %v1146_v4, %v5329_v36 }
 0x1b1   :  { %v5419_v52 = vpack.c.bf16 %v596_v57, %v594_v14  ;;  %v1832_v1 = vmax.f32 %v1058_v39, 0.0 }
 0x1b2   :  { %v1833_v12 = vmax.f32 %v1147_v45, 0.0 }
 0x1b3   :  { %1099 = vmatmul.bf16.gmra.mxu2 %v5419_v52  ;;  %1188 = vmatmul.bf16.gmra.mxu3 %v5419_v52  ;;  %v5423_v53 = vpack.c.bf16 %v1832_v1, %v1824_v10 }
 0x1b4   :  { %v5425_v54 = vpack.c.bf16 %v1833_v12, %v1825_v18 }
 0x1b5   :  { %v1203_v55 = vpop.f32.mrf.mxu0 }
 0x1b6   :  { %v1292_v9 = vpop.f32.mrf.mxu1  ;;  %v1060_v25 = vpop.f32.mrf.mxu2  ;;  %v1204_v51 = vadd.f32 %v1203_v55, %v5428_v60 }
 0x1b7   :  { %v1149_v41 = vpop.f32.mrf.mxu3  ;;  %v1293_v14 = vadd.f32 %v1292_v9, %v5431_v40  ;;  %v1061_v57 = vadd.f32 %v1060_v25, %v5326_v31 }
 0x1b8   :  { %1242 = vmatmul.bf16.gmra.mxu0 %v5317_v16  ;;  %v1150_v17 = vadd.f32 %v1149_v41, %v5329_v36  ;;  %v1730_v34 = vmax.f32 %v1204_v51, 0.0 }
 0x1b9   :  { %1331 = vmatmul.bf16.gmra.mxu1 %v5317_v16  ;;  %v1731_v55 = vmax.f32 %v1293_v14, 0.0  ;;  %v1840_v13 = vmax.f32 %v1061_v57, 0.0 }
 0x1ba   :  { %v1841_v25 = vmax.f32 %v1150_v17, 0.0 }
 0x1bd   :  { %v1205_v4 = vpop.f32.mrf.mxu0 }
 0x1be   :  { %v1294_v39 = vpop.f32.mrf.mxu1  ;;  %v1062_v45 = vpop.f32.mrf.mxu2  ;;  %v1206_v18 = vadd.f32 %v1205_v4, %v5428_v60 }
 0x1bf   :  { %v1151_v10 = vpop.f32.mrf.mxu3  ;;  %v1295_v28 = vadd.f32 %v1294_v39, %v5431_v40  ;;  %v1063_v1 = vadd.f32 %v1062_v45, %v5326_v31 }
 0x1c0   :  { %v1152_v12 = vadd.f32 %v1151_v10, %v5329_v36  ;;  %v1738_v33 = vmax.f32 %v1206_v18, 0.0 }
 0x1c1   :  { %v1739_v9 = vmax.f32 %v1295_v28, 0.0  ;;  %v1848_v27 = vmax.f32 %v1063_v1, 0.0 }
 0x1c2   :  { %v1849_v41 = vmax.f32 %v1152_v12, 0.0  ;;  %v5443_v0 = vpack.c.bf16 %v1738_v33, %v1730_v34 }
 0x1c3   :  { %v5445_v21 = vpack.c.bf16 %v1739_v9, %v1731_v55  ;;  %1380 = vmatmul.bf16.vlgmr.msrb.gmra.mxu2 %v5241_v8  ;;  %1469 = vmatmul.bf16.vlgmr.msrb.gmra.mxu3 %v5241_v8  ;;  %v5449_v4 = vpack.c.bf16 %v1848_v27, %v1840_v13 }
 0x1c4   :  { %v5451_v39 = vpack.c.bf16 %v1849_v41, %v1841_v25 }
 0x1c5   :  { %v1208_v51 = vpop.f32.mrf.mxu0 }
 0x1c6   :  { %v1297_v14 = vpop.f32.mrf.mxu1  ;;  %v1065_v45 = vpop.f32.mrf.mxu2  ;;  %v1209_v33 = vadd.f32 %v1208_v51, %v5428_v60 }
 0x1c7   :  { %v1154_v10 = vpop.f32.mrf.mxu3  ;;  %v1298_v34 = vadd.f32 %v1297_v14, %v5431_v40  ;;  %v1066_v57 = vadd.f32 %v1065_v45, %v5326_v31 }
 0x1c8   :  { %1247 = vmatmul.bf16.gmra.mxu0 %v5335_v3  ;;  %v1155_v17 = vadd.f32 %v1154_v10, %v5329_v36  ;;  %v1746_v25 = vmax.f32 %v1209_v33, 0.0 }
 0x1c9   :  { %1336 = vmatmul.bf16.gmra.mxu1 %v5335_v3  ;;  %v1747_v41 = vmax.f32 %v1298_v34, 0.0  ;;  %v1856_v56 = vmax.f32 %v1066_v57, 0.0 }
 0x1ca   :  { %v1857_v45 = vmax.f32 %v1155_v17, 0.0 }
 0x1cd   :  { %v1210_v27 = vpop.f32.mrf.mxu0 }
 0x1ce   :  { %v1299_v13 = vpop.f32.mrf.mxu1  ;;  %v1067_v18 = vpop.f32.mrf.mxu2  ;;  %v1211_v1 = vadd.f32 %v1210_v27, %v5428_v60 }
 0x1cf   :  { %v1156_v28 = vpop.f32.mrf.mxu3  ;;  %v1300_v12 = vadd.f32 %v1299_v13, %v5431_v40  ;;  %v1068_v55 = vadd.f32 %v1067_v18, %v5326_v31 }
 0x1d0   :  { %v1157_v9 = vadd.f32 %v1156_v28, %v5329_v36  ;;  %v1754_v51 = vmax.f32 %v1211_v1, 0.0 }
 0x1d1   :  { %v1755_v14 = vmax.f32 %v1300_v12, 0.0  ;;  %v1864_v24 = vmax.f32 %v1068_v55, 0.0 }
 0x1d2   :  { %v1865_v10 = vmax.f32 %v1157_v9, 0.0  ;;  %v5465_v62 = vpack.c.bf16 %v1754_v51, %v1746_v25 }
 0x1d3   :  { %1385 = vmatmul.bf16.gmra.mxu2 %v5251_v23  ;;  %1474 = vmatmul.bf16.gmra.mxu3 %v5251_v23  ;;  %v5467_v27 = vpack.c.bf16 %v1755_v14, %v1747_v41  ;;  %v5469_v13 = vpack.c.bf16 %v1864_v24, %v1856_v56 }
 0x1d4   :  { %6964 = vst [vmem:[#allocation48_spill] sm:$0xff] %v5465_v62  ;;  %v5471_v18 = vpack.c.bf16 %v1865_v10, %v1857_v45 }
 0x1d5   :  { %6965 = vst [vmem:[#allocation49_spill] sm:$0xff] %v5467_v27  ;;  %v1213_v33 = vpop.f32.mrf.mxu0 }
 0x1d6   :  { %6966 = vst [vmem:[#allocation50_spill] sm:$0xff] %v5471_v18  ;;  %v1302_v34 = vpop.f32.mrf.mxu1  ;;  %v1070_v28 = vpop.f32.mrf.mxu2  ;;  %v1214_v57 = vadd.f32 %v1213_v33, %v5428_v60 }
 0x1d7   :  { %v1159_v1 = vpop.f32.mrf.mxu3  ;;  %v1303_v17 = vadd.f32 %v1302_v34, %v5431_v40  ;;  %v1071_v12 = vadd.f32 %v1070_v28, %v5326_v31 }
 0x1d8   :  { %1252 = vmatmul.bf16.gmra.mxu0 %v5349_v5  ;;  %v1160_v55 = vadd.f32 %v1159_v1, %v5329_v36  ;;  %v1762_v10 = vmax.f32 %v1214_v57, 0.0 }
 0x1d9   :  { %1341 = vmatmul.bf16.gmra.mxu1 %v5349_v5  ;;  %v1763_v33 = vmax.f32 %v1303_v17, 0.0  ;;  %v1872_v38 = vmax.f32 %v1071_v12, 0.0 }
 0x1da   :  { %v1873_v28 = vmax.f32 %v1160_v55, 0.0 }
 0x1dd   :  { %v1215_v24 = vpop.f32.mrf.mxu0 }
 0x1de   :  { %v1304_v56 = vpop.f32.mrf.mxu1  ;;  %v1072_v9 = vpop.f32.mrf.mxu2  ;;  %v1216_v41 = vadd.f32 %v1215_v24, %v5428_v60 }
 0x1df   :  { %v1161_v25 = vpop.f32.mrf.mxu3  ;;  %v1305_v51 = vadd.f32 %v1304_v56, %v5431_v40  ;;  %v1073_v14 = vadd.f32 %v1072_v9, %v5326_v31 }
 0x1e0   :  { %v1162_v45 = vadd.f32 %v1161_v25, %v5329_v36  ;;  %v1770_v44 = vmax.f32 %v1216_v41, 0.0 }
 0x1e1   :  { %v1771_v34 = vmax.f32 %v1305_v51, 0.0  ;;  %v1880_v32 = vmax.f32 %v1073_v14, 0.0 }
 0x1e2   :  { %v1881_v1 = vmax.f32 %v1162_v45, 0.0  ;;  %v5485_v26 = vpack.c.bf16 %v1770_v44, %v1762_v10 }
 0x1e3   :  { %1390 = vmatmul.bf16.gmra.mxu2 %v5261_v46  ;;  %1479 = vmatmul.bf16.gmra.mxu3 %v5261_v46  ;;  %v5487_v24 = vpack.c.bf16 %v1771_v34, %v1763_v33  ;;  %v5489_v56 = vpack.c.bf16 %v1880_v32, %v1872_v38 }
 0x1e4   :  { %6967 = vst [vmem:[#allocation51_spill] sm:$0xff] %v5485_v26  ;;  %v5491_v9 = vpack.c.bf16 %v1881_v1, %v1873_v28 }
 0x1e5   :  { %6968 = vst [vmem:[#allocation52_spill] sm:$0xff] %v5487_v24  ;;  %v1218_v57 = vpop.f32.mrf.mxu0 }
 0x1e6   :  { %6969 = vst [vmem:[#allocation53_spill] sm:$0xff] %v5489_v56  ;;  %v1307_v17 = vpop.f32.mrf.mxu1  ;;  %v1075_v25 = vpop.f32.mrf.mxu2  ;;  %v1219_v12 = vadd.f32 %v1218_v57, %v5428_v60 }
 0x1e7   :  { %6970 = vst [vmem:[#allocation54_spill] sm:$0xff] %v5491_v9  ;;  %v1164_v41 = vpop.f32.mrf.mxu3  ;;  %v1308_v55 = vadd.f32 %v1307_v17, %v5431_v40  ;;  %v1076_v44 = vadd.f32 %v1075_v25, %v5326_v31 }
 0x1e8   :  { %1257 = vmatmul.bf16.gmra.mxu0 %v5363_v11  ;;  %v1165_v51 = vadd.f32 %v1164_v41, %v5329_v36  ;;  %v1778_v1 = vmax.f32 %v1219_v12, 0.0 }
 0x1e9   :  { %1346 = vmatmul.bf16.gmra.mxu1 %v5363_v11  ;;  %v1779_v57 = vmax.f32 %v1308_v55, 0.0  ;;  %v1888_v24 = vmax.f32 %v1076_v44, 0.0  ;;  %v4384_v44 = vld [vmem:[#allocation7 + $0x1d8] sm:$0xf] }
 0x1ea   :  { %v1889_v25 = vmax.f32 %v1165_v51, 0.0  ;;  %v4757_v51 = vld [vmem:[#allocation7 + $0x1f4] sm:$0xf0] }
 0x1ed   :  { %v1220_v32 = vpop.f32.mrf.mxu0 }
 0x1ee   :  { %v1309_v38 = vpop.f32.mrf.mxu1  ;;  %v1077_v14 = vpop.f32.mrf.mxu2  ;;  %v1221_v10 = vadd.f32 %v1220_v32, %v5428_v60 }
 0x1ef   :  { %v1166_v45 = vpop.f32.mrf.mxu3  ;;  %v1310_v33 = vadd.f32 %v1309_v38, %v5431_v40  ;;  %v1078_v34 = vadd.f32 %v1077_v14, %v5326_v31 }
 0x1f0   :  { %v1167_v28 = vadd.f32 %v1166_v45, %v5329_v36  ;;  %v1786_v20 = vmax.f32 %v1221_v10, 0.0 }
 0x1f1   :  { %v1787_v17 = vmax.f32 %v1310_v33, 0.0  ;;  %v1896_v26 = vmax.f32 %v1078_v34, 0.0  ;;  %v4753_v33 = vld [vmem:[#allocation7 + $0x1dc] sm:$0xf]  ;;  %v4385_v34 = vor.u32 %v4757_v51, %v4384_v44 }
 0x1f2   :  { %v1897_v41 = vmax.f32 %v1167_v28, 0.0  ;;  %v5505_v9 = vpack.c.bf16 %v1786_v20, %v1778_v1  ;;  %v4386_v20 = vld [vmem:[#allocation7 + $0x1f8] sm:$0xf0] }
 0x1f3   :  { %1395 = vmatmul.bf16.gmra.mxu2 %v5271_v61  ;;  %1484 = vmatmul.bf16.gmra.mxu3 %v5271_v61  ;;  %v5507_v32 = vpack.c.bf16 %v1787_v17, %v1779_v57  ;;  %v5509_v38 = vpack.c.bf16 %v1896_v26, %v1888_v24  ;;  %v4389_v28 = vor.u32 %v4753_v33, %v4386_v20  ;;  %v4352_v24 = vld [vmem:[#allocation7 + $0x198] sm:$0xf]  ;;  %v4745_v17 = vld [vmem:[#allocation7 + $0x19c] sm:$0xf] }
 0x1f4   :  { %6971 = vst [vmem:[#allocation55_spill] sm:$0xff] %v5505_v9  ;;  %v5511_v14 = vpack.c.bf16 %v1897_v41, %v1889_v25  ;;  %1550 = vmatpush.bf16.msra.mxu0 %v4385_v34  ;;  %v4749_v57 = vld [vmem:[#allocation7 + $0x1b4] sm:$0xf0] }
 0x1f5   :  { %6972 = vst [vmem:[#allocation56_spill] sm:$0xff] %v5507_v32  ;;  %v1223_v12 = vpop.f32.mrf.mxu0  ;;  %1639 = vmatpush.bf16.msra.mxu1 %v4389_v28  ;;  %v4353_v41 = vor.u32 %v4749_v57, %v4352_v24  ;;  %v4354_v32 = vld [vmem:[#allocation7 + $0x1b8] sm:$0xf0]  ;;  %v4320_v24 = vld [vmem:[#allocation7 + $0x158] sm:$0xf] }
 0x1f6   :  { %6973 = vst [vmem:[#allocation57_spill] sm:$0xff] %v5509_v38  ;;  %v1312_v55 = vpop.f32.mrf.mxu1  ;;  %v1080_v45 = vpop.f32.mrf.mxu2  ;;  %v1224_v1 = vadd.f32 %v1223_v12, %v5428_v60  ;;  %v4357_v44 = vor.u32 %v4745_v17, %v4354_v32  ;;  %v4741_v57 = vld [vmem:[#allocation7 + $0x174] sm:$0xf0] }
 0x1f7   :  { %6974 = vst [vmem:[#allocation58_spill] sm:$0xff] %v5511_v14  ;;  %v1169_v10 = vpop.f32.mrf.mxu3  ;;  %v1313_v26 = vadd.f32 %v1312_v55, %v5431_v40  ;;  %v1081_v25 = vadd.f32 %v1080_v45, %v5326_v31 }
 0x1f8   :  { %1262 = vmatmul.bf16.gmra.mxu0 %v5377_v35  ;;  %v1170_v9 = vadd.f32 %v1169_v10, %v5329_v36  ;;  %v1794_v51 = vmax.f32 %v1224_v1, 0.0  ;;  %v4737_v10 = vld [vmem:[#allocation7 + $0x15c] sm:$0xf]  ;;  %v4321_v1 = vor.u32 %v4741_v57, %v4320_v24 }
 0x1f9   :  { %1351 = vmatmul.bf16.gmra.mxu1 %v5377_v35  ;;  %v1795_v33 = vmax.f32 %v1313_v26, 0.0  ;;  %1551 = vmatpush.bf16.msra.mxu0 %v4353_v41  ;;  %v1904_v56 = vmax.f32 %v1081_v25, 0.0  ;;  %v4322_v26 = vld [vmem:[#allocation7 + $0x178] sm:$0xf0]  ;;  %v4733_v25 = vld [vmem:[#allocation7 + $0x134] sm:$0xf0] }
 0x1fa   :  { %1640 = vmatpush.bf16.msra.mxu1 %v4357_v44  ;;  %v1905_v17 = vmax.f32 %v1170_v9, 0.0  ;;  %v4288_v44 = vld [vmem:[#allocation7 + $0x118] sm:$0xf] }
 0x1fb   :  { %v4289_v9 = vor.u32 %v4733_v25, %v4288_v44 }
 0x1fd   :  { %v1225_v14 = vpop.f32.mrf.mxu0  ;;  %1552 = vmatpush.bf16.msra.mxu0 %v4321_v1 }
 0x1fe   :  { %v1314_v38 = vpop.f32.mrf.mxu1  ;;  %v1082_v20 = vpop.f32.mrf.mxu2  ;;  %v1226_v55 = vadd.f32 %v1225_v14, %v5428_v60  ;;  %v4325_v14 = vor.u32 %v4737_v10, %v4322_v26  ;;  %v4224_v26 = vld [vmem:[#allocation7 + $0x98] sm:$0xf] }
 0x1ff   :  { %v1171_v12 = vpop.f32.mrf.mxu3  ;;  %v1315_v34 = vadd.f32 %v1314_v38, %v5431_v40  ;;  %v1083_v28 = vadd.f32 %v1082_v20, %v5326_v31  ;;  %v4729_v20 = vld [vmem:[#allocation7 + $0x11c] sm:$0xf] }
 0x200   :  { %v1172_v45 = vadd.f32 %v1171_v12, %v5329_v36  ;;  %v1802_v27 = vmax.f32 %v1226_v55, 0.0  ;;  %1641 = vmatpush.bf16.msra.mxu1 %v4325_v14  ;;  %v4713_v14 = vld [vmem:[#allocation7 + $0x9c] sm:$0xf] }
 0x201   :  { %v1803_v32 = vmax.f32 %v1315_v34, 0.0  ;;  %v1912_v62 = vmax.f32 %v1083_v28, 0.0  ;;  %v4290_v34 = vld [vmem:[#allocation7 + $0x138] sm:$0xf0]  ;;  %1553 = vmatpush.bf16.msra.mxu0 %v4289_v9 }
 0x202   :  { %v1913_v18 = vmax.f32 %v1172_v45, 0.0  ;;  %v5525_v38 = vpack.c.bf16 %v1802_v27, %v1794_v51  ;;  %v4293_v24 = vor.u32 %v4729_v20, %v4290_v34  ;;  %v4256_v27 = vld [vmem:[#allocation7 + $0xd8] sm:$0xf]  ;;  %v4226_v20 = vld [vmem:[#allocation7 + $0xb8] sm:$0xf0] }
 0x203   :  { %1400 = vmatmul.bf16.gmra.mxu2 %v5281_v50  ;;  %1489 = vmatmul.bf16.gmra.mxu3 %v5281_v50  ;;  %v5527_v41 = vpack.c.bf16 %v1803_v32, %v1795_v33  ;;  %v5529_v12 = vpack.c.bf16 %v1912_v62, %v1904_v56  ;;  %v4725_v51 = vld [vmem:[#allocation7 + $0xf4] sm:$0xf0]  ;;  %v4721_v33 = vld [vmem:[#allocation7 + $0xdc] sm:$0xf] }
 0x204   :  { %6975 = vst [vmem:[#allocation59_spill] sm:$0xff] %v5525_v38  ;;  %v5531_v55 = vpack.c.bf16 %v1913_v18, %v1905_v17  ;;  %1642 = vmatpush.bf16.msra.mxu1 %v4293_v24  ;;  %v4257_v62 = vor.u32 %v4725_v51, %v4256_v27  ;;  %v4258_v56 = vld [vmem:[#allocation7 + $0xf8] sm:$0xf0]  ;;  %v4717_v17 = vld [vmem:[#allocation7 + $0xb4] sm:$0xf0]  ;;  %v4229_v27 = vor.u32 %v4713_v14, %v4226_v20 }
 0x205   :  { %6976 = vst [vmem:[#allocation60_spill] sm:$0xff] %v5527_v41  ;;  %v1228_v28 = vpop.f32.mrf.mxu0  ;;  %v4261_v18 = vor.u32 %v4721_v33, %v4258_v56  ;;  %v4225_v25 = vor.u32 %v4717_v17, %v4224_v26  ;;  %v4709_v26 = vld [vmem:[#allocation7 + $0x74] sm:$0xf0] }
 0x206   :  { %6977 = vst [vmem:[#allocation61_spill] sm:$0xff] %v5529_v12  ;;  %v1317_v45 = vpop.f32.mrf.mxu1  ;;  %v1085_v57 = vpop.f32.mrf.mxu2  ;;  %v1229_v32 = vadd.f32 %v1228_v28, %v5428_v60  ;;  %1554 = vmatpush.bf16.msra.mxu0 %v4257_v62 }
 0x207   :  { %6978 = vst [vmem:[#allocation62_spill] sm:$0xff] %v5531_v55  ;;  %v1174_v10 = vpop.f32.mrf.mxu3  ;;  %v1318_v1 = vadd.f32 %v1317_v45, %v5431_v40  ;;  %v1086_v44 = vadd.f32 %v1085_v57, %v5326_v31  ;;  %v4192_v57 = vld [vmem:[#allocation7 + $0x58] sm:$0xf] }
 0x208   :  { %1267 = vmatmul.bf16.gmra.mxu0 %v5391_v63  ;;  %1643 = vmatpush.bf16.msra.mxu1 %v4261_v18  ;;  %v1175_v9 = vadd.f32 %v1174_v10, %v5329_v36  ;;  %v1810_v51 = vmax.f32 %v1229_v32, 0.0  ;;  %v4705_v10 = vld [vmem:[#allocation7 + $0x5c] sm:$0xf]  ;;  %v4193_v32 = vor.u32 %v4709_v26, %v4192_v57 }
 0x209   :  { %1356 = vmatmul.bf16.gmra.mxu1 %v5391_v63  ;;  %v1811_v33 = vmax.f32 %v1318_v1, 0.0  ;;  %v1920_v17 = vmax.f32 %v1086_v44, 0.0  ;;  %v4194_v1 = vld [vmem:[#allocation7 + $0x78] sm:$0xf0]  ;;  %v4701_v44 = vld [vmem:[#allocation7 + $0x34] sm:$0xf0] }
 0x20a   :  { %1555 = vmatpush.bf16.msra.mxu0 %v4225_v25  ;;  %v1921_v20 = vmax.f32 %v1175_v9, 0.0 }
 0x20c   :  { %1644 = vmatpush.bf16.msra.mxu1 %v4229_v27  ;;  %v4160_v27 = vld [vmem:[#allocation7 + $0x18] sm:$0xf] }
 0x20d   :  { %v1230_v34 = vpop.f32.mrf.mxu0  ;;  %v4161_v9 = vor.u32 %v4701_v44, %v4160_v27 }
 0x20e   :  { %v1319_v24 = vpop.f32.mrf.mxu1  ;;  %v1087_v56 = vpop.f32.mrf.mxu2  ;;  %v1231_v45 = vadd.f32 %v1230_v34, %v5428_v60  ;;  %v4197_v34 = vor.u32 %v4705_v10, %v4194_v1  ;;  %1556 = vmatpush.bf16.msra.mxu0 %v4193_v32 }
 0x20f   :  { %v1176_v28 = vpop.f32.mrf.mxu3  ;;  %v1320_v62 = vadd.f32 %v1319_v24, %v5431_v40  ;;  %v1088_v18 = vadd.f32 %v1087_v56, %v5326_v31  ;;  %v4697_v56 = vld [vmem:[#allocation7 + $0x1c] sm:$0xf] }
 0x210   :  { %v1177_v41 = vadd.f32 %v1176_v28, %v5329_v36  ;;  %v1818_v38 = vmax.f32 %v1231_v45, 0.0  ;;  %1645 = vmatpush.bf16.msra.mxu1 %v4197_v34 }
 0x211   :  { %v1819_v14 = vmax.f32 %v1320_v62, 0.0  ;;  %v1928_v55 = vmax.f32 %v1088_v18, 0.0 }
 0x212   :  { %v1929_v12 = vmax.f32 %v1177_v41, 0.0  ;;  %v5545_v24 = vpack.c.bf16 %v1818_v38, %v1810_v51  ;;  %v4162_v41 = vld [vmem:[#allocation7 + $0x38] sm:$0xf0]  ;;  %1557 = vmatpush.bf16.msra.mxu0 %v4161_v9 }
 0x213   :  { %1405 = vmatmul.bf16.gmra.mxu2 %v5291_v58  ;;  %1494 = vmatmul.bf16.gmra.mxu3 %v5291_v58  ;;  %v5547_v25 = vpack.c.bf16 %v1819_v14, %v1811_v33  ;;  %v5549_v28 = vpack.c.bf16 %v1928_v55, %v1920_v17  ;;  %v4165_v57 = vor.u32 %v4697_v56, %v4162_v41 }
 0x214   :  { %v5551_v45 = vpack.c.bf16 %v1929_v12, %v1921_v20 }
 0x215   :  { %v1233_v62 = vpop.f32.mrf.mxu0  ;;  %1646 = vmatpush.bf16.msra.mxu1 %v4165_v57 }
 0x216   :  { %v1322_v18 = vpop.f32.mrf.mxu1  ;;  %v1090_v26 = vpop.f32.mrf.mxu2  ;;  %v1234_v38 = vadd.f32 %v1233_v62, %v5428_v60 }
 0x217   :  { %v1179_v10 = vpop.f32.mrf.mxu3  ;;  %v1323_v55 = vadd.f32 %v1322_v18, %v5431_v40  ;;  %v1091_v12 = vadd.f32 %v1090_v26, %v5326_v31 }
 0x218   :  { %1272 = vmatmul.bf16.gmra.mxu0 %v5405_v47  ;;  %v1180_v51 = vadd.f32 %v1179_v10, %v5329_v36  ;;  %v1826_v44 = vmax.f32 %v1234_v38, 0.0 }
 0x219   :  { %1361 = vmatmul.bf16.gmra.mxu1 %v5405_v47  ;;  %v1827_v56 = vmax.f32 %v1323_v55, 0.0  ;;  %v1936_v62 = vmax.f32 %v1091_v12, 0.0 }
 0x21a   :  { %v1937_v18 = vmax.f32 %v1180_v51, 0.0 }
 0x21d   :  { %v1235_v33 = vpop.f32.mrf.mxu0 }
 0x21e   :  { %v1324_v17 = vpop.f32.mrf.mxu1  ;;  %v1092_v14 = vpop.f32.mrf.mxu2  ;;  %v1236_v1 = vadd.f32 %v1235_v33, %v5428_v60 }
 0x21f   :  { %v1181_v32 = vpop.f32.mrf.mxu3  ;;  %v1325_v20 = vadd.f32 %v1324_v17, %v5431_v40  ;;  %v1093_v34 = vadd.f32 %v1092_v14, %v5326_v31 }
 0x220   :  { %v1182_v27 = vadd.f32 %v1181_v32, %v5329_v36  ;;  %v1834_v9 = vmax.f32 %v1236_v1, 0.0 }
 0x221   :  { %v1835_v41 = vmax.f32 %v1325_v20, 0.0  ;;  %v1944_v57 = vmax.f32 %v1093_v34, 0.0 }
 0x222   :  { %v1945_v26 = vmax.f32 %v1182_v27, 0.0  ;;  %v5565_v10 = vpack.c.bf16 %v1834_v9, %v1826_v44 }
 0x223   :  { %1410 = vmatmul.bf16.gmra.mxu2 %v5301_v37  ;;  %1499 = vmatmul.bf16.gmra.mxu3 %v5301_v37  ;;  %v5567_v33 = vpack.c.bf16 %v1835_v41, %v1827_v56  ;;  %v5569_v17 = vpack.c.bf16 %v1944_v57, %v1936_v62 }
 0x224   :  { %6979 = vst [vmem:[#allocation63_spill] sm:$0xff] %v5565_v10  ;;  %v5571_v14 = vpack.c.bf16 %v1945_v26, %v1937_v18 }
 0x225   :  { %6980 = vst [vmem:[#allocation64_spill] sm:$0xff] %v5567_v33  ;;  %v1238_v38 = vpop.f32.mrf.mxu0 }
 0x226   :  { %6981 = vst [vmem:[#allocation65_spill] sm:$0xff] %v5569_v17  ;;  %v1327_v55 = vpop.f32.mrf.mxu1  ;;  %v1095_v32 = vpop.f32.mrf.mxu2  ;;  %v1239_v12 = vadd.f32 %v1238_v38, %v5428_v60 }
 0x227   :  { %6982 = vst [vmem:[#allocation66_spill] sm:$0xff] %v5571_v14  ;;  %v1184_v1 = vpop.f32.mrf.mxu3  ;;  %v1328_v51 = vadd.f32 %v1327_v55, %v5431_v40  ;;  %v1096_v20 = vadd.f32 %v1095_v32, %v5326_v31 }
 0x228   :  { %1277 = vmatmul.bf16.gmra.mxu0 %v5419_v52  ;;  %v1185_v34 = vadd.f32 %v1184_v1, %v5329_v36  ;;  %v1842_v26 = vmax.f32 %v1239_v12, 0.0 }
 0x229   :  { %1366 = vmatmul.bf16.gmra.mxu1 %v5419_v52  ;;  %v1843_v38 = vmax.f32 %v1328_v51, 0.0  ;;  %v1952_v10 = vmax.f32 %v1096_v20, 0.0 }
 0x22a   :  { %v1953_v32 = vmax.f32 %v1185_v34, 0.0 }
 0x22d   :  { %v1240_v27 = vpop.f32.mrf.mxu0 }
 0x22e   :  { %v1329_v44 = vpop.f32.mrf.mxu1  ;;  %v1097_v56 = vpop.f32.mrf.mxu2  ;;  %v1241_v41 = vadd.f32 %v1240_v27, %v5428_v60 }
 0x22f   :  { %v1186_v9 = vpop.f32.mrf.mxu3  ;;  %v1330_v62 = vadd.f32 %v1329_v44, %v5431_v40  ;;  %v1098_v18 = vadd.f32 %v1097_v56, %v5326_v31 }
 0x230   :  { %v1187_v57 = vadd.f32 %v1186_v9, %v5329_v36  ;;  %v1850_v33 = vmax.f32 %v1241_v41, 0.0 }
 0x231   :  { %v1851_v55 = vmax.f32 %v1330_v62, 0.0  ;;  %v1960_v14 = vmax.f32 %v1098_v18, 0.0 }
 0x232   :  { %v1961_v1 = vmax.f32 %v1187_v57, 0.0  ;;  %v5585_v17 = vpack.c.bf16 %v1850_v33, %v1842_v26 }
 0x233   :  { %1415 = vmatmul.bf16.gmra.mxu2 %v5311_v2  ;;  %1504 = vmatmul.bf16.gmra.mxu3 %v5311_v2  ;;  %v5587_v27 = vpack.c.bf16 %v1851_v55, %v1843_v38  ;;  %v5589_v44 = vpack.c.bf16 %v1960_v14, %v1952_v10 }
 0x234   :  { %6983 = vst [vmem:[#allocation67_spill] sm:$0xff] %v5585_v17  ;;  %v5591_v56 = vpack.c.bf16 %v1961_v1, %v1953_v32 }
 0x235   :  { %6984 = vst [vmem:[#allocation68_spill] sm:$0xff] %v5587_v27  ;;  %v1243_v12 = vpop.f32.mrf.mxu0 }
 0x236   :  { %6985 = vst [vmem:[#allocation69_spill] sm:$0xff] %v5591_v56  ;;  %v1332_v51 = vpop.f32.mrf.mxu1  ;;  %v1100_v9 = vpop.f32.mrf.mxu2  ;;  %v1244_v20 = vadd.f32 %v1243_v12, %v5428_v60 }
 0x237   :  { %v1189_v41 = vpop.f32.mrf.mxu3  ;;  %v1333_v34 = vadd.f32 %v1332_v51, %v5431_v40  ;;  %v1101_v33 = vadd.f32 %v1100_v9, %v5326_v31 }
 0x238   :  { %1558 = vmatmul.bf16.vlgmr.msra.gmra.mxu0 %v5241_v8  ;;  %v1190_v62 = vadd.f32 %v1189_v41, %v5329_v36  ;;  %v1858_v32 = vmax.f32 %v1244_v20, 0.0 }
 0x239   :  { %1647 = vmatmul.bf16.vlgmr.msra.gmra.mxu1 %v5241_v8  ;;  %v1859_v1 = vmax.f32 %v1333_v34, 0.0  ;;  %v1968_v27 = vmax.f32 %v1101_v33, 0.0  ;;  %v5615_v33 = vld [vmem:[#allocation8] sm:$0xff] }
 0x23a   :  { %v1969_v9 = vmax.f32 %v1190_v62, 0.0  ;;  %v5618_v62 = vperm.slane %v5615_v33, 4 }
 0x23d   :  { %v1245_v10 = vpop.f32.mrf.mxu0 }
 0x23e   :  { %v1334_v14 = vpop.f32.mrf.mxu1  ;;  %v1102_v18 = vpop.f32.mrf.mxu2  ;;  %v1246_v26 = vadd.f32 %v1245_v10, %v5428_v60 }
 0x23f   :  { %v1191_v57 = vpop.f32.mrf.mxu3  ;;  %v1335_v38 = vadd.f32 %v1334_v14, %v5431_v40  ;;  %v1103_v55 = vadd.f32 %v1102_v18, %v5326_v31 }
 0x240   :  { %v1192_v8 = vadd.f32 %v1191_v57, %v5329_v36  ;;  %v1866_v12 = vmax.f32 %v1246_v26, 0.0  ;;  %v5621_v57 = vperm.slane %v5615_v33, 5 }
 0x241   :  { %v1867_v51 = vmax.f32 %v1335_v38, 0.0  ;;  %v1976_v17 = vmax.f32 %v1103_v55, 0.0 }
 0x242   :  { %v1977_v41 = vmax.f32 %v1192_v8, 0.0  ;;  %v5605_v56 = vpack.c.bf16 %v1866_v12, %v1858_v32 }
 0x243   :  { %1420 = vmatmul.bf16.gmra.mxu2 %v5317_v16  ;;  %1509 = vmatmul.bf16.gmra.mxu3 %v5317_v16  ;;  %v5607_v10 = vpack.c.bf16 %v1867_v51, %v1859_v1  ;;  %v5609_v14 = vpack.c.bf16 %v1976_v17, %v1968_v27 }
 0x244   :  { %6986 = vst [vmem:[#allocation70_spill] sm:$0xff] %v5605_v56  ;;  %v5611_v31 = vpack.c.bf16 %v1977_v41, %v1969_v9 }
 0x245   :  { %6987 = vst [vmem:[#allocation71_spill] sm:$0xff] %v5607_v10  ;;  %v1248_v36 = vpop.f32.mrf.mxu0 }
 0x246   :  { %6988 = vst [vmem:[#allocation72_spill] sm:$0xff] %v5609_v14  ;;  %v1337_v20 = vpop.f32.mrf.mxu1  ;;  %v1381_v34 = vpop.f32.mrf.mxu2  ;;  %v1249_v17 = vadd.f32 %v1248_v36, %v5428_v60 }
 0x247   :  { %6989 = vst [vmem:[#allocation73_spill] sm:$0xff] %v5611_v31  ;;  %v1470_v18 = vpop.f32.mrf.mxu3  ;;  %v1338_v27 = vadd.f32 %v1337_v20, %v5431_v40  ;;  %v1382_v26 = vadd.f32 %v1381_v34, %v5618_v62 }
 0x248   :  { %1563 = vmatmul.bf16.gmra.mxu0 %v5251_v23  ;;  %v1471_v38 = vadd.f32 %v1470_v18, %v5621_v57  ;;  %v1874_v41 = vmax.f32 %v1249_v17, 0.0 }
 0x249   :  { %1652 = vmatmul.bf16.gmra.mxu1 %v5251_v23  ;;  %v1875_v36 = vmax.f32 %v1338_v27, 0.0  ;;  %v1732_v56 = vmax.f32 %v1382_v26, 0.0 }
 0x24a   :  { %v1733_v34 = vmax.f32 %v1471_v38, 0.0 }
 0x24d   :  { %v1250_v55 = vpop.f32.mrf.mxu0 }
 0x24e   :  { %v1339_v8 = vpop.f32.mrf.mxu1  ;;  %v1251_v23 = vadd.f32 %v1250_v55, %v5428_v60  ;;  %v1383_v1 = vpop.f32.mrf.mxu2 }
 0x24f   :  { %v1340_v32 = vadd.f32 %v1339_v8, %v5431_v40  ;;  %v1472_v12 = vpop.f32.mrf.mxu3  ;;  %v1384_v51 = vadd.f32 %v1383_v1, %v5618_v62 }
 0x250   :  { %v1473_v9 = vadd.f32 %v1472_v12, %v5621_v57  ;;  %v1882_v10 = vmax.f32 %v1251_v23, 0.0 }
 0x251   :  { %v1883_v20 = vmax.f32 %v1340_v32, 0.0  ;;  %v1740_v31 = vmax.f32 %v1384_v51, 0.0 }
 0x252   :  { %v1741_v18 = vmax.f32 %v1473_v9, 0.0  ;;  %v5633_v55 = vpack.c.bf16 %v1882_v10, %v1874_v41 }
 0x253   :  { %1425 = vmatmul.bf16.gmra.mxu2 %v5335_v3  ;;  %1514 = vmatmul.bf16.gmra.mxu3 %v5335_v3  ;;  %v5635_v8 = vpack.c.bf16 %v1883_v20, %v1875_v36  ;;  %v5637_v14 = vpack.c.bf16 %v1740_v31, %v1732_v56 }
 0x254   :  { %6990 = vst [vmem:[#allocation74_spill] sm:$0xff] %v5633_v55  ;;  %v5639_v1 = vpack.c.bf16 %v1741_v18, %v1733_v34 }
 0x255   :  { %6991 = vst [vmem:[#allocation75_spill] sm:$0xff] %v5635_v8  ;;  %v1253_v17 = vpop.f32.mrf.mxu0 }
 0x256   :  { %6992 = vst [vmem:[#allocation76_spill] sm:$0xff] %v5639_v1  ;;  %v1342_v27 = vpop.f32.mrf.mxu1  ;;  %v1386_v23 = vpop.f32.mrf.mxu2  ;;  %v1254_v26 = vadd.f32 %v1253_v17, %v5428_v60 }
 0x257   :  { %v1475_v32 = vpop.f32.mrf.mxu3  ;;  %v1343_v38 = vadd.f32 %v1342_v27, %v5431_v40  ;;  %v1387_v10 = vadd.f32 %v1386_v23, %v5618_v62 }
 0x258   :  { %1568 = vmatmul.bf16.gmra.mxu0 %v5261_v46  ;;  %v1476_v12 = vadd.f32 %v1475_v32, %v5621_v57  ;;  %v1890_v34 = vmax.f32 %v1254_v26, 0.0 }
 0x259   :  { %1657 = vmatmul.bf16.gmra.mxu1 %v5261_v46  ;;  %v1891_v18 = vmax.f32 %v1343_v38, 0.0  ;;  %v1748_v8 = vmax.f32 %v1387_v10, 0.0 }
 0x25a   :  { %v1749_v23 = vmax.f32 %v1476_v12, 0.0 }
 0x25d   :  { %v1255_v56 = vpop.f32.mrf.mxu0 }
 0x25e   :  { %v1344_v31 = vpop.f32.mrf.mxu1  ;;  %v1256_v51 = vadd.f32 %v1255_v56, %v5428_v60  ;;  %v1388_v41 = vpop.f32.mrf.mxu2 }
 0x25f   :  { %v1345_v9 = vadd.f32 %v1344_v31, %v5431_v40  ;;  %v1477_v36 = vpop.f32.mrf.mxu3  ;;  %v1389_v20 = vadd.f32 %v1388_v41, %v5618_v62 }
 0x260   :  { %v1478_v46 = vadd.f32 %v1477_v36, %v5621_v57  ;;  %v1898_v17 = vmax.f32 %v1256_v51, 0.0 }
 0x261   :  { %v1899_v27 = vmax.f32 %v1345_v9, 0.0  ;;  %v1756_v55 = vmax.f32 %v1389_v20, 0.0 }
 0x262   :  { %v1757_v32 = vmax.f32 %v1478_v46, 0.0  ;;  %v5653_v56 = vpack.c.bf16 %v1898_v17, %v1890_v34 }
 0x263   :  { %1430 = vmatmul.bf16.gmra.mxu2 %v5349_v5  ;;  %1519 = vmatmul.bf16.gmra.mxu3 %v5349_v5  ;;  %v5655_v31 = vpack.c.bf16 %v1899_v27, %v1891_v18  ;;  %v5657_v1 = vpack.c.bf16 %v1756_v55, %v1748_v8 }
 0x264   :  { %6993 = vst [vmem:[#allocation77_spill] sm:$0xff] %v5653_v56  ;;  %v5659_v41 = vpack.c.bf16 %v1757_v32, %v1749_v23 }
 0x265   :  { %6994 = vst [vmem:[#allocation78_spill] sm:$0xff] %v5655_v31  ;;  %v1258_v26 = vpop.f32.mrf.mxu0 }
 0x266   :  { %6995 = vst [vmem:[#allocation79_spill] sm:$0xff] %v5659_v41  ;;  %v1347_v38 = vpop.f32.mrf.mxu1  ;;  %v1391_v51 = vpop.f32.mrf.mxu2  ;;  %v1259_v10 = vadd.f32 %v1258_v26, %v5428_v60 }
 0x267   :  { %v1480_v9 = vpop.f32.mrf.mxu3  ;;  %v1348_v12 = vadd.f32 %v1347_v38, %v5431_v40  ;;  %v1392_v36 = vadd.f32 %v1391_v51, %v5618_v62 }
 0x268   :  { %1573 = vmatmul.bf16.gmra.mxu0 %v5271_v61  ;;  %v1481_v20 = vadd.f32 %v1480_v9, %v5621_v57  ;;  %v1906_v23 = vmax.f32 %v1259_v10, 0.0 }
 0x269   :  { %1662 = vmatmul.bf16.gmra.mxu1 %v5271_v61  ;;  %v1907_v32 = vmax.f32 %v1348_v12, 0.0  ;;  %v1764_v31 = vmax.f32 %v1392_v36, 0.0 }
 0x26a   :  { %v1765_v51 = vmax.f32 %v1481_v20, 0.0 }
 0x26d   :  { %v1260_v55 = vpop.f32.mrf.mxu0 }
 0x26e   :  { %v1349_v8 = vpop.f32.mrf.mxu1  ;;  %v1261_v46 = vadd.f32 %v1260_v55, %v5428_v60  ;;  %v1393_v18 = vpop.f32.mrf.mxu2 }
 0x26f   :  { %v1350_v34 = vadd.f32 %v1349_v8, %v5431_v40  ;;  %v1482_v17 = vpop.f32.mrf.mxu3  ;;  %v1394_v27 = vadd.f32 %v1393_v18, %v5618_v62 }
 0x270   :  { %v1483_v61 = vadd.f32 %v1482_v17, %v5621_v57  ;;  %v1914_v26 = vmax.f32 %v1261_v46, 0.0 }
 0x271   :  { %v1915_v38 = vmax.f32 %v1350_v34, 0.0  ;;  %v1772_v56 = vmax.f32 %v1394_v27, 0.0 }
 0x272   :  { %v1773_v9 = vmax.f32 %v1483_v61, 0.0  ;;  %v5673_v55 = vpack.c.bf16 %v1914_v26, %v1906_v23 }
 0x273   :  { %1435 = vmatmul.bf16.gmra.mxu2 %v5363_v11  ;;  %1524 = vmatmul.bf16.gmra.mxu3 %v5363_v11  ;;  %v5675_v8 = vpack.c.bf16 %v1915_v38, %v1907_v32  ;;  %v5677_v41 = vpack.c.bf16 %v1772_v56, %v1764_v31 }
 0x274   :  { %6996 = vst [vmem:[#allocation80_spill] sm:$0xff] %v5673_v55  ;;  %v5679_v18 = vpack.c.bf16 %v1773_v9, %v1765_v51 }
 0x275   :  { %6997 = vst [vmem:[#allocation81_spill] sm:$0xff] %v5675_v8  ;;  %v1263_v10 = vpop.f32.mrf.mxu0 }
 0x276   :  { %6998 = vst [vmem:[#allocation82_spill] sm:$0xff] %v5677_v41  ;;  %v1352_v12 = vpop.f32.mrf.mxu1  ;;  %v1396_v46 = vpop.f32.mrf.mxu2  ;;  %v1264_v36 = vadd.f32 %v1263_v10, %v5428_v60 }
 0x277   :  { %6999 = vst [vmem:[#allocation83_spill] sm:$0xff] %v5679_v18  ;;  %v1485_v34 = vpop.f32.mrf.mxu3  ;;  %v1353_v20 = vadd.f32 %v1352_v12, %v5431_v40  ;;  %v1397_v17 = vadd.f32 %v1396_v46, %v5618_v62 }
 0x278   :  { %1578 = vmatmul.bf16.gmra.mxu0 %v5281_v50  ;;  %v1486_v27 = vadd.f32 %v1485_v34, %v5621_v57  ;;  %v1922_v51 = vmax.f32 %v1264_v36, 0.0 }
 0x279   :  { %1667 = vmatmul.bf16.gmra.mxu1 %v5281_v50  ;;  %v1923_v9 = vmax.f32 %v1353_v20, 0.0  ;;  %v1780_v8 = vmax.f32 %v1397_v17, 0.0 }
 0x27a   :  { %v1781_v46 = vmax.f32 %v1486_v27, 0.0 }
 0x27d   :  { %v1265_v56 = vpop.f32.mrf.mxu0 }
 0x27e   :  { %v1354_v31 = vpop.f32.mrf.mxu1  ;;  %v1266_v61 = vadd.f32 %v1265_v56, %v5428_v60  ;;  %v1398_v32 = vpop.f32.mrf.mxu2  ;;  %v4765_v56 = vld [vmem:[#allocation10 + $0x38] sm:$0xff] }
 0x27f   :  { %v1355_v23 = vadd.f32 %v1354_v31, %v5431_v40  ;;  %v1487_v26 = vpop.f32.mrf.mxu3  ;;  %v1399_v38 = vadd.f32 %v1398_v32, %v5618_v62  ;;  %v4773_v31 = vld [vmem:[#allocation10 + $0x78] sm:$0xff]  ;;  %2624 = vmatpush.bf16.msra.mxu2 %v4765_v56 }
 0x280   :  { %v1488_v50 = vadd.f32 %v1487_v26, %v5621_v57  ;;  %v1930_v10 = vmax.f32 %v1266_v61, 0.0  ;;  %2713 = vmatpush.bf16.msra.mxu3 %v4773_v31  ;;  %v4772_v26 = vld [vmem:[#allocation10 + $0x70] sm:$0xff]  ;;  %v4762_v31 = vld [vmem:[#allocation10 + $0x20] sm:$0xff] }
 0x281   :  { %v1931_v12 = vmax.f32 %v1355_v23, 0.0  ;;  %v1788_v55 = vmax.f32 %v1399_v38, 0.0  ;;  %v4764_v23 = vld [vmem:[#allocation10 + $0x30] sm:$0xff]  ;;  %v4763_v38 = vld [vmem:[#allocation10 + $0x28] sm:$0xff] }
 0x282   :  { %v1789_v34 = vmax.f32 %v1488_v50, 0.0  ;;  %v5693_v18 = vpack.c.bf16 %v1930_v10, %v1922_v51  ;;  %v4771_v50 = vld [vmem:[#allocation10 + $0x68] sm:$0xff] }
 0x283   :  { %1440 = vmatmul.bf16.gmra.mxu2 %v5377_v35  ;;  %1529 = vmatmul.bf16.gmra.mxu3 %v5377_v35  ;;  %v5695_v41 = vpack.c.bf16 %v1931_v12, %v1923_v9  ;;  %v5697_v32 = vpack.c.bf16 %v1788_v55, %v1780_v8 }
 0x284   :  { %7000 = vst [vmem:[#allocation84_spill] sm:$0xff] %v5693_v18  ;;  %v5699_v36 = vpack.c.bf16 %v1789_v34, %v1781_v46  ;;  %2625 = vmatpush.bf16.msra.mxu2 %v4764_v23  ;;  %2714 = vmatpush.bf16.msra.mxu3 %v4772_v26  ;;  %v4770_v23 = vld [vmem:[#allocation10 + $0x60] sm:$0xff] }
 0x285   :  { %7001 = vst [vmem:[#allocation85_spill] sm:$0xff] %v5695_v41  ;;  %v1268_v20 = vpop.f32.mrf.mxu0 }
 0x286   :  { %7002 = vst [vmem:[#allocation86_spill] sm:$0xff] %v5697_v32  ;;  %v1357_v17 = vpop.f32.mrf.mxu1  ;;  %v1401_v27 = vpop.f32.mrf.mxu2  ;;  %v1269_v55 = vadd.f32 %v1268_v20, %v5428_v60 }
 0x287   :  { %7003 = vst [vmem:[#allocation87_spill] sm:$0xff] %v5699_v36  ;;  %v1490_v61 = vpop.f32.mrf.mxu3  ;;  %v1358_v8 = vadd.f32 %v1357_v17, %v5431_v40  ;;  %v1402_v51 = vadd.f32 %v1401_v27, %v5618_v62 }
 0x288   :  { %1583 = vmatmul.bf16.gmra.mxu0 %v5291_v58  ;;  %v1491_v9 = vadd.f32 %v1490_v61, %v5621_v57  ;;  %2626 = vmatpush.bf16.msra.mxu2 %v4763_v38  ;;  %v1938_v26 = vmax.f32 %v1269_v55, 0.0 }
 0x289   :  { %1672 = vmatmul.bf16.gmra.mxu1 %v5291_v58  ;;  %2715 = vmatpush.bf16.msra.mxu3 %v4771_v50  ;;  %v1939_v27 = vmax.f32 %v1358_v8, 0.0  ;;  %v1796_v18 = vmax.f32 %v1402_v51, 0.0 }
 0x28a   :  { %v1797_v36 = vmax.f32 %v1491_v9, 0.0 }
 0x28c   :  { %2627 = vmatpush.bf16.msra.mxu2 %v4762_v31  ;;  %v4768_v31 = vld [vmem:[#allocation10 + $0x50] sm:$0xff] }
 0x28d   :  { %v1270_v10 = vpop.f32.mrf.mxu0  ;;  %2716 = vmatpush.bf16.msra.mxu3 %v4770_v23  ;;  %v4767_v23 = vld [vmem:[#allocation10 + $0x48] sm:$0xff] }
 0x28e   :  { %v1359_v12 = vpop.f32.mrf.mxu1  ;;  %v1271_v46 = vadd.f32 %v1270_v10, %v5428_v60  ;;  %v1403_v34 = vpop.f32.mrf.mxu2  ;;  %v4761_v10 = vld [vmem:[#allocation10 + $0x18] sm:$0xff] }
 0x28f   :  { %v1360_v58 = vadd.f32 %v1359_v12, %v5431_v40  ;;  %v1492_v56 = vpop.f32.mrf.mxu3  ;;  %v1404_v20 = vadd.f32 %v1403_v34, %v5618_v62  ;;  %v4769_v12 = vld [vmem:[#allocation10 + $0x58] sm:$0xff] }
 0x290   :  { %v1493_v17 = vadd.f32 %v1492_v56, %v5621_v57  ;;  %v1946_v41 = vmax.f32 %v1271_v46, 0.0  ;;  %2628 = vmatpush.bf16.msra.mxu2 %v4761_v10  ;;  %v4760_v56 = vld [vmem:[#allocation10 + $0x10] sm:$0xff]  ;;  %v4758_v10 = vld [vmem:[#allocation10] sm:$0xff] }
 0x291   :  { %v1947_v61 = vmax.f32 %v1360_v58, 0.0  ;;  %v1804_v38 = vmax.f32 %v1404_v20, 0.0  ;;  %2717 = vmatpush.bf16.msra.mxu3 %v4769_v12  ;;  %v4766_v12 = vld [vmem:[#allocation10 + $0x40] sm:$0xff] }
 0x292   :  { %v1805_v50 = vmax.f32 %v1493_v17, 0.0  ;;  %v5713_v32 = vpack.c.bf16 %v1946_v41, %v1938_v26  ;;  %v4759_v41 = vld [vmem:[#allocation10 + $0x8] sm:$0xff] }
 0x293   :  { %1445 = vmatmul.bf16.gmra.mxu2 %v5391_v63  ;;  %1534 = vmatmul.bf16.gmra.mxu3 %v5391_v63  ;;  %v5715_v34 = vpack.c.bf16 %v1947_v61, %v1939_v27  ;;  %v5717_v55 = vpack.c.bf16 %v1804_v38, %v1796_v18 }
 0x294   :  { %7004 = vst [vmem:[#allocation88_spill] sm:$0xff] %v5713_v32  ;;  %v5719_v8 = vpack.c.bf16 %v1805_v50, %v1797_v36  ;;  %2629 = vmatpush.bf16.msra.mxu2 %v4760_v56 }
 0x295   :  { %7005 = vst [vmem:[#allocation89_spill] sm:$0xff] %v5715_v34  ;;  %v1273_v51 = vpop.f32.mrf.mxu0  ;;  %2718 = vmatpush.bf16.msra.mxu3 %v4768_v31 }
 0x296   :  { %v1362_v9 = vpop.f32.mrf.mxu1  ;;  %v1406_v46 = vpop.f32.mrf.mxu2  ;;  %v1274_v18 = vadd.f32 %v1273_v51, %v5428_v60 }
 0x297   :  { %v1495_v58 = vpop.f32.mrf.mxu3  ;;  %v1363_v36 = vadd.f32 %v1362_v9, %v5431_v40  ;;  %v1407_v20 = vadd.f32 %v1406_v46, %v5618_v62 }
 0x298   :  { %1588 = vmatmul.bf16.gmra.mxu0 %v5301_v37  ;;  %v1496_v17 = vadd.f32 %v1495_v58, %v5621_v57  ;;  %2630 = vmatpush.bf16.msra.mxu2 %v4759_v41  ;;  %v1954_v56 = vmax.f32 %v1274_v18, 0.0 }
 0x299   :  { %1677 = vmatmul.bf16.gmra.mxu1 %v5301_v37  ;;  %2719 = vmatpush.bf16.msra.mxu3 %v4767_v23  ;;  %v1955_v46 = vmax.f32 %v1363_v36, 0.0  ;;  %v1812_v34 = vmax.f32 %v1407_v20, 0.0 }
 0x29a   :  { %v1813_v32 = vmax.f32 %v1496_v17, 0.0 }
 0x29c   :  { %2631 = vmatpush.bf16.msra.mxu2 %v4758_v10 }
 0x29d   :  { %v1275_v26 = vpop.f32.mrf.mxu0  ;;  %2720 = vmatpush.bf16.msra.mxu3 %v4766_v12 }
 0x29e   :  { %v1364_v27 = vpop.f32.mrf.mxu1  ;;  %v1276_v61 = vadd.f32 %v1275_v26, %v5428_v60  ;;  %v1408_v38 = vpop.f32.mrf.mxu2 }
 0x29f   :  { %v1365_v37 = vadd.f32 %v1364_v27, %v5431_v40  ;;  %v1497_v50 = vpop.f32.mrf.mxu3  ;;  %v1409_v51 = vadd.f32 %v1408_v38, %v5618_v62 }
 0x2a0   :  { %v1498_v9 = vadd.f32 %v1497_v50, %v5621_v57  ;;  %v1962_v31 = vmax.f32 %v1276_v61, 0.0 }
 0x2a1   :  { %v1963_v58 = vmax.f32 %v1365_v37, 0.0  ;;  %v1820_v41 = vmax.f32 %v1409_v51, 0.0 }
 0x2a2   :  { %v1821_v23 = vmax.f32 %v1498_v9, 0.0  ;;  %v5733_v26 = vpack.c.bf16 %v1962_v31, %v1954_v56 }
 0x2a3   :  { %1450 = vmatmul.bf16.gmra.mxu2 %v5405_v47  ;;  %1539 = vmatmul.bf16.gmra.mxu3 %v5405_v47  ;;  %v5735_v27 = vpack.c.bf16 %v1963_v58, %v1955_v46  ;;  %v5737_v38 = vpack.c.bf16 %v1820_v41, %v1812_v34 }
 0x2a4   :  { %v5739_v18 = vpack.c.bf16 %v1821_v23, %v1813_v32 }
 0x2a5   :  { %7006 = vst [vmem:[#allocation90_spill] sm:$0xff] %v5735_v27  ;;  %v1278_v36 = vpop.f32.mrf.mxu0 }
 0x2a6   :  { %v1367_v61 = vpop.f32.mrf.mxu1  ;;  %v1411_v20 = vpop.f32.mrf.mxu2  ;;  %v1279_v37 = vadd.f32 %v1278_v36, %v5428_v60 }
 0x2a7   :  { %v1500_v17 = vpop.f32.mrf.mxu3  ;;  %v1368_v50 = vadd.f32 %v1367_v61, %v5431_v40  ;;  %v1412_v10 = vadd.f32 %v1411_v20, %v5618_v62 }
 0x2a8   :  { %1593 = vmatmul.bf16.gmra.mxu0 %v5311_v2  ;;  %v1501_v12 = vadd.f32 %v1500_v17, %v5621_v57  ;;  %v1970_v58 = vmax.f32 %v1279_v37, 0.0 }
 0x2a9   :  { %1682 = vmatmul.bf16.gmra.mxu1 %v5311_v2  ;;  %v1971_v41 = vmax.f32 %v1368_v50, 0.0  ;;  %v1828_v61 = vmax.f32 %v1412_v10, 0.0  ;;  %v5762_v10 = vperm.slane %v5615_v33, 6 }
 0x2aa   :  { %v1829_v20 = vmax.f32 %v1501_v12, 0.0  ;;  %v5765_v12 = vperm.slane %v5615_v33, 7 }
 0x2ad   :  { %v1280_v34 = vpop.f32.mrf.mxu0 }
 0x2ae   :  { %v1369_v51 = vpop.f32.mrf.mxu1  ;;  %v1281_v32 = vadd.f32 %v1280_v34, %v5428_v60  ;;  %v1413_v56 = vpop.f32.mrf.mxu2 }
 0x2af   :  { %v1370_v9 = vadd.f32 %v1369_v51, %v5431_v40  ;;  %v1502_v46 = vpop.f32.mrf.mxu3  ;;  %v1414_v31 = vadd.f32 %v1413_v56, %v5618_v62 }
 0x2b0   :  { %v1503_v2 = vadd.f32 %v1502_v46, %v5621_v57  ;;  %v1978_v23 = vmax.f32 %v1281_v32, 0.0 }
 0x2b1   :  { %v1979_v36 = vmax.f32 %v1370_v9, 0.0  ;;  %v1836_v27 = vmax.f32 %v1414_v31, 0.0 }
 0x2b2   :  { %v1837_v17 = vmax.f32 %v1503_v2, 0.0  ;;  %v5753_v60 = vpack.c.bf16 %v1978_v23, %v1970_v58 }
 0x2b3   :  { %1455 = vmatmul.bf16.gmra.mxu2 %v5419_v52  ;;  %1544 = vmatmul.bf16.gmra.mxu3 %v5419_v52  ;;  %v5755_v40 = vpack.c.bf16 %v1979_v36, %v1971_v41  ;;  %v5757_v34 = vpack.c.bf16 %v1836_v27, %v1828_v61 }
 0x2b4   :  { %7007 = vst [vmem:[#allocation91_spill] sm:$0xff] %v5753_v60  ;;  %v5759_v51 = vpack.c.bf16 %v1837_v17, %v1829_v20 }
 0x2b5   :  { %7008 = vst [vmem:[#allocation92_spill] sm:$0xff] %v5755_v40  ;;  %v1559_v37 = vpop.f32.mrf.mxu0 }
 0x2b6   :  { %7009 = vst [vmem:[#allocation93_spill] sm:$0xff] %v5757_v34  ;;  %v1648_v50 = vpop.f32.mrf.mxu1  ;;  %v1416_v32 = vpop.f32.mrf.mxu2  ;;  %v1560_v56 = vadd.f32 %v1559_v37, %v5762_v10 }
 0x2b7   :  { %7010 = vst [vmem:[#allocation94_spill] sm:$0xff] %v5759_v51  ;;  %v1505_v9 = vpop.f32.mrf.mxu3  ;;  %v1649_v27 = vadd.f32 %v1648_v50, %v5765_v12  ;;  %v1417_v46 = vadd.f32 %v1416_v32, %v5618_v62 }
 0x2b8   :  { %1598 = vmatmul.bf16.gmra.mxu0 %v5317_v16  ;;  %v1506_v31 = vadd.f32 %v1505_v9, %v5621_v57  ;;  %v1734_v20 = vmax.f32 %v1560_v56, 0.0 }
 0x2b9   :  { %1687 = vmatmul.bf16.gmra.mxu1 %v5317_v16  ;;  %v1735_v17 = vmax.f32 %v1649_v27, 0.0  ;;  %v1844_v40 = vmax.f32 %v1417_v46, 0.0 }
 0x2ba   :  { %v1845_v32 = vmax.f32 %v1506_v31, 0.0 }
 0x2bd   :  { %v1561_v2 = vpop.f32.mrf.mxu0 }
 0x2be   :  { %v1650_v58 = vpop.f32.mrf.mxu1  ;;  %v1418_v41 = vpop.f32.mrf.mxu2  ;;  %v1562_v36 = vadd.f32 %v1561_v2, %v5762_v10 }
 0x2bf   :  { %v1507_v23 = vpop.f32.mrf.mxu3  ;;  %v1651_v33 = vadd.f32 %v1650_v58, %v5765_v12  ;;  %v1419_v61 = vadd.f32 %v1418_v41, %v5618_v62 }
 0x2c0   :  { %v1508_v16 = vadd.f32 %v1507_v23, %v5621_v57  ;;  %v1742_v37 = vmax.f32 %v1562_v36, 0.0 }
 0x2c1   :  { %v1743_v50 = vmax.f32 %v1651_v33, 0.0  ;;  %v1852_v60 = vmax.f32 %v1419_v61, 0.0 }
 0x2c2   :  { %v1853_v9 = vmax.f32 %v1508_v16, 0.0  ;;  %v5777_v51 = vpack.c.bf16 %v1742_v37, %v1734_v20 }
 0x2c3   :  { %v5779_v34 = vpack.c.bf16 %v1743_v50, %v1735_v17  ;;  %2632 = vmatmul.bf16.vlgmr.msra.gmra.mxu2 %v5339_v15  ;;  %2721 = vmatmul.bf16.vlgmr.msra.gmra.mxu3 %v5341_v19  ;;  %v5783_v2 = vpack.c.bf16 %v1852_v60, %v1844_v40 }
 0x2c4   :  { %v5785_v58 = vpack.c.bf16 %v1853_v9, %v1845_v32 }
 0x2c5   :  { %v1564_v56 = vpop.f32.mrf.mxu0 }
 0x2c6   :  { %v1653_v27 = vpop.f32.mrf.mxu1  ;;  %v1421_v41 = vpop.f32.mrf.mxu2  ;;  %v1565_v46 = vadd.f32 %v1564_v56, %v5762_v10 }
 0x2c7   :  { %v1510_v23 = vpop.f32.mrf.mxu3  ;;  %v1654_v31 = vadd.f32 %v1653_v27, %v5765_v12  ;;  %v1422_v15 = vadd.f32 %v1421_v41, %v5618_v62 }
 0x2c8   :  { %1603 = vmatmul.bf16.gmra.mxu0 %v5335_v3  ;;  %v1511_v19 = vadd.f32 %v1510_v23, %v5621_v57  ;;  %v1750_v17 = vmax.f32 %v1565_v46, 0.0 }
 0x2c9   :  { %1692 = vmatmul.bf16.gmra.mxu1 %v5335_v3  ;;  %v1751_v37 = vmax.f32 %v1654_v31, 0.0  ;;  %v1860_v9 = vmax.f32 %v1422_v15, 0.0 }
 0x2ca   :  { %v1861_v56 = vmax.f32 %v1511_v19, 0.0 }
 0x2cd   :  { %v1566_v60 = vpop.f32.mrf.mxu0 }
 0x2ce   :  { %v1655_v40 = vpop.f32.mrf.mxu1  ;;  %v1423_v36 = vpop.f32.mrf.mxu2  ;;  %v1567_v61 = vadd.f32 %v1566_v60, %v5762_v10 }
 0x2cf   :  { %v1512_v33 = vpop.f32.mrf.mxu3  ;;  %v1656_v16 = vadd.f32 %v1655_v40, %v5765_v12  ;;  %v1424_v20 = vadd.f32 %v1423_v36, %v5618_v62 }
 0x2d0   :  { %v1513_v3 = vadd.f32 %v1512_v33, %v5621_v57  ;;  %v1758_v50 = vmax.f32 %v1567_v61, 0.0 }
 0x2d1   :  { %v1759_v32 = vmax.f32 %v1656_v16, 0.0  ;;  %v1868_v27 = vmax.f32 %v1424_v20, 0.0 }
 0x2d2   :  { %v1869_v41 = vmax.f32 %v1513_v3, 0.0  ;;  %v5799_v23 = vpack.c.bf16 %v1758_v50, %v1750_v17 }
 0x2d3   :  { %2637 = vmatmul.bf16.gmra.mxu2 %v5353_v30  ;;  %2726 = vmatmul.bf16.gmra.mxu3 %v5355_v22  ;;  %v5801_v60 = vpack.c.bf16 %v1759_v32, %v1751_v37  ;;  %v5803_v40 = vpack.c.bf16 %v1868_v27, %v1860_v9 }
 0x2d4   :  { %v5805_v36 = vpack.c.bf16 %v1869_v41, %v1861_v56 }
 0x2d5   :  { %7011 = vst [vmem:[#allocation95_spill] sm:$0xff] %v5801_v60  ;;  %v1569_v46 = vpop.f32.mrf.mxu0 }
 0x2d6   :  { %v1658_v31 = vpop.f32.mrf.mxu1  ;;  %v1426_v33 = vpop.f32.mrf.mxu2  ;;  %v1570_v30 = vadd.f32 %v1569_v46, %v5762_v10 }
 0x2d7   :  { %v1515_v61 = vpop.f32.mrf.mxu3  ;;  %v1659_v22 = vadd.f32 %v1658_v31, %v5765_v12  ;;  %v1427_v15 = vadd.f32 %v1426_v33, %v5618_v62 }
 0x2d8   :  { %1608 = vmatmul.bf16.gmra.mxu0 %v5349_v5  ;;  %v1516_v19 = vadd.f32 %v1515_v61, %v5621_v57  ;;  %v1766_v9 = vmax.f32 %v1570_v30, 0.0 }
 0x2d9   :  { %1697 = vmatmul.bf16.gmra.mxu1 %v5349_v5  ;;  %v1767_v56 = vmax.f32 %v1659_v22, 0.0  ;;  %v1876_v46 = vmax.f32 %v1427_v15, 0.0 }
 0x2da   :  { %v1877_v31 = vmax.f32 %v1516_v19, 0.0 }
 0x2dd   :  { %v1571_v16 = vpop.f32.mrf.mxu0 }
 0x2de   :  { %v1660_v20 = vpop.f32.mrf.mxu1  ;;  %v1428_v3 = vpop.f32.mrf.mxu2  ;;  %v1572_v37 = vadd.f32 %v1571_v16, %v5762_v10 }
 0x2df   :  { %v1517_v17 = vpop.f32.mrf.mxu3  ;;  %v1661_v50 = vadd.f32 %v1660_v20, %v5765_v12  ;;  %v1429_v32 = vadd.f32 %v1428_v3, %v5618_v62 }
 0x2e0   :  { %v1518_v5 = vadd.f32 %v1517_v17, %v5621_v57  ;;  %v1774_v27 = vmax.f32 %v1572_v37, 0.0 }
 0x2e1   :  { %v1775_v41 = vmax.f32 %v1661_v50, 0.0  ;;  %v1884_v33 = vmax.f32 %v1429_v32, 0.0 }
 0x2e2   :  { %v1885_v61 = vmax.f32 %v1518_v5, 0.0  ;;  %v5819_v60 = vpack.c.bf16 %v1774_v27, %v1766_v9 }
 0x2e3   :  { %2642 = vmatmul.bf16.gmra.mxu2 %v5367_v43  ;;  %2731 = vmatmul.bf16.gmra.mxu3 %v5369_v29  ;;  %v5821_v16 = vpack.c.bf16 %v1775_v41, %v1767_v56  ;;  %v5823_v20 = vpack.c.bf16 %v1884_v33, %v1876_v46 }
 0x2e4   :  { %v5825_v3 = vpack.c.bf16 %v1885_v61, %v1877_v31 }
 0x2e5   :  { %7012 = vst [vmem:[#allocation96_spill] sm:$0xff] %v5821_v16  ;;  %v1574_v30 = vpop.f32.mrf.mxu0 }
 0x2e6   :  { %v1663_v22 = vpop.f32.mrf.mxu1  ;;  %v1431_v17 = vpop.f32.mrf.mxu2  ;;  %v1575_v43 = vadd.f32 %v1574_v30, %v5762_v10 }
 0x2e7   :  { %v1520_v37 = vpop.f32.mrf.mxu3  ;;  %v1664_v29 = vadd.f32 %v1663_v22, %v5765_v12  ;;  %v1432_v15 = vadd.f32 %v1431_v17, %v5618_v62 }
 0x2e8   :  { %1613 = vmatmul.bf16.gmra.mxu0 %v5363_v11  ;;  %v1521_v19 = vadd.f32 %v1520_v37, %v5621_v57  ;;  %v1782_v46 = vmax.f32 %v1575_v43, 0.0 }
 0x2e9   :  { %1702 = vmatmul.bf16.gmra.mxu1 %v5363_v11  ;;  %v1783_v31 = vmax.f32 %v1664_v29, 0.0  ;;  %v1892_v30 = vmax.f32 %v1432_v15, 0.0  ;;  %v4781_v15 = vld [vmem:[#allocation10 + $0xb8] sm:$0xff] }
 0x2ea   :  { %v1893_v22 = vmax.f32 %v1521_v19, 0.0  ;;  %2802 = vmatpush.bf16.msrb.mxu0 %v4781_v15 }
 0x2ed   :  { %v1576_v50 = vpop.f32.mrf.mxu0 }
 0x2ee   :  { %v1665_v32 = vpop.f32.mrf.mxu1  ;;  %v1433_v5 = vpop.f32.mrf.mxu2  ;;  %v1577_v56 = vadd.f32 %v1576_v50, %v5762_v10 }
 0x2ef   :  { %v1522_v9 = vpop.f32.mrf.mxu3  ;;  %v1666_v27 = vadd.f32 %v1665_v32, %v5765_v12  ;;  %v1434_v41 = vadd.f32 %v1433_v5, %v5618_v62 }
 0x2f0   :  { %v1523_v11 = vadd.f32 %v1522_v9, %v5621_v57  ;;  %v1790_v33 = vmax.f32 %v1577_v56, 0.0 }
 0x2f1   :  { %v1791_v61 = vmax.f32 %v1666_v27, 0.0  ;;  %v1900_v17 = vmax.f32 %v1434_v41, 0.0  ;;  %v4780_v27 = vld [vmem:[#allocation10 + $0xb0] sm:$0xff] }
 0x2f2   :  { %v1901_v37 = vmax.f32 %v1523_v11, 0.0  ;;  %v5839_v16 = vpack.c.bf16 %v1790_v33, %v1782_v46  ;;  %v4788_v41 = vld [vmem:[#allocation10 + $0xf0] sm:$0xff]  ;;  %2803 = vmatpush.bf16.msrb.mxu0 %v4780_v27 }
 0x2f3   :  { %2647 = vmatmul.bf16.gmra.mxu2 %v5381_v59  ;;  %2736 = vmatmul.bf16.gmra.mxu3 %v5383_v7  ;;  %v5841_v50 = vpack.c.bf16 %v1791_v61, %v1783_v31  ;;  %v5843_v32 = vpack.c.bf16 %v1900_v17, %v1892_v30  ;;  %v4789_v59 = vld [vmem:[#allocation10 + $0xf8] sm:$0xff] }
 0x2f4   :  { %7013 = vst [vmem:[#allocation97_spill] sm:$0xff] %v5839_v16  ;;  %v5845_v5 = vpack.c.bf16 %v1901_v37, %v1893_v22  ;;  %2891 = vmatpush.bf16.msrb.mxu1 %v4789_v59  ;;  %v4779_v59 = vld [vmem:[#allocation10 + $0xa8] sm:$0xff] }
 0x2f5   :  { %7014 = vst [vmem:[#allocation98_spill] sm:$0xff] %v5841_v50  ;;  %v1579_v43 = vpop.f32.mrf.mxu0 }
 0x2f6   :  { %7015 = vst [vmem:[#allocation99_spill] sm:$0xff] %v5843_v32  ;;  %v1668_v29 = vpop.f32.mrf.mxu1  ;;  %v1436_v9 = vpop.f32.mrf.mxu2  ;;  %v1580_v7 = vadd.f32 %v1579_v43, %v5762_v10  ;;  %2804 = vmatpush.bf16.msrb.mxu0 %v4779_v59 }
 0x2f7   :  { %7016 = vst [vmem:[#allocation100_spill] sm:$0xff] %v5845_v5  ;;  %v1525_v56 = vpop.f32.mrf.mxu3  ;;  %v1669_v19 = vadd.f32 %v1668_v29, %v5765_v12  ;;  %v1437_v11 = vadd.f32 %v1436_v9, %v5618_v62 }
 0x2f8   :  { %1618 = vmatmul.bf16.gmra.mxu0 %v5377_v35  ;;  %v1526_v46 = vadd.f32 %v1525_v56, %v5621_v57  ;;  %2892 = vmatpush.bf16.msrb.mxu1 %v4788_v41  ;;  %v1798_v43 = vmax.f32 %v1580_v7, 0.0  ;;  %v4787_v56 = vld [vmem:[#allocation10 + $0xe8] sm:$0xff] }
 0x2f9   :  { %1707 = vmatmul.bf16.gmra.mxu1 %v5377_v35  ;;  %v1799_v29 = vmax.f32 %v1669_v19, 0.0  ;;  %v1908_v50 = vmax.f32 %v1437_v11, 0.0 }
 0x2fa   :  { %v1909_v16 = vmax.f32 %v1526_v46, 0.0 }
 0x2fc   :  { %2893 = vmatpush.bf16.msrb.mxu1 %v4787_v56 }
 0x2fd   :  { %v1581_v31 = vpop.f32.mrf.mxu0 }
 0x2fe   :  { %v1670_v33 = vpop.f32.mrf.mxu1  ;;  %v1438_v61 = vpop.f32.mrf.mxu2  ;;  %v1582_v35 = vadd.f32 %v1581_v31, %v5762_v10  ;;  %v4778_v31 = vld [vmem:[#allocation10 + $0xa0] sm:$0xff] }
 0x2ff   :  { %v1527_v30 = vpop.f32.mrf.mxu3  ;;  %v1671_v22 = vadd.f32 %v1670_v33, %v5765_v12  ;;  %v1439_v17 = vadd.f32 %v1438_v61, %v5618_v62  ;;  %v4786_v33 = vld [vmem:[#allocation10 + $0xe0] sm:$0xff]  ;;  %2805 = vmatpush.bf16.msrb.mxu0 %v4778_v31 }
 0x300   :  { %v1528_v37 = vadd.f32 %v1527_v30, %v5621_v57  ;;  %v1806_v15 = vmax.f32 %v1582_v35, 0.0  ;;  %2894 = vmatpush.bf16.msrb.mxu1 %v4786_v33 }
 0x301   :  { %v1807_v9 = vmax.f32 %v1671_v22, 0.0  ;;  %v1916_v5 = vmax.f32 %v1439_v17, 0.0 }
 0x302   :  { %v1917_v32 = vmax.f32 %v1528_v37, 0.0  ;;  %v5859_v27 = vpack.c.bf16 %v1806_v15, %v1798_v43 }
 0x303   :  { %2652 = vmatmul.bf16.gmra.mxu2 %v5395_v6  ;;  %2741 = vmatmul.bf16.gmra.mxu3 %v5397_v42  ;;  %v5861_v41 = vpack.c.bf16 %v1807_v9, %v1799_v29  ;;  %v5863_v7 = vpack.c.bf16 %v1916_v5, %v1908_v50  ;;  %v4777_v6 = vld [vmem:[#allocation10 + $0x98] sm:$0xff]  ;;  %v4784_v5 = vld [vmem:[#allocation10 + $0xd0] sm:$0xff] }
 0x304   :  { %v5865_v19 = vpack.c.bf16 %v1917_v32, %v1909_v16  ;;  %v4785_v42 = vld [vmem:[#allocation10 + $0xd8] sm:$0xff]  ;;  %2806 = vmatpush.bf16.msrb.mxu0 %v4777_v6  ;;  %v4776_v32 = vld [vmem:[#allocation10 + $0x90] sm:$0xff] }
 0x305   :  { %7017 = vst [vmem:[#allocation101_spill] sm:$0xff] %v5861_v41  ;;  %v1584_v11 = vpop.f32.mrf.mxu0  ;;  %2895 = vmatpush.bf16.msrb.mxu1 %v4785_v42 }
 0x306   :  { %v1673_v46 = vpop.f32.mrf.mxu1  ;;  %v1441_v61 = vpop.f32.mrf.mxu2  ;;  %v1585_v50 = vadd.f32 %v1584_v11, %v5762_v10 }
 0x307   :  { %v1530_v30 = vpop.f32.mrf.mxu3  ;;  %v1674_v16 = vadd.f32 %v1673_v46, %v5765_v12  ;;  %v1442_v35 = vadd.f32 %v1441_v61, %v5618_v62  ;;  %v4775_v46 = vld [vmem:[#allocation10 + $0x88] sm:$0xff] }
 0x308   :  { %1623 = vmatmul.bf16.gmra.mxu0 %v5391_v63  ;;  %v1531_v22 = vadd.f32 %v1530_v30, %v5621_v57  ;;  %v1814_v56 = vmax.f32 %v1585_v50, 0.0  ;;  %v4783_v61 = vld [vmem:[#allocation10 + $0xc8] sm:$0xff] }
 0x309   :  { %1712 = vmatmul.bf16.gmra.mxu1 %v5391_v63  ;;  %2807 = vmatpush.bf16.msrb.mxu0 %v4776_v32  ;;  %v1815_v31 = vmax.f32 %v1674_v16, 0.0  ;;  %v1924_v30 = vmax.f32 %v1442_v35, 0.0  ;;  %v4774_v32 = vld [vmem:[#allocation10 + $0x80] sm:$0xff] }
 0x30a   :  { %2896 = vmatpush.bf16.msrb.mxu1 %v4784_v5  ;;  %v1925_v6 = vmax.f32 %v1531_v22, 0.0  ;;  %v4782_v5 = vld [vmem:[#allocation10 + $0xc0] sm:$0xff] }
 0x30d   :  { %v1586_v17 = vpop.f32.mrf.mxu0  ;;  %2808 = vmatpush.bf16.msrb.mxu0 %v4775_v46 }
 0x30e   :  { %v1675_v37 = vpop.f32.mrf.mxu1  ;;  %v1443_v43 = vpop.f32.mrf.mxu2  ;;  %v1587_v63 = vadd.f32 %v1586_v17, %v5762_v10  ;;  %2897 = vmatpush.bf16.msrb.mxu1 %v4783_v61 }
 0x30f   :  { %v1532_v29 = vpop.f32.mrf.mxu3  ;;  %v1676_v15 = vadd.f32 %v1675_v37, %v5765_v12  ;;  %v1444_v9 = vadd.f32 %v1443_v43, %v5618_v62 }
 0x310   :  { %v1533_v59 = vadd.f32 %v1532_v29, %v5621_v57  ;;  %v1822_v33 = vmax.f32 %v1587_v63, 0.0 }
 0x311   :  { %v1823_v11 = vmax.f32 %v1676_v15, 0.0  ;;  %v1932_v42 = vmax.f32 %v1444_v9, 0.0  ;;  %2809 = vmatpush.bf16.msrb.mxu0 %v4774_v32 }
 0x312   :  { %v1933_v41 = vmax.f32 %v1533_v59, 0.0  ;;  %v5879_v17 = vpack.c.bf16 %v1822_v33, %v1814_v56  ;;  %2898 = vmatpush.bf16.msrb.mxu1 %v4782_v5 }
 0x313   :  { %2657 = vmatmul.bf16.gmra.mxu2 %v5409_v49  ;;  %2746 = vmatmul.bf16.gmra.mxu3 %v5411_v48  ;;  %v5881_v37 = vpack.c.bf16 %v1823_v11, %v1815_v31  ;;  %v5883_v50 = vpack.c.bf16 %v1932_v42, %v1924_v30 }
 0x314   :  { %v5885_v16 = vpack.c.bf16 %v1933_v41, %v1925_v6 }
 0x315   :  { %v1589_v35 = vpop.f32.mrf.mxu0 }
 0x316   :  { %v1678_v22 = vpop.f32.mrf.mxu1  ;;  %v1446_v43 = vpop.f32.mrf.mxu2  ;;  %v1590_v49 = vadd.f32 %v1589_v35, %v5762_v10 }
 0x317   :  { %v1535_v29 = vpop.f32.mrf.mxu3  ;;  %v1679_v48 = vadd.f32 %v1678_v22, %v5765_v12  ;;  %v1447_v63 = vadd.f32 %v1446_v43, %v5618_v62 }
 0x318   :  { %1628 = vmatmul.bf16.gmra.mxu0 %v5405_v47  ;;  %v1536_v41 = vadd.f32 %v1535_v29, %v5621_v57  ;;  %v1830_v46 = vmax.f32 %v1590_v49, 0.0 }
 0x319   :  { %1717 = vmatmul.bf16.gmra.mxu1 %v5405_v47  ;;  %v1831_v61 = vmax.f32 %v1679_v48, 0.0  ;;  %v1940_v42 = vmax.f32 %v1447_v63, 0.0 }
 0x31a   :  { %v1941_v32 = vmax.f32 %v1536_v41, 0.0 }
 0x31d   :  { %v1591_v15 = vpop.f32.mrf.mxu0 }
 0x31e   :  { %v1680_v9 = vpop.f32.mrf.mxu1  ;;  %v1448_v59 = vpop.f32.mrf.mxu2  ;;  %v1592_v31 = vadd.f32 %v1591_v15, %v5762_v10 }
 0x31f   :  { %v1537_v56 = vpop.f32.mrf.mxu3  ;;  %v1681_v33 = vadd.f32 %v1680_v9, %v5765_v12  ;;  %v1449_v11 = vadd.f32 %v1448_v59, %v5618_v62 }
 0x320   :  { %v1538_v47 = vadd.f32 %v1537_v56, %v5621_v57  ;;  %v1838_v30 = vmax.f32 %v1592_v31, 0.0 }
 0x321   :  { %v1839_v6 = vmax.f32 %v1681_v33, 0.0  ;;  %v1948_v5 = vmax.f32 %v1449_v11, 0.0 }
 0x322   :  { %v1949_v35 = vmax.f32 %v1538_v47, 0.0  ;;  %v5899_v22 = vpack.c.bf16 %v1838_v30, %v1830_v46 }
 0x323   :  { %2662 = vmatmul.bf16.gmra.mxu2 %v5423_v53  ;;  %2751 = vmatmul.bf16.gmra.mxu3 %v5425_v54  ;;  %v5901_v43 = vpack.c.bf16 %v1839_v6, %v1831_v61  ;;  %v5903_v29 = vpack.c.bf16 %v1948_v5, %v1940_v42 }
 0x324   :  { %v5905_v15 = vpack.c.bf16 %v1949_v35, %v1941_v32 }
 0x325   :  { %7018 = vst [vmem:[#allocation102_spill] sm:$0xff] %v5901_v43  ;;  %v1594_v49 = vpop.f32.mrf.mxu0 }
 0x326   :  { %v1683_v48 = vpop.f32.mrf.mxu1  ;;  %v1451_v9 = vpop.f32.mrf.mxu2  ;;  %v1595_v53 = vadd.f32 %v1594_v49, %v5762_v10 }
 0x327   :  { %v1540_v59 = vpop.f32.mrf.mxu3  ;;  %v1684_v54 = vadd.f32 %v1683_v48, %v5765_v12  ;;  %v1452_v63 = vadd.f32 %v1451_v9, %v5618_v62 }
 0x328   :  { %1633 = vmatmul.bf16.gmra.mxu0 %v5419_v52  ;;  %v1541_v41 = vadd.f32 %v1540_v59, %v5621_v57  ;;  %v1846_v30 = vmax.f32 %v1595_v53, 0.0 }
 0x329   :  { %1722 = vmatmul.bf16.gmra.mxu1 %v5419_v52  ;;  %v1847_v6 = vmax.f32 %v1684_v54, 0.0  ;;  %v1956_v5 = vmax.f32 %v1452_v63, 0.0 }
 0x32a   :  { %v1957_v35 = vmax.f32 %v1541_v41, 0.0 }
 0x32d   :  { %v1596_v56 = vpop.f32.mrf.mxu0 }
 0x32e   :  { %v1685_v31 = vpop.f32.mrf.mxu1  ;;  %v1453_v33 = vpop.f32.mrf.mxu2  ;;  %v1597_v47 = vadd.f32 %v1596_v56, %v5762_v10 }
 0x32f   :  { %v1542_v11 = vpop.f32.mrf.mxu3  ;;  %v1686_v46 = vadd.f32 %v1685_v31, %v5765_v12  ;;  %v1454_v61 = vadd.f32 %v1453_v33, %v5618_v62 }
 0x330   :  { %v1543_v52 = vadd.f32 %v1542_v11, %v5621_v57  ;;  %v1854_v42 = vmax.f32 %v1597_v47, 0.0 }
 0x331   :  { %v1855_v32 = vmax.f32 %v1686_v46, 0.0  ;;  %v1964_v49 = vmax.f32 %v1454_v61, 0.0 }
 0x332   :  { %v1965_v48 = vmax.f32 %v1543_v52, 0.0  ;;  %v5919_v9 = vpack.c.bf16 %v1854_v42, %v1846_v30 }
 0x333   :  { %2667 = vmatmul.bf16.gmra.mxu2 %v5449_v4  ;;  %2756 = vmatmul.bf16.gmra.mxu3 %v5451_v39  ;;  %v5921_v59 = vpack.c.bf16 %v1855_v32, %v1847_v6  ;;  %v5923_v56 = vpack.c.bf16 %v1964_v49, %v1956_v5 }
 0x334   :  { %7019 = vst [vmem:[#allocation103_spill] sm:$0xff] %v5919_v9  ;;  %v5925_v31 = vpack.c.bf16 %v1965_v48, %v1957_v35 }
 0x335   :  { %7020 = vst [vmem:[#allocation104_spill] sm:$0xff] %v5921_v59  ;;  %v1599_v53 = vpop.f32.mrf.mxu0 }
 0x336   :  { %7021 = vst [vmem:[#allocation105_spill] sm:$0xff] %v5923_v56  ;;  %v1688_v54 = vpop.f32.mrf.mxu1  ;;  %v1456_v33 = vpop.f32.mrf.mxu2  ;;  %v1600_v4 = vadd.f32 %v1599_v53, %v5762_v10  ;;  %v7079_v56 = vld [vmem:[#allocation84_spill] sm:$0xff] }
 0x337   :  { %7022 = vst [vmem:[#allocation106_spill] sm:$0xff] %v5925_v31  ;;  %v1545_v11 = vpop.f32.mrf.mxu3  ;;  %v1689_v39 = vadd.f32 %v1688_v54, %v5765_v12  ;;  %v1457_v63 = vadd.f32 %v1456_v33, %v5618_v62  ;;  %v7023_v33 = vld [vmem:[#allocation50_spill] sm:$0xff] }
 0x338   :  { %2810 = vmatmul.bf16.vlgmr.msrb.gmra.mxu0 %v5443_v0  ;;  %v1546_v41 = vadd.f32 %v1545_v11, %v5621_v57  ;;  %v1862_v42 = vmax.f32 %v1600_v4, 0.0  ;;  %v7077_v31 = vld [vmem:[#allocation86_spill] sm:$0xff] }
 0x339   :  { %2899 = vmatmul.bf16.vlgmr.msrb.gmra.mxu1 %v5445_v21  ;;  %v1863_v32 = vmax.f32 %v1689_v39, 0.0  ;;  %v1972_v49 = vmax.f32 %v1457_v63, 0.0 }
 0x33a   :  { %v1973_v48 = vmax.f32 %v1546_v41, 0.0  ;;  %v7028_v41 = vld [vmem:[#allocation48_spill] sm:$0xff] }
 0x33d   :  { %v1601_v47 = vpop.f32.mrf.mxu0 }
 0x33e   :  { %v1690_v46 = vpop.f32.mrf.mxu1  ;;  %v1458_v61 = vpop.f32.mrf.mxu2  ;;  %v1602_v30 = vadd.f32 %v1601_v47, %v5762_v10 }
 0x33f   :  { %v1547_v52 = vpop.f32.mrf.mxu3  ;;  %v1691_v6 = vadd.f32 %v1690_v46, %v5765_v12  ;;  %v1459_v0 = vadd.f32 %v1458_v61, %v5618_v62 }
 0x340   :  { %v1548_v21 = vadd.f32 %v1547_v52, %v5621_v57  ;;  %v1870_v5 = vmax.f32 %v1602_v30, 0.0  ;;  %v7029_v52 = vld [vmem:[#allocation49_spill] sm:$0xff] }
 0x341   :  { %v1871_v35 = vmax.f32 %v1691_v6, 0.0  ;;  %v1980_v53 = vmax.f32 %v1459_v0, 0.0 }
 0x342   :  { %v1981_v54 = vmax.f32 %v1548_v21, 0.0  ;;  %v5939_v11 = vpack.c.bf16 %v1870_v5, %v1862_v42 }
 0x343   :  { %2672 = vmatmul.bf16.gmra.mxu2 %v5469_v13  ;;  %2761 = vmatmul.bf16.gmra.mxu3 %v7023_v33  ;;  %v5941_v47 = vpack.c.bf16 %v1871_v35, %v1863_v32  ;;  %v5943_v46 = vpack.c.bf16 %v1980_v53, %v1972_v49  ;;  %v7030_v33 = vld [vmem:[#allocation53_spill] sm:$0xff] }
 0x344   :  { %7024 = vst [vmem:[#allocation50_spill] sm:$0xff] %v5939_v11  ;;  %v5945_v62 = vpack.c.bf16 %v1981_v54, %v1973_v48 }
 0x345   :  { %7025 = vst [vmem:[#allocation107_spill] sm:$0xff] %v5941_v47  ;;  %v1604_v57 = vpop.f32.mrf.mxu0 }
 0x346   :  { %7026 = vst [vmem:[#allocation108_spill] sm:$0xff] %v5943_v46  ;;  %v1693_v4 = vpop.f32.mrf.mxu1  ;;  %v2633_v39 = vpop.f32.mrf.mxu2  ;;  %v1605_v13 = vadd.f32 %v1604_v57, %v5762_v10 }
 0x347   :  { %7027 = vst [vmem:[#allocation109_spill] sm:$0xff] %v5945_v62  ;;  %v2722_v61 = vpop.f32.mrf.mxu3  ;;  %v1694_v30 = vadd.f32 %v1693_v4, %v5765_v12 }
 0x348   :  { %v5947_v63 = vadd.f32 %v2722_v61, %v2633_v39  ;;  %2815 = vmatmul.bf16.gmra.mxu0 %v7028_v41  ;;  %v1878_v49 = vmax.f32 %v1605_v13, 0.0  ;;  %v7031_v39 = vld [vmem:[#allocation54_spill] sm:$0xff]  ;;  %v7035_v13 = vld [vmem:[#allocation52_spill] sm:$0xff] }
 0x349   :  { %2904 = vmatmul.bf16.gmra.mxu1 %v7029_v52  ;;  %v1879_v48 = vmax.f32 %v1694_v30, 0.0 }
 0x34d   :  { %v1606_v6 = vpop.f32.mrf.mxu0 }
 0x34e   :  { %v1695_v0 = vpop.f32.mrf.mxu1  ;;  %v1607_v21 = vadd.f32 %v1606_v6, %v5762_v10  ;;  %v2635_v32 = vpop.f32.mrf.mxu2 }
 0x34f   :  { %v1696_v42 = vadd.f32 %v1695_v0, %v5765_v12  ;;  %v2724_v5 = vpop.f32.mrf.mxu3 }
 0x350   :  { %v5955_v35 = vadd.f32 %v2724_v5, %v2635_v32  ;;  %v1886_v53 = vmax.f32 %v1607_v21, 0.0  ;;  %v7034_v32 = vld [vmem:[#allocation51_spill] sm:$0xff] }
 0x351   :  { %v1887_v54 = vmax.f32 %v1696_v42, 0.0 }
 0x352   :  { %v5959_v57 = vpack.c.bf16 %v1886_v53, %v1878_v49 }
 0x353   :  { %2677 = vmatmul.bf16.gmra.mxu2 %v7030_v33  ;;  %2766 = vmatmul.bf16.gmra.mxu3 %v7031_v39  ;;  %v5961_v4 = vpack.c.bf16 %v1887_v54, %v1879_v48 }
 0x354   :  { %7032 = vst [vmem:[#allocation48_spill] sm:$0xff] %v5959_v57 }
 0x355   :  { %7033 = vst [vmem:[#allocation49_spill] sm:$0xff] %v5961_v4  ;;  %v1609_v61 = vpop.f32.mrf.mxu0  ;;  %v7036_v4 = vld [vmem:[#allocation57_spill] sm:$0xff] }
 0x356   :  { %v1698_v41 = vpop.f32.mrf.mxu1  ;;  %v2638_v52 = vpop.f32.mrf.mxu2  ;;  %v1610_v30 = vadd.f32 %v1609_v61, %v5762_v10 }
 0x357   :  { %v2727_v6 = vpop.f32.mrf.mxu3  ;;  %v1699_v21 = vadd.f32 %v1698_v41, %v5765_v12 }
 0x358   :  { %v5963_v0 = vadd.f32 %v2727_v6, %v2638_v52  ;;  %2820 = vmatmul.bf16.gmra.mxu0 %v7034_v32  ;;  %v1894_v39 = vmax.f32 %v1610_v30, 0.0  ;;  %v7041_v30 = vld [vmem:[#allocation56_spill] sm:$0xff] }
 0x359   :  { %2909 = vmatmul.bf16.gmra.mxu1 %v7035_v13  ;;  %v1895_v52 = vmax.f32 %v1699_v21, 0.0  ;;  %v7037_v13 = vld [vmem:[#allocation58_spill] sm:$0xff] }
 0x35d   :  { %v1611_v42 = vpop.f32.mrf.mxu0 }
 0x35e   :  { %v1700_v5 = vpop.f32.mrf.mxu1  ;;  %v1612_v49 = vadd.f32 %v1611_v42, %v5762_v10  ;;  %v2640_v53 = vpop.f32.mrf.mxu2 }
 0x35f   :  { %v1701_v48 = vadd.f32 %v1700_v5, %v5765_v12  ;;  %v2729_v54 = vpop.f32.mrf.mxu3 }
 0x360   :  { %v5971_v33 = vadd.f32 %v2729_v54, %v2640_v53  ;;  %v1902_v6 = vmax.f32 %v1612_v49, 0.0  ;;  %v7040_v53 = vld [vmem:[#allocation55_spill] sm:$0xff] }
 0x361   :  { %v1903_v32 = vmax.f32 %v1701_v48, 0.0 }
 0x362   :  { %v5975_v61 = vpack.c.bf16 %v1902_v6, %v1894_v39 }
 0x363   :  { %2682 = vmatmul.bf16.gmra.mxu2 %v7036_v4  ;;  %2771 = vmatmul.bf16.gmra.mxu3 %v7037_v13  ;;  %v5977_v41 = vpack.c.bf16 %v1903_v32, %v1895_v52 }
 0x364   :  { %7038 = vst [vmem:[#allocation53_spill] sm:$0xff] %v5975_v61 }
 0x365   :  { %7039 = vst [vmem:[#allocation54_spill] sm:$0xff] %v5977_v41  ;;  %v1614_v57 = vpop.f32.mrf.mxu0  ;;  %v7042_v41 = vld [vmem:[#allocation61_spill] sm:$0xff] }
 0x366   :  { %v1703_v42 = vpop.f32.mrf.mxu1  ;;  %v2643_v47 = vpop.f32.mrf.mxu2  ;;  %v1615_v21 = vadd.f32 %v1614_v57, %v5762_v10 }
 0x367   :  { %v2732_v5 = vpop.f32.mrf.mxu3  ;;  %v1704_v4 = vadd.f32 %v1703_v42, %v5765_v12 }
 0x368   :  { %v5979_v11 = vadd.f32 %v2732_v5, %v2643_v47  ;;  %2825 = vmatmul.bf16.gmra.mxu0 %v7040_v53  ;;  %v1910_v47 = vmax.f32 %v1615_v21, 0.0  ;;  %v7047_v21 = vld [vmem:[#allocation60_spill] sm:$0xff] }
 0x369   :  { %2914 = vmatmul.bf16.gmra.mxu1 %v7041_v30  ;;  %v1911_v13 = vmax.f32 %v1704_v4, 0.0  ;;  %v7043_v30 = vld [vmem:[#allocation62_spill] sm:$0xff] }
 0x36d   :  { %v1616_v49 = vpop.f32.mrf.mxu0 }
 0x36e   :  { %v1705_v48 = vpop.f32.mrf.mxu1  ;;  %v1617_v54 = vadd.f32 %v1616_v49, %v5762_v10  ;;  %v2645_v52 = vpop.f32.mrf.mxu2 }
 0x36f   :  { %v1706_v39 = vadd.f32 %v1705_v48, %v5765_v12  ;;  %v2734_v6 = vpop.f32.mrf.mxu3 }
 0x370   :  { %v5987_v32 = vadd.f32 %v2734_v6, %v2645_v52  ;;  %v1918_v5 = vmax.f32 %v1617_v54, 0.0  ;;  %v7046_v52 = vld [vmem:[#allocation59_spill] sm:$0xff] }
 0x371   :  { %v1919_v53 = vmax.f32 %v1706_v39, 0.0 }
 0x372   :  { %v5991_v57 = vpack.c.bf16 %v1918_v5, %v1910_v47 }
 0x373   :  { %2687 = vmatmul.bf16.gmra.mxu2 %v7042_v41  ;;  %2776 = vmatmul.bf16.gmra.mxu3 %v7043_v30  ;;  %v5993_v42 = vpack.c.bf16 %v1919_v53, %v1911_v13 }
 0x374   :  { %7044 = vst [vmem:[#allocation51_spill] sm:$0xff] %v5991_v57 }
 0x375   :  { %7045 = vst [vmem:[#allocation52_spill] sm:$0xff] %v5993_v42  ;;  %v1619_v61 = vpop.f32.mrf.mxu0 }
 0x376   :  { %v1708_v49 = vpop.f32.mrf.mxu1  ;;  %v2648_v62 = vpop.f32.mrf.mxu2  ;;  %v1620_v4 = vadd.f32 %v1619_v61, %v5762_v10  ;;  %v4797_v61 = vld [vmem:[#allocation10 + $0x138] sm:$0xff] }
 0x377   :  { %v2737_v48 = vpop.f32.mrf.mxu3  ;;  %v1709_v41 = vadd.f32 %v1708_v49, %v5765_v12  ;;  %v4805_v49 = vld [vmem:[#allocation10 + $0x178] sm:$0xff]  ;;  %2980 = vmatpush.bf16.msrb.mxu2 %v4797_v61 }
 0x378   :  { %v5995_v46 = vadd.f32 %v2737_v48, %v2648_v62  ;;  %2830 = vmatmul.bf16.gmra.mxu0 %v7046_v52  ;;  %v1926_v62 = vmax.f32 %v1620_v4, 0.0  ;;  %3069 = vmatpush.bf16.msrb.mxu3 %v4805_v49  ;;  %v4796_v4 = vld [vmem:[#allocation10 + $0x130] sm:$0xff] }
 0x379   :  { %2919 = vmatmul.bf16.gmra.mxu1 %v7047_v21  ;;  %v1927_v30 = vmax.f32 %v1709_v41, 0.0  ;;  %v4804_v41 = vld [vmem:[#allocation10 + $0x170] sm:$0xff] }
 0x37b   :  { %2981 = vmatpush.bf16.msrb.mxu2 %v4796_v4 }
 0x37c   :  { %3070 = vmatpush.bf16.msrb.mxu3 %v4804_v41 }
 0x37d   :  { %v1621_v54 = vpop.f32.mrf.mxu0 }
 0x37e   :  { %v1710_v39 = vpop.f32.mrf.mxu1  ;;  %v1622_v6 = vadd.f32 %v1621_v54, %v5762_v10  ;;  %v2650_v13 = vpop.f32.mrf.mxu2 }
 0x37f   :  { %v1711_v47 = vadd.f32 %v1710_v39, %v5765_v12  ;;  %v2739_v5 = vpop.f32.mrf.mxu3 }
 0x380   :  { %v6003_v53 = vadd.f32 %v2739_v5, %v2650_v13  ;;  %v1934_v48 = vmax.f32 %v1622_v6, 0.0 }
 0x381   :  { %v1935_v52 = vmax.f32 %v1711_v47, 0.0 }
 0x382   :  { %v6007_v21 = vpack.c.bf16 %v1934_v48, %v1926_v62 }
 0x383   :  { %2692 = vmatmul.bf16.gmra.mxu2 %v5549_v28  ;;  %2781 = vmatmul.bf16.gmra.mxu3 %v5551_v45  ;;  %v6009_v42 = vpack.c.bf16 %v1935_v52, %v1927_v30  ;;  %v4795_v28 = vld [vmem:[#allocation10 + $0x128] sm:$0xff] }
 0x384   :  { %7048 = vst [vmem:[#allocation57_spill] sm:$0xff] %v6007_v21  ;;  %v4803_v45 = vld [vmem:[#allocation10 + $0x168] sm:$0xff]  ;;  %2982 = vmatpush.bf16.msrb.mxu2 %v4795_v28  ;;  %v7051_v28 = vld [vmem:[#allocation66_spill] sm:$0xff] }
 0x385   :  { %7049 = vst [vmem:[#allocation58_spill] sm:$0xff] %v6009_v42  ;;  %v1624_v54 = vpop.f32.mrf.mxu0  ;;  %3071 = vmatpush.bf16.msrb.mxu3 %v4803_v45  ;;  %v4793_v45 = vld [vmem:[#allocation10 + $0x118] sm:$0xff] }
 0x386   :  { %v1713_v39 = vpop.f32.mrf.mxu1  ;;  %v2653_v13 = vpop.f32.mrf.mxu2  ;;  %v1625_v47 = vadd.f32 %v1624_v54, %v5762_v10 }
 0x387   :  { %v2742_v5 = vpop.f32.mrf.mxu3  ;;  %v1714_v62 = vadd.f32 %v1713_v39, %v5765_v12  ;;  %v7050_v39 = vld [vmem:[#allocation65_spill] sm:$0xff] }
 0x388   :  { %v6011_v6 = vadd.f32 %v2742_v5, %v2653_v13  ;;  %2835 = vmatmul.bf16.gmra.mxu0 %v5545_v24  ;;  %v4794_v13 = vld [vmem:[#allocation10 + $0x120] sm:$0xff]  ;;  %v1942_v4 = vmax.f32 %v1625_v47, 0.0 }
 0x389   :  { %2924 = vmatmul.bf16.gmra.mxu1 %v5547_v25  ;;  %v4802_v25 = vld [vmem:[#allocation10 + $0x160] sm:$0xff]  ;;  %v1943_v41 = vmax.f32 %v1714_v62, 0.0  ;;  %2983 = vmatpush.bf16.msrb.mxu2 %v4794_v13 }
 0x38a   :  { %3072 = vmatpush.bf16.msrb.mxu3 %v4802_v25  ;;  %v7055_v13 = vld [vmem:[#allocation64_spill] sm:$0xff]  ;;  %v4799_v25 = vld [vmem:[#allocation10 + $0x148] sm:$0xff] }
 0x38d   :  { %v1626_v30 = vpop.f32.mrf.mxu0  ;;  %2984 = vmatpush.bf16.msrb.mxu2 %v4793_v45 }
 0x38e   :  { %v1715_v48 = vpop.f32.mrf.mxu1  ;;  %v1627_v52 = vadd.f32 %v1626_v30, %v5762_v10  ;;  %v2655_v49 = vpop.f32.mrf.mxu2  ;;  %v4801_v30 = vld [vmem:[#allocation10 + $0x158] sm:$0xff] }
 0x38f   :  { %v1716_v61 = vadd.f32 %v1715_v48, %v5765_v12  ;;  %v2744_v24 = vpop.f32.mrf.mxu3  ;;  %3073 = vmatpush.bf16.msrb.mxu3 %v4801_v30 }
 0x390   :  { %v6019_v5 = vadd.f32 %v2744_v24, %v2655_v49  ;;  %v1950_v42 = vmax.f32 %v1627_v52, 0.0  ;;  %v4792_v52 = vld [vmem:[#allocation10 + $0x110] sm:$0xff]  ;;  %v7054_v24 = vld [vmem:[#allocation63_spill] sm:$0xff] }
 0x391   :  { %v1951_v54 = vmax.f32 %v1716_v61, 0.0  ;;  %v4800_v61 = vld [vmem:[#allocation10 + $0x150] sm:$0xff]  ;;  %2985 = vmatpush.bf16.msrb.mxu2 %v4792_v52 }
 0x392   :  { %v6023_v21 = vpack.c.bf16 %v1950_v42, %v1942_v4  ;;  %v4791_v42 = vld [vmem:[#allocation10 + $0x108] sm:$0xff] }
 0x393   :  { %2697 = vmatmul.bf16.gmra.mxu2 %v7050_v39  ;;  %2786 = vmatmul.bf16.gmra.mxu3 %v7051_v28  ;;  %v6025_v48 = vpack.c.bf16 %v1951_v54, %v1943_v41 }
 0x394   :  { %7052 = vst [vmem:[#allocation55_spill] sm:$0xff] %v6023_v21  ;;  %3074 = vmatpush.bf16.msrb.mxu3 %v4800_v61 }
 0x395   :  { %7053 = vst [vmem:[#allocation56_spill] sm:$0xff] %v6025_v48  ;;  %v1629_v57 = vpop.f32.mrf.mxu0  ;;  %2986 = vmatpush.bf16.msrb.mxu2 %v4791_v42 }
 0x396   :  { %v1718_v59 = vpop.f32.mrf.mxu1  ;;  %v2658_v47 = vpop.f32.mrf.mxu2  ;;  %v1630_v4 = vadd.f32 %v1629_v57, %v5762_v10 }
 0x397   :  { %v2747_v62 = vpop.f32.mrf.mxu3  ;;  %v1719_v41 = vadd.f32 %v1718_v59, %v5765_v12  ;;  %v7056_v59 = vld [vmem:[#allocation69_spill] sm:$0xff] }
 0x398   :  { %v6027_v49 = vadd.f32 %v2747_v62, %v2658_v47  ;;  %2840 = vmatmul.bf16.gmra.mxu0 %v7054_v24  ;;  %3075 = vmatpush.bf16.msrb.mxu3 %v4799_v25  ;;  %v4790_v62 = vld [vmem:[#allocation10 + $0x100] sm:$0xff]  ;;  %v1958_v61 = vmax.f32 %v1630_v4, 0.0  ;;  %v7059_v4 = vld [vmem:[#allocation67_spill] sm:$0xff] }
 0x399   :  { %2929 = vmatmul.bf16.gmra.mxu1 %v7055_v13  ;;  %v4798_v24 = vld [vmem:[#allocation10 + $0x140] sm:$0xff]  ;;  %v1959_v13 = vmax.f32 %v1719_v41, 0.0  ;;  %2987 = vmatpush.bf16.msrb.mxu2 %v4790_v62 }
 0x39a   :  { %v7060_v41 = vld [vmem:[#allocation68_spill] sm:$0xff] }
 0x39c   :  { %3076 = vmatpush.bf16.msrb.mxu3 %v4798_v24 }
 0x39d   :  { %v1631_v54 = vpop.f32.mrf.mxu0 }
 0x39e   :  { %v1720_v39 = vpop.f32.mrf.mxu1  ;;  %v1632_v28 = vadd.f32 %v1631_v54, %v5762_v10  ;;  %v2660_v30 = vpop.f32.mrf.mxu2 }
 0x39f   :  { %v1721_v45 = vadd.f32 %v1720_v39, %v5765_v12  ;;  %v2749_v47 = vpop.f32.mrf.mxu3 }
 0x3a0   :  { %v6035_v52 = vadd.f32 %v2749_v47, %v2660_v30  ;;  %v1966_v48 = vmax.f32 %v1632_v28, 0.0 }
 0x3a1   :  { %v1967_v57 = vmax.f32 %v1721_v45, 0.0 }
 0x3a2   :  { %v6039_v42 = vpack.c.bf16 %v1966_v48, %v1958_v61 }
 0x3a3   :  { %2702 = vmatmul.bf16.gmra.mxu2 %v5589_v44  ;;  %2791 = vmatmul.bf16.gmra.mxu3 %v7056_v59  ;;  %v6041_v25 = vpack.c.bf16 %v1967_v57, %v1959_v13 }
 0x3a4   :  { %7057 = vst [vmem:[#allocation61_spill] sm:$0xff] %v6039_v42  ;;  %v7075_v42 = vld [vmem:[#allocation80_spill] sm:$0xff] }
 0x3a5   :  { %7058 = vst [vmem:[#allocation62_spill] sm:$0xff] %v6041_v25  ;;  %v1634_v54 = vpop.f32.mrf.mxu0 }
 0x3a6   :  { %v1723_v39 = vpop.f32.mrf.mxu1  ;;  %v2663_v21 = vpop.f32.mrf.mxu2  ;;  %v1635_v28 = vadd.f32 %v1634_v54, %v5762_v10 }
 0x3a7   :  { %v2752_v9 = vpop.f32.mrf.mxu3  ;;  %v1724_v44 = vadd.f32 %v1723_v39, %v5765_v12 }
 0x3a8   :  { %v6043_v30 = vadd.f32 %v2752_v9, %v2663_v21  ;;  %2845 = vmatmul.bf16.gmra.mxu0 %v7059_v4  ;;  %v1974_v9 = vmax.f32 %v1635_v28, 0.0  ;;  %v7061_v4 = vld [vmem:[#allocation72_spill] sm:$0xff] }
 0x3a9   :  { %2934 = vmatmul.bf16.gmra.mxu1 %v7060_v41  ;;  %v1975_v21 = vmax.f32 %v1724_v44, 0.0  ;;  %v7062_v41 = vld [vmem:[#allocation73_spill] sm:$0xff]  ;;  %v7065_v44 = vld [vmem:[#allocation70_spill] sm:$0xff] }
 0x3ad   :  { %v1636_v45 = vpop.f32.mrf.mxu0 }
 0x3ae   :  { %v1725_v47 = vpop.f32.mrf.mxu1  ;;  %v1637_v48 = vadd.f32 %v1636_v45, %v5762_v10  ;;  %v2665_v24 = vpop.f32.mrf.mxu2 }
 0x3af   :  { %v1726_v62 = vadd.f32 %v1725_v47, %v5765_v12  ;;  %v2754_v61 = vpop.f32.mrf.mxu3 }
 0x3b0   :  { %v6051_v13 = vadd.f32 %v2754_v61, %v2665_v24  ;;  %v1982_v57 = vmax.f32 %v1637_v48, 0.0  ;;  %v7066_v48 = vld [vmem:[#allocation71_spill] sm:$0xff] }
 0x3b1   :  { %v1983_v59 = vmax.f32 %v1726_v62, 0.0 }
 0x3b2   :  { %v6055_v54 = vpack.c.bf16 %v1982_v57, %v1974_v9 }
 0x3b3   :  { %2707 = vmatmul.bf16.gmra.mxu2 %v7061_v4  ;;  %2796 = vmatmul.bf16.gmra.mxu3 %v7062_v41  ;;  %v6057_v39 = vpack.c.bf16 %v1983_v59, %v1975_v21 }
 0x3b4   :  { %7063 = vst [vmem:[#allocation59_spill] sm:$0xff] %v6055_v54  ;;  %v7073_v54 = vld [vmem:[#allocation82_spill] sm:$0xff] }
 0x3b5   :  { %7064 = vst [vmem:[#allocation60_spill] sm:$0xff] %v6057_v39  ;;  %v2811_v25 = vpop.f32.mrf.mxu0  ;;  %v7071_v39 = vld [vmem:[#allocation77_spill] sm:$0xff] }
 0x3b6   :  { %v2900_v10 = vpop.f32.mrf.mxu1  ;;  %v2668_v45 = vpop.f32.mrf.mxu2  ;;  %v2812_v47 = vadd.f32 %v2811_v25, %v5947_v63  ;;  %v7067_v63 = vld [vmem:[#allocation76_spill] sm:$0xff] }
 0x3b7   :  { %v2757_v12 = vpop.f32.mrf.mxu3 }
 0x3b8   :  { %v6060_v24 = vadd.f32 %v2757_v12, %v2668_v45  ;;  %v6062_v28 = vadd.f32 %v2900_v10, %v2812_v47  ;;  %2850 = vmatmul.bf16.gmra.mxu0 %v7065_v44 }
 0x3b9   :  { %2939 = vmatmul.bf16.gmra.mxu1 %v7066_v48  ;;  %v7068_v48 = vld [vmem:[#allocation74_spill] sm:$0xff] }
 0x3bd   :  { %v2813_v62 = vpop.f32.mrf.mxu0 }
 0x3be   :  { %v2902_v61 = vpop.f32.mrf.mxu1  ;;  %v2670_v9 = vpop.f32.mrf.mxu2  ;;  %v2814_v21 = vadd.f32 %v2813_v62, %v5955_v35  ;;  %v7069_v35 = vld [vmem:[#allocation75_spill] sm:$0xff] }
 0x3bf   :  { %v2759_v57 = vpop.f32.mrf.mxu3 }
 0x3c0   :  { %v6067_v59 = vadd.f32 %v2759_v57, %v2670_v9  ;;  %v6069_v4 = vadd.f32 %v2902_v61, %v2814_v21 }
 0x3c3   :  { %2988 = vmatmul.bf16.vlgmr.msrb.gmra.mxu2 %v5637_v14  ;;  %3077 = vmatmul.bf16.vlgmr.msrb.gmra.mxu3 %v7067_v63 }
 0x3c5   :  { %v2816_v25 = vpop.f32.mrf.mxu0 }
 0x3c6   :  { %v2905_v41 = vpop.f32.mrf.mxu1  ;;  %v2673_v10 = vpop.f32.mrf.mxu2  ;;  %v2817_v12 = vadd.f32 %v2816_v25, %v5963_v0  ;;  %v7070_v0 = vld [vmem:[#allocation79_spill] sm:$0xff] }
 0x3c7   :  { %v2762_v45 = vpop.f32.mrf.mxu3 }
 0x3c8   :  { %v6074_v47 = vadd.f32 %v2762_v45, %v2673_v10  ;;  %v6076_v44 = vadd.f32 %v2905_v41, %v2817_v12  ;;  %2855 = vmatmul.bf16.gmra.mxu0 %v7068_v48 }
 0x3c9   :  { %2944 = vmatmul.bf16.gmra.mxu1 %v7069_v35 }
 0x3cd   :  { %v2818_v62 = vpop.f32.mrf.mxu0 }
 0x3ce   :  { %v2907_v61 = vpop.f32.mrf.mxu1  ;;  %v2675_v9 = vpop.f32.mrf.mxu2  ;;  %v2819_v57 = vadd.f32 %v2818_v62, %v5971_v33  ;;  %v7072_v33 = vld [vmem:[#allocation78_spill] sm:$0xff] }
 0x3cf   :  { %v2764_v14 = vpop.f32.mrf.mxu3 }
 0x3d0   :  { %v6081_v21 = vadd.f32 %v2764_v14, %v2675_v9  ;;  %v6083_v63 = vadd.f32 %v2907_v61, %v2819_v57 }
 0x3d3   :  { %2993 = vmatmul.bf16.gmra.mxu2 %v5657_v1  ;;  %3082 = vmatmul.bf16.gmra.mxu3 %v7070_v0 }
 0x3d5   :  { %v2821_v25 = vpop.f32.mrf.mxu0 }
 0x3d6   :  { %v2910_v41 = vpop.f32.mrf.mxu1  ;;  %v2678_v10 = vpop.f32.mrf.mxu2  ;;  %v2822_v12 = vadd.f32 %v2821_v25, %v5979_v11  ;;  %v7074_v11 = vld [vmem:[#allocation83_spill] sm:$0xff] }
 0x3d7   :  { %v2767_v45 = vpop.f32.mrf.mxu3 }
 0x3d8   :  { %v6088_v48 = vadd.f32 %v2767_v45, %v2678_v10  ;;  %v6090_v35 = vadd.f32 %v2910_v41, %v2822_v12  ;;  %2860 = vmatmul.bf16.gmra.mxu0 %v7071_v39 }
 0x3d9   :  { %2949 = vmatmul.bf16.gmra.mxu1 %v7072_v33 }
 0x3dd   :  { %v2823_v62 = vpop.f32.mrf.mxu0 }
 0x3de   :  { %v2912_v61 = vpop.f32.mrf.mxu1  ;;  %v2680_v9 = vpop.f32.mrf.mxu2  ;;  %v2824_v14 = vadd.f32 %v2823_v62, %v5987_v32  ;;  %v7076_v32 = vld [vmem:[#allocation81_spill] sm:$0xff] }
 0x3df   :  { %v2769_v1 = vpop.f32.mrf.mxu3 }
 0x3e0   :  { %v6095_v57 = vadd.f32 %v2769_v1, %v2680_v9  ;;  %v6097_v0 = vadd.f32 %v2912_v61, %v2824_v14 }
 0x3e3   :  { %2998 = vmatmul.bf16.gmra.mxu2 %v7073_v54  ;;  %3087 = vmatmul.bf16.gmra.mxu3 %v7074_v11 }
 0x3e5   :  { %v2826_v25 = vpop.f32.mrf.mxu0 }
 0x3e6   :  { %v2915_v41 = vpop.f32.mrf.mxu1  ;;  %v2683_v10 = vpop.f32.mrf.mxu2  ;;  %v2827_v45 = vadd.f32 %v2826_v25, %v5995_v46  ;;  %v7078_v46 = vld [vmem:[#allocation87_spill] sm:$0xff] }
 0x3e7   :  { %v2772_v39 = vpop.f32.mrf.mxu3 }
 0x3e8   :  { %v6102_v12 = vadd.f32 %v2772_v39, %v2683_v10  ;;  %v6104_v33 = vadd.f32 %v2915_v41, %v2827_v45  ;;  %2865 = vmatmul.bf16.gmra.mxu0 %v7075_v42 }
 0x3e9   :  { %2954 = vmatmul.bf16.gmra.mxu1 %v7076_v32 }
 0x3ed   :  { %v2828_v62 = vpop.f32.mrf.mxu0 }
 0x3ee   :  { %v2917_v61 = vpop.f32.mrf.mxu1  ;;  %v2685_v9 = vpop.f32.mrf.mxu2  ;;  %v2829_v1 = vadd.f32 %v2828_v62, %v6003_v53  ;;  %v7080_v53 = vld [vmem:[#allocation85_spill] sm:$0xff]  ;;  %v4813_v62 = vld [vmem:[#allocation10 + $0x1b8] sm:$0xff] }
 0x3ef   :  { %v2774_v54 = vpop.f32.mrf.mxu3  ;;  %3158 = vmatpush.bf16.msra.mxu0 %v4813_v62 }
 0x3f0   :  { %v6109_v14 = vadd.f32 %v2774_v54, %v2685_v9  ;;  %v6111_v11 = vadd.f32 %v2917_v61, %v2829_v1  ;;  %v4821_v61 = vld [vmem:[#allocation10 + $0x1f8] sm:$0xff]  ;;  %v4820_v9 = vld [vmem:[#allocation10 + $0x1f0] sm:$0xff] }
 0x3f1   :  { %3247 = vmatpush.bf16.msra.mxu1 %v4821_v61 }
 0x3f3   :  { %3003 = vmatmul.bf16.gmra.mxu2 %v7077_v31  ;;  %3092 = vmatmul.bf16.gmra.mxu3 %v7078_v46  ;;  %v4812_v31 = vld [vmem:[#allocation10 + $0x1b0] sm:$0xff] }
 0x3f4   :  { %3159 = vmatpush.bf16.msra.mxu0 %v4812_v31 }
 0x3f5   :  { %v2831_v25 = vpop.f32.mrf.mxu0  ;;  %3248 = vmatpush.bf16.msra.mxu1 %v4820_v9 }
 0x3f6   :  { %v2920_v41 = vpop.f32.mrf.mxu1  ;;  %v2688_v10 = vpop.f32.mrf.mxu2  ;;  %v2832_v39 = vadd.f32 %v2831_v25, %v6011_v6 }
 0x3f7   :  { %v2777_v42 = vpop.f32.mrf.mxu3 }
 0x3f8   :  { %v6116_v45 = vadd.f32 %v2777_v42, %v2688_v10  ;;  %v6118_v32 = vadd.f32 %v2920_v41, %v2832_v39  ;;  %2870 = vmatmul.bf16.gmra.mxu0 %v7079_v56  ;;  %v4811_v56 = vld [vmem:[#allocation10 + $0x1a8] sm:$0xff]  ;;  %v4810_v42 = vld [vmem:[#allocation10 + $0x1a0] sm:$0xff] }
 0x3f9   :  { %2959 = vmatmul.bf16.gmra.mxu1 %v7080_v53  ;;  %v4819_v10 = vld [vmem:[#allocation10 + $0x1e8] sm:$0xff]  ;;  %3160 = vmatpush.bf16.msra.mxu0 %v4811_v56  ;;  %v4818_v39 = vld [vmem:[#allocation10 + $0x1e0] sm:$0xff] }
 0x3fa   :  { %3249 = vmatpush.bf16.msra.mxu1 %v4819_v10 }
 0x3fd   :  { %v2833_v54 = vpop.f32.mrf.mxu0  ;;  %3161 = vmatpush.bf16.msra.mxu0 %v4810_v42 }
 0x3fe   :  { %v2922_v1 = vpop.f32.mrf.mxu1  ;;  %v2690_v46 = vpop.f32.mrf.mxu2  ;;  %v2834_v6 = vadd.f32 %v2833_v54, %v6019_v5  ;;  %3250 = vmatpush.bf16.msra.mxu1 %v4818_v39  ;;  %v7082_v54 = vld [vmem:[#allocation88_spill] sm:$0xff] }
 0x3ff   :  { %v2779_v43 = vpop.f32.mrf.mxu3 }
 0x400   :  { %v6123_v25 = vadd.f32 %v2779_v43, %v2690_v46  ;;  %v6125_v41 = vadd.f32 %v2922_v1, %v2834_v6  ;;  %v4817_v1 = vld [vmem:[#allocation10 + $0x1d8] sm:$0xff]  ;;  %v4808_v46 = vld [vmem:[#allocation10 + $0x190] sm:$0xff] }
 0x401   :  { %v4816_v6 = vld [vmem:[#allocation10 + $0x1d0] sm:$0xff] }
 0x402   :  { %7081 = vst [vmem:[#allocation65_spill] sm:$0xff] %v6125_v41  ;;  %3251 = vmatpush.bf16.msra.mxu1 %v4817_v1 }
 0x403   :  { %3008 = vmatmul.bf16.gmra.mxu2 %v5717_v55  ;;  %3097 = vmatmul.bf16.gmra.mxu3 %v5719_v8  ;;  %v7083_v55 = vld [vmem:[#allocation89_spill] sm:$0xff]  ;;  %v4809_v8 = vld [vmem:[#allocation10 + $0x198] sm:$0xff] }
 0x404   :  { %3162 = vmatpush.bf16.msra.mxu0 %v4809_v8 }
 0x405   :  { %v2836_v53 = vpop.f32.mrf.mxu0 }
 0x406   :  { %v2925_v62 = vpop.f32.mrf.mxu1  ;;  %v2693_v61 = vpop.f32.mrf.mxu2  ;;  %v2837_v31 = vadd.f32 %v2836_v53, %v6027_v49  ;;  %3252 = vmatpush.bf16.msra.mxu1 %v4816_v6 }
 0x407   :  { %v2782_v5 = vpop.f32.mrf.mxu3 }
 0x408   :  { %v6130_v43 = vadd.f32 %v2782_v5, %v2693_v61  ;;  %v6132_v9 = vadd.f32 %v2925_v62, %v2837_v31  ;;  %2875 = vmatmul.bf16.gmra.mxu0 %v7082_v54  ;;  %v4807_v62 = vld [vmem:[#allocation10 + $0x188] sm:$0xff]  ;;  %v4806_v5 = vld [vmem:[#allocation10 + $0x180] sm:$0xff] }
 0x409   :  { %2964 = vmatmul.bf16.gmra.mxu1 %v7083_v55  ;;  %3163 = vmatpush.bf16.msra.mxu0 %v4808_v46  ;;  %v4815_v61 = vld [vmem:[#allocation10 + $0x1c8] sm:$0xff]  ;;  %v4814_v31 = vld [vmem:[#allocation10 + $0x1c0] sm:$0xff] }
 0x40a   :  { %3253 = vmatpush.bf16.msra.mxu1 %v4815_v61  ;;  %v7086_v61 = vld [vmem:[#allocation94_spill] sm:$0xff] }
 0x40d   :  { %v2838_v56 = vpop.f32.mrf.mxu0  ;;  %3164 = vmatpush.bf16.msra.mxu0 %v4807_v62 }
 0x40e   :  { %v2927_v10 = vpop.f32.mrf.mxu1  ;;  %v2695_v41 = vpop.f32.mrf.mxu2  ;;  %v2839_v53 = vadd.f32 %v2838_v56, %v6035_v52  ;;  %3254 = vmatpush.bf16.msra.mxu1 %v4814_v31 }
 0x40f   :  { %v2784_v49 = vpop.f32.mrf.mxu3 }
 0x410   :  { %v6137_v42 = vadd.f32 %v2784_v49, %v2695_v41  ;;  %v6139_v39 = vadd.f32 %v2927_v10, %v2839_v53 }
 0x411   :  { %3165 = vmatpush.bf16.msra.mxu0 %v4806_v5 }
 0x413   :  { %3013 = vmatmul.bf16.gmra.mxu2 %v5737_v38  ;;  %3102 = vmatmul.bf16.gmra.mxu3 %v5739_v18  ;;  %v7084_v38 = vld [vmem:[#allocation90_spill] sm:$0xff] }
 0x415   :  { %v2841_v54 = vpop.f32.mrf.mxu0 }
 0x416   :  { %v2930_v55 = vpop.f32.mrf.mxu1  ;;  %v2698_v8 = vpop.f32.mrf.mxu2  ;;  %v2842_v41 = vadd.f32 %v2841_v54, %v6043_v30  ;;  %v7085_v30 = vld [vmem:[#allocation93_spill] sm:$0xff] }
 0x417   :  { %v2787_v52 = vpop.f32.mrf.mxu3 }
 0x418   :  { %v6144_v1 = vadd.f32 %v2787_v52, %v2698_v8  ;;  %v6146_v46 = vadd.f32 %v2930_v55, %v2842_v41  ;;  %2880 = vmatmul.bf16.gmra.mxu0 %v5733_v26  ;;  %v7087_v41 = vld [vmem:[#allocation91_spill] sm:$0xff] }
 0x419   :  { %2969 = vmatmul.bf16.gmra.mxu1 %v7084_v38 }
 0x41d   :  { %v2843_v18 = vpop.f32.mrf.mxu0 }
 0x41e   :  { %v2932_v6 = vpop.f32.mrf.mxu1  ;;  %v2700_v56 = vpop.f32.mrf.mxu2  ;;  %v2844_v49 = vadd.f32 %v2843_v18, %v6051_v13  ;;  %v7088_v13 = vld [vmem:[#allocation92_spill] sm:$0xff] }
 0x41f   :  { %v2789_v10 = vpop.f32.mrf.mxu3 }
 0x420   :  { %v6151_v53 = vadd.f32 %v2789_v10, %v2700_v56  ;;  %v6153_v62 = vadd.f32 %v2932_v6, %v2844_v49 }
 0x423   :  { %3018 = vmatmul.bf16.gmra.mxu2 %v7085_v30  ;;  %3107 = vmatmul.bf16.gmra.mxu3 %v7086_v61 }
 0x425   :  { %v2846_v5 = vpop.f32.mrf.mxu0 }
 0x426   :  { %v2935_v31 = vpop.f32.mrf.mxu1  ;;  %v2703_v54 = vpop.f32.mrf.mxu2  ;;  %v2847_v55 = vadd.f32 %v2846_v5, %v6060_v24 }
 0x427   :  { %v2792_v26 = vpop.f32.mrf.mxu3 }
 0x428   :  { %v6158_v8 = vadd.f32 %v2792_v26, %v2703_v54  ;;  %v6160_v52 = vadd.f32 %v2935_v31, %v2847_v55  ;;  %2885 = vmatmul.bf16.gmra.mxu0 %v7087_v41 }
 0x429   :  { %2974 = vmatmul.bf16.gmra.mxu1 %v7088_v13 }
 0x42d   :  { %v2848_v38 = vpop.f32.mrf.mxu0 }
 0x42e   :  { %v2937_v18 = vpop.f32.mrf.mxu1  ;;  %v2705_v6 = vpop.f32.mrf.mxu2  ;;  %v2849_v10 = vadd.f32 %v2848_v38, %v6067_v59 }
 0x42f   :  { %v2794_v56 = vpop.f32.mrf.mxu3 }
 0x430   :  { %v6165_v49 = vadd.f32 %v2794_v56, %v2705_v6  ;;  %v6167_v30 = vadd.f32 %v2937_v18, %v2849_v10 }
 0x433   :  { %3023 = vmatmul.bf16.gmra.mxu2 %v5783_v2  ;;  %3112 = vmatmul.bf16.gmra.mxu3 %v5785_v58 }
 0x435   :  { %v2851_v24 = vpop.f32.mrf.mxu0 }
 0x436   :  { %v2940_v61 = vpop.f32.mrf.mxu1  ;;  %v2708_v5 = vpop.f32.mrf.mxu2  ;;  %v2852_v54 = vadd.f32 %v2851_v24, %v6074_v47 }
 0x437   :  { %v2797_v31 = vpop.f32.mrf.mxu3 }
 0x438   :  { %v6172_v26 = vadd.f32 %v2797_v31, %v2708_v5  ;;  %v6174_v55 = vadd.f32 %v2940_v61, %v2852_v54  ;;  %3166 = vmatmul.bf16.vlgmr.msra.gmra.mxu0 %v5777_v51 }
 0x439   :  { %3255 = vmatmul.bf16.vlgmr.msra.gmra.mxu1 %v5779_v34 }
 0x43d   :  { %v2853_v59 = vpop.f32.mrf.mxu0 }
 0x43e   :  { %v2942_v41 = vpop.f32.mrf.mxu1  ;;  %v2710_v13 = vpop.f32.mrf.mxu2  ;;  %v2854_v58 = vadd.f32 %v2853_v59, %v6081_v21  ;;  %v7089_v21 = vld [vmem:[#allocation95_spill] sm:$0xff] }
 0x43f   :  { %v2799_v2 = vpop.f32.mrf.mxu3 }
 0x440   :  { %v6179_v38 = vadd.f32 %v2799_v2, %v2710_v13  ;;  %v6181_v18 = vadd.f32 %v2942_v41, %v2854_v58 }
 0x443   :  { %3028 = vmatmul.bf16.gmra.mxu2 %v5803_v40  ;;  %3117 = vmatmul.bf16.gmra.mxu3 %v5805_v36 }
 0x445   :  { %v2856_v47 = vpop.f32.mrf.mxu0 }
 0x446   :  { %v2945_v6 = vpop.f32.mrf.mxu1  ;;  %v2857_v51 = vadd.f32 %v2856_v47, %v6088_v48  ;;  %v2989_v56 = vpop.f32.mrf.mxu2 }
 0x447   :  { %v3078_v34 = vpop.f32.mrf.mxu3  ;;  %v2990_v10 = vadd.f32 %v2989_v56, %v6062_v28 }
 0x448   :  { %v6187_v24 = vadd.f32 %v2945_v6, %v2857_v51  ;;  %3171 = vmatmul.bf16.gmra.mxu0 %v5799_v23 }
 0x449   :  { %3260 = vmatmul.bf16.gmra.mxu1 %v7089_v21  ;;  %v6191_v61 = vadd.f32 %v3078_v34, %v2990_v10 }
 0x44d   :  { %v2858_v5 = vpop.f32.mrf.mxu0 }
 0x44e   :  { %v2947_v40 = vpop.f32.mrf.mxu1  ;;  %v2859_v36 = vadd.f32 %v2858_v5, %v6095_v57  ;;  %v2991_v31 = vpop.f32.mrf.mxu2  ;;  %v7092_v5 = vld [vmem:[#allocation100_spill] sm:$0xff] }
 0x44f   :  { %v3080_v54 = vpop.f32.mrf.mxu3  ;;  %v2992_v48 = vadd.f32 %v2991_v31, %v6069_v4  ;;  %v7090_v4 = vld [vmem:[#allocation96_spill] sm:$0xff] }
 0x450   :  { %v6195_v59 = vadd.f32 %v2947_v40, %v2859_v36 }
 0x451   :  { %v6197_v41 = vadd.f32 %v3080_v54, %v2992_v48 }
 0x453   :  { %3033 = vmatmul.bf16.gmra.mxu2 %v5823_v20  ;;  %3122 = vmatmul.bf16.gmra.mxu3 %v5825_v3 }
 0x455   :  { %v2861_v23 = vpop.f32.mrf.mxu0 }
 0x456   :  { %v2950_v28 = vpop.f32.mrf.mxu1  ;;  %v2862_v13 = vadd.f32 %v2861_v23, %v6102_v12  ;;  %v2994_v2 = vpop.f32.mrf.mxu2  ;;  %v7093_v23 = vld [vmem:[#allocation97_spill] sm:$0xff] }
 0x457   :  { %v3083_v58 = vpop.f32.mrf.mxu3  ;;  %v2995_v57 = vadd.f32 %v2994_v2, %v6076_v44  ;;  %v7091_v44 = vld [vmem:[#allocation99_spill] sm:$0xff] }
 0x458   :  { %v6203_v47 = vadd.f32 %v2950_v28, %v2862_v13  ;;  %3176 = vmatmul.bf16.gmra.mxu0 %v5819_v60 }
 0x459   :  { %3265 = vmatmul.bf16.gmra.mxu1 %v7090_v4  ;;  %v6207_v6 = vadd.f32 %v3083_v58, %v2995_v57 }
 0x45d   :  { %v2863_v51 = vpop.f32.mrf.mxu0 }
 0x45e   :  { %v2952_v20 = vpop.f32.mrf.mxu1  ;;  %v2864_v3 = vadd.f32 %v2863_v51, %v6109_v14  ;;  %v2996_v56 = vpop.f32.mrf.mxu2 }
 0x45f   :  { %v3085_v34 = vpop.f32.mrf.mxu3  ;;  %v2997_v12 = vadd.f32 %v2996_v56, %v6083_v63  ;;  %v7094_v63 = vld [vmem:[#allocation98_spill] sm:$0xff] }
 0x460   :  { %v6211_v10 = vadd.f32 %v2952_v20, %v2864_v3 }
 0x461   :  { %v6213_v21 = vadd.f32 %v3085_v34, %v2997_v12 }
 0x463   :  { %3038 = vmatmul.bf16.gmra.mxu2 %v7091_v44  ;;  %3127 = vmatmul.bf16.gmra.mxu3 %v7092_v5 }
 0x465   :  { %v2866_v60 = vpop.f32.mrf.mxu0 }
 0x466   :  { %v2955_v40 = vpop.f32.mrf.mxu1  ;;  %v2867_v36 = vadd.f32 %v2866_v60, %v6116_v45  ;;  %v2999_v31 = vpop.f32.mrf.mxu2 }
 0x467   :  { %v3088_v54 = vpop.f32.mrf.mxu3  ;;  %v3000_v14 = vadd.f32 %v2999_v31, %v6090_v35 }
 0x468   :  { %v6219_v48 = vadd.f32 %v2955_v40, %v2867_v36  ;;  %3181 = vmatmul.bf16.gmra.mxu0 %v7093_v23 }
 0x469   :  { %3270 = vmatmul.bf16.gmra.mxu1 %v7094_v63  ;;  %v6223_v28 = vadd.f32 %v3088_v54, %v3000_v14 }
 0x46d   :  { %v2868_v13 = vpop.f32.mrf.mxu0 }
 0x46e   :  { %v2957_v2 = vpop.f32.mrf.mxu1  ;;  %v2869_v58 = vadd.f32 %v2868_v13, %v6123_v25  ;;  %v3001_v57 = vpop.f32.mrf.mxu2 }
 0x46f   :  { %v3090_v4 = vpop.f32.mrf.mxu3  ;;  %v3002_v45 = vadd.f32 %v3001_v57, %v6097_v0  ;;  %v7095_v0 = vld [vmem:[#allocation101_spill] sm:$0xff] }
 0x470   :  { %v6227_v51 = vadd.f32 %v2957_v2, %v2869_v58 }
 0x471   :  { %v6229_v20 = vadd.f32 %v3090_v4, %v3002_v45 }
 0x473   :  { %3043 = vmatmul.bf16.gmra.mxu2 %v5863_v7  ;;  %3132 = vmatmul.bf16.gmra.mxu3 %v5865_v19 }
 0x475   :  { %v2871_v35 = vpop.f32.mrf.mxu0 }
 0x476   :  { %v2960_v3 = vpop.f32.mrf.mxu1  ;;  %v2872_v56 = vadd.f32 %v2871_v35, %v6130_v43  ;;  %v3004_v34 = vpop.f32.mrf.mxu2 }
 0x477   :  { %v3093_v12 = vpop.f32.mrf.mxu3  ;;  %v3005_v25 = vadd.f32 %v3004_v34, %v6104_v33 }
 0x478   :  { %v6235_v44 = vadd.f32 %v2960_v3, %v2872_v56  ;;  %3186 = vmatmul.bf16.gmra.mxu0 %v5859_v27 }
 0x479   :  { %3275 = vmatmul.bf16.gmra.mxu1 %v7095_v0  ;;  %v6239_v5 = vadd.f32 %v3093_v12, %v3005_v25  ;;  %v7100_v25 = vld [vmem:[#allocation106_spill] sm:$0xff] }
 0x47d   :  { %v2873_v60 = vpop.f32.mrf.mxu0 }
 0x47e   :  { %v2962_v7 = vpop.f32.mrf.mxu1  ;;  %v2874_v19 = vadd.f32 %v2873_v60, %v6137_v42  ;;  %v3006_v40 = vpop.f32.mrf.mxu2 }
 0x47f   :  { %v3095_v36 = vpop.f32.mrf.mxu3  ;;  %v3007_v43 = vadd.f32 %v3006_v40, %v6111_v11 }
 0x480   :  { %v6243_v31 = vadd.f32 %v2962_v7, %v2874_v19 }
 0x481   :  { %v6245_v54 = vadd.f32 %v3095_v36, %v3007_v43  ;;  %v7103_v36 = vld [vmem:[#allocation104_spill] sm:$0xff] }
 0x483   :  { %3048 = vmatmul.bf16.gmra.mxu2 %v5883_v50  ;;  %3137 = vmatmul.bf16.gmra.mxu3 %v5885_v16 }
 0x485   :  { %v2876_v27 = vpop.f32.mrf.mxu0 }
 0x486   :  { %v2965_v33 = vpop.f32.mrf.mxu1  ;;  %v2877_v14 = vadd.f32 %v2876_v27, %v6144_v1  ;;  %v3009_v23 = vpop.f32.mrf.mxu2 }
 0x487   :  { %v3098_v63 = vpop.f32.mrf.mxu3  ;;  %v3010_v42 = vadd.f32 %v3009_v23, %v6118_v32 }
 0x488   :  { %v6251_v13 = vadd.f32 %v2965_v33, %v2877_v14  ;;  %3191 = vmatmul.bf16.gmra.mxu0 %v5879_v17 }
 0x489   :  { %3280 = vmatmul.bf16.gmra.mxu1 %v5881_v37  ;;  %v6255_v11 = vadd.f32 %v3098_v63, %v3010_v42  ;;  %v7106_v42 = vld [vmem:[#allocation109_spill] sm:$0xff] }
 0x48d   :  { %v2878_v2 = vpop.f32.mrf.mxu0 }
 0x48e   :  { %v2967_v50 = vpop.f32.mrf.mxu1  ;;  %v2879_v16 = vadd.f32 %v2878_v2, %v6151_v53  ;;  %v6258_v58 = vpop.f32.mrf.mxu2  ;;  %v7097_v53 = vld [vmem:[#allocation102_spill] sm:$0xff] }
 0x48f   :  { %v6260_v57 = vpop.f32.mrf.mxu3 }
 0x490   :  { %v6262_v1 = vadd.f32 %v2967_v50, %v2879_v16 }
 0x493   :  { %3053 = vmatmul.bf16.gmra.mxu2 %v5903_v29  ;;  %3142 = vmatmul.bf16.gmra.mxu3 %v5905_v15 }
 0x495   :  { %v2881_v32 = vpop.f32.mrf.mxu0 }
 0x496   :  { %v2970_v17 = vpop.f32.mrf.mxu1  ;;  %v2882_v37 = vadd.f32 %v2881_v32, %v6158_v8  ;;  %v6267_v4 = vpop.f32.mrf.mxu2  ;;  %v7099_v8 = vld [vmem:[#allocation105_spill] sm:$0xff] }
 0x497   :  { %v6269_v45 = vpop.f32.mrf.mxu3 }
 0x498   :  { %v6271_v35 = vadd.f32 %v2970_v17, %v2882_v37  ;;  %3196 = vmatmul.bf16.gmra.mxu0 %v5899_v22 }
 0x499   :  { %3285 = vmatmul.bf16.gmra.mxu1 %v7097_v53  ;;  %v7108_v53 = vld [vmem:[#allocation107_spill] sm:$0xff] }
 0x49a   :  { %7096 = vst [vmem:[#allocation66_spill] sm:$0xff] %v6271_v35 }
 0x49d   :  { %v2883_v3 = vpop.f32.mrf.mxu0 }
 0x49e   :  { %v2972_v56 = vpop.f32.mrf.mxu1  ;;  %v2884_v29 = vadd.f32 %v2883_v3, %v6165_v49  ;;  %v6276_v34 = vpop.f32.mrf.mxu2  ;;  %v7102_v49 = vld [vmem:[#allocation103_spill] sm:$0xff] }
 0x49f   :  { %v6278_v15 = vpop.f32.mrf.mxu3 }
 0x4a0   :  { %v6280_v12 = vadd.f32 %v2972_v56, %v2884_v29 }
 0x4a2   :  { %7098 = vst [vmem:[#allocation63_spill] sm:$0xff] %v6280_v12 }
 0x4a3   :  { %3058 = vmatmul.bf16.gmra.mxu2 %v7099_v8  ;;  %3147 = vmatmul.bf16.gmra.mxu3 %v7100_v25 }
 0x4a5   :  { %v2886_v0 = vpop.f32.mrf.mxu0 }
 0x4a6   :  { %v2975_v60 = vpop.f32.mrf.mxu1  ;;  %v2887_v22 = vadd.f32 %v2886_v0, %v6172_v26  ;;  %v6285_v7 = vpop.f32.mrf.mxu2  ;;  %v7105_v26 = vld [vmem:[#allocation108_spill] sm:$0xff] }
 0x4a7   :  { %v6287_v19 = vpop.f32.mrf.mxu3 }
 0x4a8   :  { %v6289_v40 = vadd.f32 %v2975_v60, %v2887_v22  ;;  %3201 = vmatmul.bf16.gmra.mxu0 %v7102_v49 }
 0x4a9   :  { %3290 = vmatmul.bf16.gmra.mxu1 %v7103_v36 }
 0x4aa   :  { %7101 = vst [vmem:[#allocation64_spill] sm:$0xff] %v6289_v40  ;;  %v7116_v40 = vld [vmem:[#allocation57_spill] sm:$0xff] }
 0x4ad   :  { %v2888_v43 = vpop.f32.mrf.mxu0 }
 0x4ae   :  { %v2977_v27 = vpop.f32.mrf.mxu1  ;;  %v2889_v33 = vadd.f32 %v2888_v43, %v6179_v38  ;;  %v6294_v14 = vpop.f32.mrf.mxu2  ;;  %v7107_v38 = vld [vmem:[#allocation50_spill] sm:$0xff] }
 0x4af   :  { %v6296_v23 = vpop.f32.mrf.mxu3 }
 0x4b0   :  { %v6298_v63 = vadd.f32 %v2977_v27, %v2889_v33 }
 0x4b2   :  { %7104 = vst [vmem:[#allocation69_spill] sm:$0xff] %v6298_v63 }
 0x4b3   :  { %3063 = vmatmul.bf16.gmra.mxu2 %v7105_v26  ;;  %3152 = vmatmul.bf16.gmra.mxu3 %v7106_v42  ;;  %v7109_v26 = vld [vmem:[#allocation48_spill] sm:$0xff]  ;;  %v7110_v42 = vld [vmem:[#allocation49_spill] sm:$0xff] }
 0x4b5   :  { %v3167_v2 = vpop.f32.mrf.mxu0 }
 0x4b6   :  { %v3256_v50 = vpop.f32.mrf.mxu1  ;;  %v6302_v16 = vpop.f32.mrf.mxu2  ;;  %v3168_v17 = vadd.f32 %v3167_v2, %v6191_v61 }
 0x4b7   :  { %v6304_v32 = vpop.f32.mrf.mxu3 }
 0x4b8   :  { %v6307_v37 = vadd.f32 %v3256_v50, %v3168_v17  ;;  %3206 = vmatmul.bf16.gmra.mxu0 %v7107_v38 }
 0x4b9   :  { %3295 = vmatmul.bf16.gmra.mxu1 %v7108_v53 }
 0x4bd   :  { %v3169_v3 = vpop.f32.mrf.mxu0 }
 0x4be   :  { %v3258_v56 = vpop.f32.mrf.mxu1  ;;  %v6311_v29 = vpop.f32.mrf.mxu2  ;;  %v3170_v25 = vadd.f32 %v3169_v3, %v6197_v41 }
 0x4bf   :  { %v6313_v8 = vpop.f32.mrf.mxu3 }
 0x4c0   :  { %v6316_v0 = vadd.f32 %v3258_v56, %v3170_v25 }
 0x4c5   :  { %v3172_v61 = vpop.f32.mrf.mxu0 }
 0x4c6   :  { %v3261_v22 = vpop.f32.mrf.mxu1  ;;  %v3029_v49 = vpop.f32.mrf.mxu2  ;;  %v3173_v43 = vadd.f32 %v3172_v61, %v6207_v6 }
 0x4c7   :  { %v3118_v36 = vpop.f32.mrf.mxu3  ;;  %v3030_v27 = vadd.f32 %v3029_v49, %v6174_v55 }
 0x4c8   :  { %v6322_v33 = vadd.f32 %v3261_v22, %v3173_v43  ;;  %3211 = vmatmul.bf16.gmra.mxu0 %v7109_v26  ;;  %v7111_v43 = vld [vmem:[#allocation53_spill] sm:$0xff] }
 0x4c9   :  { %3300 = vmatmul.bf16.gmra.mxu1 %v7110_v42  ;;  %v6326_v41 = vadd.f32 %v3118_v36, %v3030_v27  ;;  %v7112_v27 = vld [vmem:[#allocation54_spill] sm:$0xff] }
 0x4cd   :  { %v3174_v2 = vpop.f32.mrf.mxu0 }
 0x4ce   :  { %v3263_v50 = vpop.f32.mrf.mxu1  ;;  %v6328_v17 = vpop.f32.mrf.mxu2  ;;  %v3175_v53 = vadd.f32 %v3174_v2, %v6213_v21 }
 0x4cf   :  { %v6330_v38 = vpop.f32.mrf.mxu3 }
 0x4d0   :  { %v6333_v3 = vadd.f32 %v3263_v50, %v3175_v53 }
 0x4d5   :  { %v3177_v6 = vpop.f32.mrf.mxu0 }
 0x4d6   :  { %v3266_v56 = vpop.f32.mrf.mxu1  ;;  %v3034_v25 = vpop.f32.mrf.mxu2  ;;  %v3178_v22 = vadd.f32 %v3177_v6, %v6223_v28 }
 0x4d7   :  { %v3123_v61 = vpop.f32.mrf.mxu3  ;;  %v3035_v49 = vadd.f32 %v3034_v25, %v6187_v24 }
 0x4d8   :  { %v6339_v36 = vadd.f32 %v3266_v56, %v3178_v22  ;;  %3216 = vmatmul.bf16.gmra.mxu0 %v7111_v43  ;;  %v7113_v43 = vld [vmem:[#allocation51_spill] sm:$0xff] }
 0x4d9   :  { %3305 = vmatmul.bf16.gmra.mxu1 %v7112_v27  ;;  %v6343_v21 = vadd.f32 %v3123_v61, %v3035_v49  ;;  %v7114_v27 = vld [vmem:[#allocation52_spill] sm:$0xff] }
 0x4dd   :  { %v3179_v26 = vpop.f32.mrf.mxu0 }
 0x4de   :  { %v3268_v42 = vpop.f32.mrf.mxu1  ;;  %v6345_v2 = vpop.f32.mrf.mxu2  ;;  %v3180_v53 = vadd.f32 %v3179_v26, %v6229_v20 }
 0x4df   :  { %v6347_v50 = vpop.f32.mrf.mxu3 }
 0x4e0   :  { %v6350_v60 = vadd.f32 %v3268_v42, %v3180_v53 }
 0x4e5   :  { %v3182_v28 = vpop.f32.mrf.mxu0 }
 0x4e6   :  { %v3271_v6 = vpop.f32.mrf.mxu1  ;;  %v3039_v56 = vpop.f32.mrf.mxu2  ;;  %v3183_v61 = vadd.f32 %v3182_v28, %v6239_v5 }
 0x4e7   :  { %v3128_v25 = vpop.f32.mrf.mxu3  ;;  %v3040_v22 = vadd.f32 %v3039_v56, %v6203_v47 }
 0x4e8   :  { %v6356_v49 = vadd.f32 %v3271_v6, %v3183_v61  ;;  %3221 = vmatmul.bf16.gmra.mxu0 %v7113_v43 }
 0x4e9   :  { %3310 = vmatmul.bf16.gmra.mxu1 %v7114_v27  ;;  %v6360_v20 = vadd.f32 %v3128_v25, %v3040_v22  ;;  %v7115_v22 = vld [vmem:[#allocation65_spill] sm:$0xff] }
 0x4ea   :  { %v3012_v43 = vadd.f32 %v6258_v58, %v7115_v22  ;;  %v7118_v22 = vld [vmem:[#allocation55_spill] sm:$0xff] }
 0x4ed   :  { %v3184_v26 = vpop.f32.mrf.mxu0 }
 0x4ee   :  { %v3273_v42 = vpop.f32.mrf.mxu1  ;;  %v6362_v53 = vpop.f32.mrf.mxu2  ;;  %v3185_v24 = vadd.f32 %v3184_v26, %v6245_v54  ;;  %v7117_v54 = vld [vmem:[#allocation58_spill] sm:$0xff]  ;;  %v3101_v26 = vadd.f32 %v6260_v57, %v3012_v43  ;;  %v7119_v43 = vld [vmem:[#allocation56_spill] sm:$0xff] }
 0x4ef   :  { %v6364_v55 = vpop.f32.mrf.mxu3 }
 0x4f0   :  { %v6367_v63 = vadd.f32 %v3273_v42, %v3185_v24 }
 0x4f5   :  { %v3187_v5 = vpop.f32.mrf.mxu0 }
 0x4f6   :  { %v3276_v28 = vpop.f32.mrf.mxu1  ;;  %v3044_v6 = vpop.f32.mrf.mxu2  ;;  %v3188_v25 = vadd.f32 %v3187_v5, %v6255_v11 }
 0x4f7   :  { %v3133_v56 = vpop.f32.mrf.mxu3  ;;  %v3045_v61 = vadd.f32 %v3044_v6, %v6219_v48  ;;  %v3015_v6 = vadd.f32 %v6267_v4, %v6132_v9 }
 0x4f8   :  { %v6375_v27 = vadd.f32 %v3276_v28, %v3188_v25  ;;  %3226 = vmatmul.bf16.gmra.mxu0 %v7116_v40  ;;  %v3017_v25 = vadd.f32 %v6276_v34, %v6139_v39  ;;  %v3020_v34 = vadd.f32 %v6285_v7, %v6146_v46  ;;  %v3027_v7 = vadd.f32 %v6311_v29, %v6167_v30 }
 0x4f9   :  { %3315 = vmatmul.bf16.gmra.mxu1 %v7117_v54  ;;  %v6379_v24 = vadd.f32 %v3133_v56, %v3045_v61  ;;  %v3104_v54 = vadd.f32 %v6269_v45, %v3015_v6  ;;  %v7121_v45 = vld [vmem:[#allocation62_spill] sm:$0xff]  ;;  %v3032_v29 = vadd.f32 %v6328_v17, %v6181_v18  ;;  %v7125_v18 = vpack.c.bf16 %v6367_v63, %v6356_v49 }
 0x4fd   :  { %v3189_v42 = vpop.f32.mrf.mxu0 }
 0x4fe   :  { %v3278_v47 = vpop.f32.mrf.mxu1  ;;  %v6382_v12 = vpop.f32.mrf.mxu2  ;;  %v3190_v48 = vadd.f32 %v3189_v42, %v3101_v26  ;;  %v3106_v26 = vadd.f32 %v6278_v15, %v3017_v25  ;;  %v3109_v15 = vadd.f32 %v6287_v19, %v3020_v34  ;;  %v7123_v19 = vld [vmem:[#allocation60_spill] sm:$0xff] }
 0x4ff   :  { %v6384_v11 = vpop.f32.mrf.mxu3 }
 0x500   :  { %v6386_v5 = vadd.f32 %v3278_v47, %v3190_v48 }
 0x505   :  { %v3192_v28 = vpop.f32.mrf.mxu0 }
 0x506   :  { %v3281_v40 = vpop.f32.mrf.mxu1  ;;  %v3049_v56 = vpop.f32.mrf.mxu2  ;;  %v3193_v42 = vadd.f32 %v3192_v28, %v3104_v54 }
 0x507   :  { %v3050_v57 = vadd.f32 %v3049_v56, %v6235_v44  ;;  %v3138_v61 = vpop.f32.mrf.mxu3 }
 0x508   :  { %3231 = vmatmul.bf16.gmra.mxu0 %v7118_v22  ;;  %v3282_v58 = vadd.f32 %v3281_v40, %v3193_v42 }
 0x509   :  { %3320 = vmatmul.bf16.gmra.mxu1 %v7119_v43  ;;  %v6397_v47 = vadd.f32 %v3138_v61, %v3050_v57  ;;  %v3022_v57 = vadd.f32 %v6294_v14, %v6153_v62  ;;  %v7120_v61 = vld [vmem:[#allocation61_spill] sm:$0xff]  ;;  %v3025_v62 = vadd.f32 %v6302_v16, %v6160_v52  ;;  %v7122_v14 = vld [vmem:[#allocation59_spill] sm:$0xff] }
 0x50b   :  { %v3111_v28 = vadd.f32 %v6296_v23, %v3022_v57  ;;  %v3116_v23 = vadd.f32 %v6313_v8, %v3027_v7 }
 0x50d   :  { %v3194_v48 = vpop.f32.mrf.mxu0 }
 0x50e   :  { %v3283_v9 = vpop.f32.mrf.mxu1  ;;  %v3195_v4 = vadd.f32 %v3194_v48, %v3106_v26 }
 0x510   :  { %v3284_v44 = vadd.f32 %v3283_v9, %v3195_v4 }
 0x512   :  { %v3341_v56 = vpack.c.bf16 %v3284_v44, %v3282_v58 }
 0x515   :  { %v3197_v35 = vpop.f32.mrf.mxu0 }
 0x516   :  { %v3286_v39 = vpop.f32.mrf.mxu1  ;;  %v3198_v6 = vadd.f32 %v3197_v35, %v3109_v15  ;;  %v3114_v35 = vadd.f32 %v6304_v32, %v3025_v62  ;;  %v3121_v32 = vadd.f32 %v6330_v38, %v3032_v29  ;;  %v7130_v62 = vld [vmem:[#allocation18_spill] sm:$0xff] }
 0x518   :  { %3236 = vmatmul.bf16.gmra.mxu0 %v7120_v61  ;;  %v3287_v22 = vadd.f32 %v3286_v39, %v3198_v6 }
 0x519   :  { %3325 = vmatmul.bf16.gmra.mxu1 %v7121_v45 }
 0x51d   :  { %v3199_v40 = vpop.f32.mrf.mxu0 }
 0x51e   :  { %v3288_v25 = vpop.f32.mrf.mxu1  ;;  %v3200_v58 = vadd.f32 %v3199_v40, %v3111_v28  ;;  %v7124_v28 = vpack.c.bf16 %v6386_v5, %v6375_v27  ;;  %v7126_v27 = vpack.c.bf16 %v6350_v60, %v6339_v36  ;;  %v7129_v60 = vld [vmem:[#allocation16_spill] sm:$0xff] }
 0x520   :  { %v3289_v43 = vadd.f32 %v3288_v25, %v3200_v58  ;;  %v7127_v25 = vpack.c.bf16 %v6333_v3, %v6322_v33  ;;  %v3042_v33 = vadd.f32 %v6362_v53, %v6211_v10  ;;  %v3047_v10 = vadd.f32 %v6382_v12, %v6227_v51  ;;  %v3051_v53 = vpop.f32.mrf.mxu2 }
 0x521   :  { %v3052_v12 = vadd.f32 %v3051_v53, %v6243_v31 }
 0x522   :  { %v3342_v54 = vpack.c.bf16 %v3289_v43, %v3287_v22  ;;  %v3131_v43 = vadd.f32 %v6364_v55, %v3042_v33  ;;  %v3136_v55 = vadd.f32 %v6384_v11, %v3047_v10 }
 0x525   :  { %v3202_v26 = vpop.f32.mrf.mxu0 }
 0x526   :  { %v3291_v46 = vpop.f32.mrf.mxu1  ;;  %v3203_v42 = vadd.f32 %v3202_v26, %v3114_v35 }
 0x528   :  { %3241 = vmatmul.bf16.gmra.mxu0 %v7122_v14  ;;  %v3292_v44 = vadd.f32 %v3291_v46, %v3203_v42  ;;  %v3140_v42 = vpop.f32.mrf.mxu3 }
 0x529   :  { %3330 = vmatmul.bf16.gmra.mxu1 %v7123_v19 }
 0x52d   :  { %v3204_v48 = vpop.f32.mrf.mxu0 }
 0x52e   :  { %v3293_v9 = vpop.f32.mrf.mxu1  ;;  %v3205_v4 = vadd.f32 %v3204_v48, %v3116_v23 }
 0x530   :  { %v3294_v39 = vadd.f32 %v3293_v9, %v3205_v4  ;;  %v3054_v4 = vpop.f32.mrf.mxu2 }
 0x532   :  { %v3343_v34 = vpack.c.bf16 %v3294_v39, %v3292_v44  ;;  %v7131_v39 = vld [vmem:[#allocation20_spill] sm:$0xff] }
 0x534   :  { %3356 = vmatpush.bf16.msra.mxu2 %v3343_v34 }
 0x535   :  { %v3207_v52 = vpop.f32.mrf.mxu0 }
 0x536   :  { %v3296_v16 = vpop.f32.mrf.mxu1  ;;  %v3208_v30 = vadd.f32 %v3207_v52, %v6326_v41  ;;  %v3143_v52 = vpop.f32.mrf.mxu3 }
 0x538   :  { %v6420_v57 = vadd.f32 %v3296_v16, %v3208_v30  ;;  %3357 = vmatpush.bf16.msra.mxu2 %v3342_v54  ;;  %v3141_v16 = vadd.f32 %v3140_v42, %v3052_v12  ;;  %v3056_v30 = vpop.f32.mrf.mxu2 }
 0x539   :  { %v3057_v31 = vadd.f32 %v3056_v30, %v6262_v1 }
 0x53c   :  { %3358 = vmatpush.bf16.msra.mxu2 %v3341_v56  ;;  %v3037_v56 = vadd.f32 %v6345_v2, %v6195_v59  ;;  %v7128_v59 = vpack.c.bf16 %v6316_v0, %v6307_v37 }
 0x53d   :  { %v3209_v8 = vpop.f32.mrf.mxu0 }
 0x53e   :  { %v3298_v61 = vpop.f32.mrf.mxu1  ;;  %v3210_v45 = vadd.f32 %v3209_v8, %v3121_v32  ;;  %v3126_v5 = vadd.f32 %v6347_v50, %v3037_v56 }
 0x540   :  { %v6423_v15 = vadd.f32 %v3298_v61, %v3210_v45  ;;  %3359 = vmatpush.bf16.msra.mxu2 %v7124_v28  ;;  %v3145_v45 = vpop.f32.mrf.mxu3 }
 0x542   :  { %v3344_v41 = vpack.c.bf16 %v6423_v15, %v6420_v57  ;;  %v7150_v57 = vld [vmem:[#allocation27_spill] sm:$0xff] }
 0x544   :  { %3360 = vmatpush.bf16.msra.mxu2 %v7125_v18  ;;  %v7132_v18 = vld [vmem:[#allocation22_spill] sm:$0xff] }
 0x545   :  { %v3212_v17 = vpop.f32.mrf.mxu0 }
 0x546   :  { %v3301_v6 = vpop.f32.mrf.mxu1  ;;  %v3213_v38 = vadd.f32 %v3212_v17, %v6343_v21 }
 0x548   :  { %v6436_v40 = vadd.f32 %v3301_v6, %v3213_v38  ;;  %3361 = vmatpush.bf16.msra.mxu2 %v7126_v27  ;;  %v3059_v38 = vpop.f32.mrf.mxu2  ;;  %v3146_v27 = vadd.f32 %v3145_v45, %v3057_v31  ;;  %v7141_v31 = vld [vmem:[#allocation17_spill] sm:$0xff] }
 0x54c   :  { %3362 = vmatpush.bf16.msra.mxu2 %v7127_v25 }
 0x54d   :  { %v3214_v63 = vpop.f32.mrf.mxu0 }
 0x54e   :  { %v3303_v49 = vpop.f32.mrf.mxu1  ;;  %v3215_v58 = vadd.f32 %v3214_v63, %v3126_v5  ;;  %v3148_v5 = vpop.f32.mrf.mxu3 }
 0x550   :  { %v6445_v22 = vadd.f32 %v3303_v49, %v3215_v58  ;;  %3363 = vmatpush.bf16.msra.mxu2 %v7128_v59  ;;  %v3061_v59 = vpop.f32.mrf.mxu2 }
 0x552   :  { %v3345_v21 = vpack.c.bf16 %v6445_v22, %v6436_v40  ;;  %v7148_v40 = vld [vmem:[#allocation38_spill] sm:$0xff]  ;;  %v7149_v22 = vld [vmem:[#allocation25_spill] sm:$0xff] }
 0x553   :  { %3364 = vmatmul.bf16.vlgmr.msra.gmra.mxu2 %v7129_v60 }
 0x555   :  { %v3217_v36 = vpop.f32.mrf.mxu0 }
 0x556   :  { %v3306_v2 = vpop.f32.mrf.mxu1  ;;  %v3218_v50 = vadd.f32 %v3217_v36, %v6360_v20 }
 0x558   :  { %v6456_v3 = vadd.f32 %v3306_v2, %v3218_v50  ;;  %v7133_v50 = vld [vmem:[#allocation24_spill] sm:$0xff] }
 0x55d   :  { %v3219_v54 = vpop.f32.mrf.mxu0 }
 0x55e   :  { %v3308_v26 = vpop.f32.mrf.mxu1  ;;  %v3220_v37 = vadd.f32 %v3219_v54, %v3131_v43  ;;  %v7134_v54 = vld [vmem:[#allocation66_spill] sm:$0xff] }
 0x560   :  { %v6459_v0 = vadd.f32 %v3308_v26, %v3220_v37  ;;  %v3150_v26 = vpop.f32.mrf.mxu3  ;;  %v7135_v37 = vld [vmem:[#allocation63_spill] sm:$0xff] }
 0x561   :  { %v3062_v1 = vadd.f32 %v3061_v59, %v7135_v37 }
 0x562   :  { %v3346_v46 = vpack.c.bf16 %v6459_v0, %v6456_v3  ;;  %v7146_v3 = vld [vmem:[#allocation36_spill] sm:$0xff]  ;;  %v7147_v0 = vld [vmem:[#allocation23_spill] sm:$0xff] }
 0x563   :  { %3369 = vmatmul.bf16.gmra.mxu2 %v7130_v62 }
 0x565   :  { %v3222_v7 = vpop.f32.mrf.mxu0 }
 0x566   :  { %v3311_v14 = vpop.f32.mrf.mxu1  ;;  %v3223_v20 = vadd.f32 %v3222_v7, %v6379_v24  ;;  %v3064_v7 = vpop.f32.mrf.mxu2 }
 0x568   :  { %v6467_v19 = vadd.f32 %v3311_v14, %v3223_v20  ;;  %v3151_v14 = vadd.f32 %v3150_v26, %v3062_v1  ;;  %v3153_v42 = vpop.f32.mrf.mxu3 }
 0x56d   :  { %v3224_v35 = vpop.f32.mrf.mxu0 }
 0x56e   :  { %v3313_v23 = vpop.f32.mrf.mxu1  ;;  %v3225_v48 = vadd.f32 %v3224_v35, %v3136_v55 }
 0x570   :  { %v6470_v9 = vadd.f32 %v3313_v23, %v3225_v48  ;;  %v3155_v30 = vpop.f32.mrf.mxu3 }
 0x572   :  { %v3347_v44 = vpack.c.bf16 %v6470_v9, %v6467_v19  ;;  %v7144_v19 = vld [vmem:[#allocation34_spill] sm:$0xff]  ;;  %v7145_v9 = vld [vmem:[#allocation21_spill] sm:$0xff] }
 0x573   :  { %3374 = vmatmul.bf16.gmra.mxu2 %v7131_v39  ;;  %v3066_v39 = vpop.f32.mrf.mxu2 }
 0x575   :  { %v3227_v24 = vpop.f32.mrf.mxu0 }
 0x576   :  { %v3316_v34 = vpop.f32.mrf.mxu1  ;;  %v3228_v51 = vadd.f32 %v3227_v24, %v6397_v47  ;;  %v3055_v47 = vadd.f32 %v3054_v4, %v6251_v13  ;;  %v3060_v13 = vadd.f32 %v3059_v38, %v7134_v54  ;;  %v7136_v4 = vld [vmem:[#allocation26_spill] sm:$0xff] }
 0x577   :  { %v7140_v38 = vld [vmem:[#allocation30_spill] sm:$0xff] }
 0x578   :  { %v6477_v11 = vadd.f32 %v3316_v34, %v3228_v51  ;;  %v3144_v56 = vadd.f32 %v3143_v52, %v3055_v47  ;;  %v3149_v62 = vadd.f32 %v3148_v5, %v3060_v13  ;;  %v7137_v51 = vld [vmem:[#allocation64_spill] sm:$0xff]  ;;  %v7138_v52 = vld [vmem:[#allocation69_spill] sm:$0xff] }
 0x579   :  { %v3065_v12 = vadd.f32 %v3064_v7, %v7137_v51  ;;  %v7139_v47 = vld [vmem:[#allocation28_spill] sm:$0xff]  ;;  %v7157_v7 = vld [vmem:[#allocation35_spill] sm:$0xff] }
 0x57d   :  { %v3229_v29 = vpop.f32.mrf.mxu0 }
 0x57e   :  { %v3318_v32 = vpop.f32.mrf.mxu1  ;;  %v3230_v8 = vadd.f32 %v3229_v29, %v3141_v16  ;;  %v3154_v16 = vadd.f32 %v3153_v42, %v3065_v12 }
 0x580   :  { %v3319_v61 = vadd.f32 %v3318_v32, %v3230_v8 }
 0x582   :  { %v3348_v28 = vpack.c.bf16 %v3319_v61, %v6477_v11  ;;  %v3067_v11 = vadd.f32 %v3066_v39, %v7138_v52 }
 0x583   :  { %3379 = vmatmul.bf16.gmra.mxu2 %v7132_v18 }
 0x584   :  { %v3156_v29 = vadd.f32 %v3155_v30, %v3067_v11 }
 0x585   :  { %v3232_v17 = vpop.f32.mrf.mxu0 }
 0x586   :  { %v3321_v6 = vpop.f32.mrf.mxu1  ;;  %v3233_v25 = vadd.f32 %v3232_v17, %v3144_v56  ;;  %v7143_v56 = vld [vmem:[#allocation19_spill] sm:$0xff] }
 0x588   :  { %v3322_v60 = vadd.f32 %v3321_v6, %v3233_v25  ;;  %v7154_v25 = vld [vmem:[#allocation42_spill] sm:$0xff] }
 0x58d   :  { %v3234_v63 = vpop.f32.mrf.mxu0 }
 0x58e   :  { %v3323_v49 = vpop.f32.mrf.mxu1  ;;  %v3235_v58 = vadd.f32 %v3234_v63, %v3146_v27  ;;  %v7153_v27 = vld [vmem:[#allocation31_spill] sm:$0xff] }
 0x590   :  { %v3324_v36 = vadd.f32 %v3323_v49, %v3235_v58  ;;  %v3534_v49 = vlaneseq  ;;  %v6520_v58 = vld [vmem:[%s6898_s5] ss:$0 sm:$0xff]  ;;  %s5127_s5 = smov [#allocation11]  }
 0x591   :  { %s3925_s25 = sshll.u32 %s5127_s5, 4  ;;  %s3926_s25 = int_to_ptr.vmem [resolvable:$true] %s3925_s25 }
 0x592   :  { %v3349_v2 = vpack.c.bf16 %v3324_v36, %v3322_v60  ;;  %v6522_v59 = vand.u32 127, %v3534_v49  ;;  %v7155_v60 = vld [vmem:[#allocation33_spill] sm:$0xff] }
 0x593   :  { %3384 = vmatmul.bf16.gmra.mxu2 %v7133_v50  ;;  %v7156_v50 = vld [vmem:[#allocation44_spill] sm:$0xff] }
 0x594   :  { %vm3536_vm0 = vcmp.lt.s32.totalorder %v6522_v59, 40 }
 0x595   :  { %v3237_v33 = vpop.f32.mrf.mxu0 }
 0x596   :  { %v3326_v43 = vpop.f32.mrf.mxu1  ;;  %v3238_v20 = vadd.f32 %v3237_v33, %v3149_v62 }
 0x598   :  { %v3327_v35 = vadd.f32 %v3326_v43, %v3238_v20 }
 0x59d   :  { %v3239_v10 = vpop.f32.mrf.mxu0 }
 0x59e   :  { %v3328_v53 = vpop.f32.mrf.mxu1  ;;  %v3240_v55 = vadd.f32 %v3239_v10, %v3151_v14  ;;  %v7158_v10 = vld [vmem:[#allocation46_spill] sm:$0xff] }
 0x5a0   :  { %v3329_v23 = vadd.f32 %v3328_v53, %v3240_v55 }
 0x5a2   :  { %v3350_v48 = vpack.c.bf16 %v3329_v23, %v3327_v35 }
 0x5a3   :  { %3389 = vmatmul.bf16.gmra.mxu2 %v7136_v4 }
 0x5a5   :  { %v3242_v24 = vpop.f32.mrf.mxu0 }
 0x5a6   :  { %v3331_v34 = vpop.f32.mrf.mxu1  ;;  %v3243_v32 = vadd.f32 %v3242_v24, %v3154_v16  ;;  %v7159_v24 = vld [vmem:[#allocation37_spill] sm:$0xff] }
 0x5a8   :  { %v3332_v18 = vadd.f32 %v3331_v34, %v3243_v32 }
 0x5ad   :  { %v3244_v8 = vpop.f32.mrf.mxu0 }
 0x5ae   :  { %v3245_v61 = vadd.f32 %v3244_v8, %v3156_v29  ;;  %v3333_v45 = vpop.f32.mrf.mxu1 }
 0x5b0   :  { %v3334_v17 = vadd.f32 %v3333_v45, %v3245_v61  ;;  %v7160_v61 = vld [vmem:[#allocation39_spill] sm:$0xff] }
 0x5b2   :  { %v3351_v6 = vpack.c.bf16 %v3334_v17, %v3332_v18 }
 0x5b3   :  { %3394 = vmatmul.bf16.gmra.mxu2 %v7139_v47 }
 0x5b4   :  { %3445 = vmatpush.bf16.msra.mxu3 %v3351_v6 }
 0x5b8   :  { %3446 = vmatpush.bf16.msra.mxu3 %v3350_v48 }
 0x5bc   :  { %3447 = vmatpush.bf16.msra.mxu3 %v3349_v2 }
 0x5c0   :  { %3448 = vmatpush.bf16.msra.mxu3 %v3348_v28  ;;  %v7142_v28 = vld [vmem:[#allocation32_spill] sm:$0xff] }
 0x5c3   :  { %3399 = vmatmul.bf16.gmra.mxu2 %v7140_v38 }
 0x5c4   :  { %3449 = vmatpush.bf16.msra.mxu3 %v3347_v44 }
 0x5c8   :  { %3450 = vmatpush.bf16.msra.mxu3 %v3346_v46  ;;  %v7152_v46 = vld [vmem:[#allocation40_spill] sm:$0xff] }
 0x5cc   :  { %3451 = vmatpush.bf16.msra.mxu3 %v3345_v21 }
 0x5d0   :  { %3452 = vmatpush.bf16.msra.mxu3 %v3344_v41  ;;  %v7151_v41 = vld [vmem:[#allocation29_spill] sm:$0xff] }
 0x5d3   :  { %3453 = vmatmul.bf16.vlgmr.msra.gmra.mxu3 %v7141_v31  ;;  %3404 = vmatmul.bf16.gmra.mxu2 %v7142_v28 }
 0x5d6   :  { %v3365_v15 = vpop.f32.mrf.mxu2 }
 0x5d7   :  { %v3366_v36 = vadd.f32 %v6520_v58, %v3365_v15 }
 0x5de   :  { %v3367_v21 = vpop.f32.mrf.mxu2 }
 0x5df   :  { %v3368_v13 = vadd.f32 %v6520_v58, %v3367_v21 }
 0x5e3   :  { %3458 = vmatmul.bf16.gmra.mxu3 %v7143_v56  ;;  %3409 = vmatmul.bf16.gmra.mxu2 %v7144_v19 }
 0x5e6   :  { %v3370_v44 = vpop.f32.mrf.mxu2 }
 0x5e7   :  { %v3371_v14 = vadd.f32 %v6520_v58, %v3370_v44 }
 0x5ee   :  { %v3372_v5 = vpop.f32.mrf.mxu2 }
 0x5ef   :  { %v3373_v23 = vadd.f32 %v6520_v58, %v3372_v5 }
 0x5f3   :  { %3463 = vmatmul.bf16.gmra.mxu3 %v7145_v9  ;;  %3414 = vmatmul.bf16.gmra.mxu2 %v7146_v3  ;;  %v7161_v9 = vld [vmem:[#allocation41_spill] sm:$0xff] }
 0x5f6   :  { %v3375_v63 = vpop.f32.mrf.mxu2 }
 0x5f7   :  { %v3376_v34 = vadd.f32 %v6520_v58, %v3375_v63 }
 0x5fe   :  { %v3377_v2 = vpop.f32.mrf.mxu2 }
 0x5ff   :  { %v3378_v16 = vadd.f32 %v6520_v58, %v3377_v2 }
 0x603   :  { %3468 = vmatmul.bf16.gmra.mxu3 %v7147_v0  ;;  %3419 = vmatmul.bf16.gmra.mxu2 %v7148_v40 }
 0x606   :  { %v3380_v26 = vpop.f32.mrf.mxu2 }
 0x607   :  { %v3381_v45 = vadd.f32 %v6520_v58, %v3380_v26 }
 0x60e   :  { %v3382_v20 = vpop.f32.mrf.mxu2 }
 0x60f   :  { %v3383_v38 = vadd.f32 %v6520_v58, %v3382_v20 }
 0x613   :  { %3473 = vmatmul.bf16.gmra.mxu3 %v7149_v22  ;;  %3424 = vmatmul.bf16.gmra.mxu2 %v7152_v46 }
 0x616   :  { %v3385_v42 = vpop.f32.mrf.mxu2 }
 0x617   :  { %v3386_v3 = vadd.f32 %v6520_v58, %v3385_v42 }
 0x61e   :  { %v3387_v51 = vpop.f32.mrf.mxu2 }
 0x61f   :  { %v3388_v15 = vadd.f32 %v6520_v58, %v3387_v51 }
 0x623   :  { %3478 = vmatmul.bf16.gmra.mxu3 %v7150_v57  ;;  %3429 = vmatmul.bf16.gmra.mxu2 %v7154_v25 }
 0x626   :  { %v3390_v30 = vpop.f32.mrf.mxu2 }
 0x627   :  { %v3391_v5 = vadd.f32 %v6520_v58, %v3390_v30 }
 0x62e   :  { %v3392_v18 = vpop.f32.mrf.mxu2 }
 0x633   :  { %3483 = vmatmul.bf16.gmra.mxu3 %v7151_v41  ;;  %3434 = vmatmul.bf16.gmra.mxu2 %v7156_v50 }
 0x636   :  { %v3395_v31 = vpop.f32.mrf.mxu2 }
 0x63e   :  { %v3397_v40 = vpop.f32.mrf.mxu2 }
 0x643   :  { %3488 = vmatmul.bf16.gmra.mxu3 %v7153_v27  ;;  %3439 = vmatmul.bf16.gmra.mxu2 %v7158_v10  ;;  %v7162_v27 = vld [vmem:[#allocation43_spill] sm:$0xff] }
 0x646   :  { %v3400_v46 = vpop.f32.mrf.mxu2 }
 0x647   :  { %v3401_v42 = vadd.f32 %v6520_v58, %v3400_v46 }
 0x653   :  { %3493 = vmatmul.bf16.gmra.mxu3 %v7155_v60  ;;  %v3402_v60 = vpop.f32.mrf.mxu2 }
 0x654   :  { %v3403_v51 = vadd.f32 %v6520_v58, %v3402_v60 }
 0x656   :  { %v3454_v33 = vpop.f32.mrf.mxu3 }
 0x657   :  { %v3455_v43 = vadd.f32 %v3454_v33, %v3366_v36  ;;  %v3393_v36 = vadd.f32 %v6520_v58, %v3392_v18 }
 0x659   :  { %v6530_v54 = vsel %vm3536_vm0, %v3455_v43, -1e+30  ;;  %v7163_v43 = vld [vmem:[#allocation45_spill] sm:$0xff] }
 0x65a   :  { %3569 = vmax.xlane.f32.xlu0 %v6530_v54 }
 0x65b   :  { %v3405_v26 = vpop.f32.mrf.mxu2 }
 0x65e   :  { %v3456_v37 = vpop.f32.mrf.mxu3 }
 0x65f   :  { %v3457_v1 = vadd.f32 %v3456_v37, %v3368_v13  ;;  %v3396_v13 = vadd.f32 %v6520_v58, %v3395_v31 }
 0x661   :  { %v6536_v62 = vsel %vm3536_vm0, %v3457_v1, -1e+30 }
 0x662   :  { %3571 = vmax.xlane.f32.xlu0 %v6536_v62 }
 0x663   :  { %3498 = vmatmul.bf16.gmra.mxu3 %v7157_v7  ;;  %v3407_v10 = vpop.f32.mrf.mxu2 }
 0x666   :  { %v3459_v53 = vpop.f32.mrf.mxu3 }
 0x667   :  { %v3460_v55 = vadd.f32 %v3459_v53, %v3371_v14  ;;  %v3398_v14 = vadd.f32 %v6520_v58, %v3397_v40 }
 0x669   :  { %v6544_v35 = vsel %vm3536_vm0, %v3460_v55, -1e+30 }
 0x66a   :  { %3573 = vmax.xlane.f32.xlu1 %v6544_v35 }
 0x66e   :  { %v3461_v48 = vpop.f32.mrf.mxu3 }
 0x66f   :  { %v3462_v4 = vadd.f32 %v3461_v48, %v3373_v23  ;;  %v7164_v23 = vld [vmem:[#allocation47_spill] sm:$0xff] }
 0x671   :  { %v6550_v39 = vsel %vm3536_vm0, %v3462_v4, -1e+30 }
 0x672   :  { %3575 = vmax.xlane.f32.xlu1 %v6550_v39 }
 0x673   :  { %3503 = vmatmul.bf16.gmra.mxu3 %v7159_v24  ;;  %v3410_v24 = vpop.f32.mrf.mxu2 }
 0x676   :  { %v3464_v12 = vpop.f32.mrf.mxu3 }
 0x677   :  { %v3465_v52 = vadd.f32 %v3464_v12, %v3376_v34 }
 0x679   :  { %v6557_v11 = vsel %vm3536_vm0, %v3465_v52, -1e+30 }
 0x67a   :  { %3577 = vmax.xlane.f32.xlu2 %v6557_v11 }
 0x67e   :  { %v3466_v29 = vpop.f32.mrf.mxu3 }
 0x67f   :  { %v3467_v32 = vadd.f32 %v3466_v29, %v3378_v16 }
 0x681   :  { %v6563_v8 = vsel %vm3536_vm0, %v3467_v32, -1e+30 }
 0x682   :  { %3579 = vmax.xlane.f32.xlu2 %v6563_v8 }
 0x683   :  { %3508 = vmatmul.bf16.gmra.mxu3 %v7160_v61  ;;  %v3412_v61 = vpop.f32.mrf.mxu2 }
 0x686   :  { %v3469_v17 = vpop.f32.mrf.mxu3 }
 0x687   :  { %v3470_v6 = vadd.f32 %v3469_v17, %v3381_v45  ;;  %v3406_v45 = vadd.f32 %v6520_v58, %v3405_v26 }
 0x689   :  { %v6570_v47 = vsel %vm3536_vm0, %v3470_v6, -1e+30 }
 0x68a   :  { %3581 = vmax.xlane.f32.xlu0 %v6570_v47 }
 0x68e   :  { %v3471_v28 = vpop.f32.mrf.mxu3 }
 0x68f   :  { %v3472_v56 = vadd.f32 %v3471_v28, %v3383_v38 }
 0x691   :  { %v6576_v19 = vsel %vm3536_vm0, %v3472_v56, -1e+30  ;;  %v3415_v56 = vpop.f32.mrf.mxu2 }
 0x692   :  { %3583 = vmax.xlane.f32.xlu1 %v6576_v19 }
 0x693   :  { %3513 = vmatmul.bf16.gmra.mxu3 %v7161_v9  ;;  %v3408_v9 = vadd.f32 %v6520_v58, %v3407_v10 }
 0x696   :  { %v3474_v0 = vpop.f32.mrf.mxu3 }
 0x697   :  { %v3475_v22 = vadd.f32 %v3474_v0, %v3386_v3 }
 0x699   :  { %v6583_v57 = vsel %vm3536_vm0, %v3475_v22, -1e+30 }
 0x69a   :  { %3585 = vmax.xlane.f32.xlu2 %v6583_v57 }
 0x69e   :  { %v3476_v41 = vpop.f32.mrf.mxu3 }
 0x69f   :  { %v3477_v21 = vadd.f32 %v3476_v41, %v3388_v15 }
 0x6a1   :  { %v6589_v44 = vsel %vm3536_vm0, %v3477_v21, -1e+30  ;;  %v3411_v21 = vadd.f32 %v6520_v58, %v3410_v24 }
 0x6a2   :  { %3587 = vmax.xlane.f32.xlu0 %v6589_v44 }
 0x6a3   :  { %3518 = vmatmul.bf16.gmra.mxu3 %v7162_v27 }
 0x6a6   :  { %v3479_v25 = vpop.f32.mrf.mxu3 }
 0x6a7   :  { %v3480_v63 = vadd.f32 %v3479_v25, %v3391_v5  ;;  %v3417_v5 = vpop.f32.mrf.mxu2 }
 0x6a9   :  { %v6596_v49 = vsel %vm3536_vm0, %v3480_v63, -1e+30 }
 0x6aa   :  { %3589 = vmax.xlane.f32.xlu1 %v6596_v49 }
 0x6ae   :  { %v3481_v2 = vpop.f32.mrf.mxu3 }
 0x6af   :  { %v3482_v50 = vadd.f32 %v3481_v2, %v3393_v36  ;;  %v3413_v2 = vadd.f32 %v6520_v58, %v3412_v61 }
 0x6b1   :  { %v6602_v33 = vsel %vm3536_vm0, %v3482_v50, -1e+30 }
 0x6b2   :  { %3591 = vmax.xlane.f32.xlu2 %v6602_v33 }
 0x6b3   :  { %3523 = vmatmul.bf16.gmra.mxu3 %v7163_v43 }
 0x6b6   :  { %v3484_v37 = vpop.f32.mrf.mxu3 }
 0x6b7   :  { %v3485_v1 = vadd.f32 %v3484_v37, %v3396_v13 }
 0x6b9   :  { %v6609_v7 = vsel %vm3536_vm0, %v3485_v1, -1e+30  ;;  %v3420_v1 = vpop.f32.mrf.mxu2 }
 0x6ba   :  { %3593 = vmax.xlane.f32.xlu0 %v6609_v7 }
 0x6be   :  { %v3486_v20 = vpop.f32.mrf.mxu3 }
 0x6bf   :  { %v3487_v53 = vadd.f32 %v3486_v20, %v3398_v14  ;;  %v3416_v20 = vadd.f32 %v6520_v58, %v3415_v56 }
 0x6c1   :  { %v6615_v55 = vsel %vm3536_vm0, %v3487_v53, -1e+30  ;;  %v3422_v24 = vpop.f32.mrf.mxu2 }
 0x6c2   :  { %3595 = vmax.xlane.f32.xlu1 %v6615_v55 }
 0x6c3   :  { %3528 = vmatmul.bf16.gmra.mxu3 %v7164_v23 }
 0x6c6   :  { %v3489_v48 = vpop.f32.mrf.mxu3 }
 0x6c7   :  { %v3490_v4 = vadd.f32 %v3489_v48, %v3401_v42 }
 0x6c9   :  { %v6622_v34 = vsel %vm3536_vm0, %v3490_v4, -1e+30 }
 0x6ca   :  { %3597 = vmax.xlane.f32.xlu2 %v6622_v34 }
 0x6cd   :  { %v3570_v12 = vpop.xlane.xlu0 %3569 }
 0x6ce   :  { %v6627_v52 = vsub.f32 %v6530_v54, %v3570_v12  ;;  %v3491_v16 = vpop.f32.mrf.mxu3 }
 0x6cf   :  { %v3492_v30 = vadd.f32 %v3491_v16, %v3403_v51  ;;  %v3418_v51 = vadd.f32 %v6520_v58, %v3417_v5 }
 0x6d0   :  { %v3665_v29 = vmul.f32 1.442695, %v6627_v52 }
 0x6d1   :  { %v6632_v32 = vsel %vm3536_vm0, %v3492_v30, -1e+30 }
 0x6d2   :  { %4835 = vpow2.f32 %v3665_v29  ;;  %3599 = vmax.xlane.f32.xlu0 %v6632_v32 }
 0x6d5   :  { %v3572_v18 = vpop.xlane.xlu0 %3571 }
 0x6d6   :  { %v6637_v17 = vsub.f32 %v6536_v62, %v3572_v18  ;;  %v3494_v54 = vpop.f32.mrf.mxu3  ;;  %v3421_v18 = vadd.f32 %v6520_v58, %v3420_v1 }
 0x6d7   :  { %v3495_v6 = vadd.f32 %v3494_v54, %v3406_v45  ;;  %v3425_v54 = vpop.f32.mrf.mxu2 }
 0x6d8   :  { %v4836_v38 = vpop.eup %4835  ;;  %v3667_v31 = vmul.f32 1.442695, %v6637_v17 }
 0x6d9   :  { %3729 = vadd.xlane.f32.xlu2 %v4836_v38  ;;  %v6642_v28 = vsel %vm3536_vm0, %v3495_v6, -1e+30 }
 0x6da   :  { %4837 = vpow2.f32 %v3667_v31  ;;  %3601 = vmax.xlane.f32.xlu1 %v6642_v28 }
 0x6dd   :  { %v3574_v3 = vpop.xlane.xlu1 %3573 }
 0x6de   :  { %v6647_v62 = vsub.f32 %v6544_v35, %v3574_v3  ;;  %v3496_v0 = vpop.f32.mrf.mxu3 }
 0x6df   :  { %v3497_v40 = vadd.f32 %v3496_v0, %v3408_v9  ;;  %v3423_v0 = vadd.f32 %v6520_v58, %v3422_v24 }
 0x6e0   :  { %v4838_v22 = vpop.eup %4837  ;;  %v3669_v15 = vmul.f32 1.442695, %v6647_v62 }
 0x6e1   :  { %3731 = vadd.xlane.f32.xlu0 %v4838_v22  ;;  %v6652_v41 = vsel %vm3536_vm0, %v3497_v40, -1e+30 }
 0x6e2   :  { %4839 = vpow2.f32 %v3669_v15  ;;  %3603 = vmax.xlane.f32.xlu2 %v6652_v41  ;;  %v3427_v15 = vpop.f32.mrf.mxu2 }
 0x6e5   :  { %v3576_v46 = vpop.xlane.xlu1 %3575 }
 0x6e6   :  { %v6657_v27 = vsub.f32 %v6550_v39, %v3576_v46  ;;  %v3499_v35 = vpop.f32.mrf.mxu3 }
 0x6e7   :  { %v3500_v25 = vadd.f32 %v3499_v35, %v3411_v21 }
 0x6e8   :  { %v4840_v63 = vpop.eup %4839  ;;  %v3671_v60 = vmul.f32 1.442695, %v6657_v27 }
 0x6e9   :  { %3733 = vadd.xlane.f32.xlu1 %v4840_v63  ;;  %v6662_v36 = vsel %vm3536_vm0, %v3500_v25, -1e+30  ;;  %v3426_v25 = vadd.f32 %v6520_v58, %v3425_v54 }
 0x6ea   :  { %4841 = vpow2.f32 %v3671_v60  ;;  %3605 = vmax.xlane.f32.xlu0 %v6662_v36 }
 0x6ed   :  { %v3578_v50 = vpop.xlane.xlu2 %3577 }
 0x6ee   :  { %v6667_v39 = vsub.f32 %v6557_v11, %v3578_v50  ;;  %v3501_v43 = vpop.f32.mrf.mxu3 }
 0x6ef   :  { %v3502_v13 = vadd.f32 %v3501_v43, %v3413_v2 }
 0x6f0   :  { %v4842_v26 = vpop.eup %4841  ;;  %v3673_v37 = vmul.f32 1.442695, %v6667_v39 }
 0x6f1   :  { %3735 = vadd.xlane.f32.xlu2 %v4842_v26  ;;  %v6672_v14 = vsel %vm3536_vm0, %v3502_v13, -1e+30  ;;  %v3430_v13 = vpop.f32.mrf.mxu2 }
 0x6f2   :  { %4843 = vpow2.f32 %v3673_v37  ;;  %3607 = vmax.xlane.f32.xlu1 %v6672_v14  ;;  %v3428_v37 = vadd.f32 %v6520_v58, %v3427_v15  ;;  %v3431_v24 = vadd.f32 %v6520_v58, %v3430_v13 }
 0x6f5   :  { %v3580_v10 = vpop.xlane.xlu2 %3579 }
 0x6f6   :  { %v6677_v11 = vsub.f32 %v6563_v8, %v3580_v10  ;;  %v3504_v53 = vpop.f32.mrf.mxu3 }
 0x6f7   :  { %v3505_v23 = vadd.f32 %v3504_v53, %v3416_v20 }
 0x6f8   :  { %v4844_v42 = vpop.eup %4843  ;;  %v3675_v48 = vmul.f32 1.442695, %v6677_v11 }
 0x6f9   :  { %3737 = vadd.xlane.f32.xlu0 %v4844_v42  ;;  %v6682_v4 = vsel %vm3536_vm0, %v3505_v23, -1e+30 }
 0x6fa   :  { %4845 = vpow2.f32 %v3675_v48  ;;  %3609 = vmax.xlane.f32.xlu2 %v6682_v4  ;;  %v3432_v48 = vpop.f32.mrf.mxu2 }
 0x6fd   :  { %v3582_v12 = vpop.xlane.xlu0 %3581 }
 0x6fe   :  { %v6687_v8 = vsub.f32 %v6570_v47, %v3582_v12  ;;  %v3506_v16 = vpop.f32.mrf.mxu3 }
 0x6ff   :  { %v3507_v30 = vadd.f32 %v3506_v16, %v3418_v51 }
 0x700   :  { %v4846_v29 = vpop.eup %4845  ;;  %v3677_v61 = vmul.f32 1.442695, %v6687_v8 }
 0x701   :  { %3739 = vadd.xlane.f32.xlu1 %v4846_v29  ;;  %v6692_v45 = vsel %vm3536_vm0, %v3507_v30, -1e+30  ;;  %v3433_v29 = vadd.f32 %v6520_v58, %v3432_v48 }
 0x702   :  { %4847 = vpow2.f32 %v3677_v61  ;;  %3611 = vmax.xlane.f32.xlu0 %v6692_v45  ;;  %v3435_v30 = vpop.f32.mrf.mxu2 }
 0x705   :  { %v3584_v6 = vpop.xlane.xlu1 %3583 }
 0x706   :  { %v6697_v47 = vsub.f32 %v6576_v19, %v3584_v6  ;;  %v3509_v38 = vpop.f32.mrf.mxu3  ;;  %v3436_v6 = vadd.f32 %v6520_v58, %v3435_v30 }
 0x707   :  { %v3510_v31 = vadd.f32 %v3509_v38, %v3421_v18 }
 0x708   :  { %v4848_v56 = vpop.eup %4847  ;;  %v3679_v9 = vmul.f32 1.442695, %v6697_v47 }
 0x709   :  { %3741 = vadd.xlane.f32.xlu2 %v4848_v56  ;;  %v6702_v3 = vsel %vm3536_vm0, %v3510_v31, -1e+30 }
 0x70a   :  { %4849 = vpow2.f32 %v3679_v9  ;;  %3613 = vmax.xlane.f32.xlu1 %v6702_v3  ;;  %v3437_v31 = vpop.f32.mrf.mxu2 }
 0x70b   :  { %v3438_v15 = vadd.f32 %v6520_v58, %v3437_v31 }
 0x70d   :  { %v3586_v40 = vpop.xlane.xlu2 %3585 }
 0x70e   :  { %v6707_v22 = vsub.f32 %v6583_v57, %v3586_v40  ;;  %v3511_v19 = vpop.f32.mrf.mxu3 }
 0x70f   :  { %v3512_v21 = vadd.f32 %v3511_v19, %v3423_v0 }
 0x710   :  { %v4850_v46 = vpop.eup %4849  ;;  %v3681_v35 = vmul.f32 1.442695, %v6707_v22 }
 0x711   :  { %3743 = vadd.xlane.f32.xlu0 %v4850_v46  ;;  %v6712_v5 = vsel %vm3536_vm0, %v3512_v21, -1e+30 }
 0x712   :  { %4851 = vpow2.f32 %v3681_v35  ;;  %3615 = vmax.xlane.f32.xlu2 %v6712_v5 }
 0x715   :  { %v3588_v63 = vpop.xlane.xlu0 %3587 }
 0x716   :  { %v6717_v57 = vsub.f32 %v6589_v44, %v3588_v63  ;;  %v3514_v60 = vpop.f32.mrf.mxu3 }
 0x717   :  { %v3515_v2 = vadd.f32 %v3514_v60, %v3426_v25  ;;  %v3440_v25 = vpop.f32.mrf.mxu2 }
 0x718   :  { %v4852_v50 = vpop.eup %4851  ;;  %v3683_v43 = vmul.f32 1.442695, %v6717_v57 }
 0x719   :  { %3745 = vadd.xlane.f32.xlu1 %v4852_v50  ;;  %v6722_v26 = vsel %vm3536_vm0, %v3515_v2, -1e+30  ;;  %v3441_v2 = vadd.f32 %v6520_v58, %v3440_v25 }
 0x71a   :  { %4853 = vpow2.f32 %v3683_v43  ;;  %3617 = vmax.xlane.f32.xlu0 %v6722_v26 }
 0x71d   :  { %v3590_v1 = vpop.xlane.xlu1 %3589 }
 0x71e   :  { %v6727_v44 = vsub.f32 %v6596_v49, %v3590_v1  ;;  %v3516_v20 = vpop.f32.mrf.mxu3 }
 0x71f   :  { %v3517_v10 = vadd.f32 %v3516_v20, %v3428_v37 }
 0x720   :  { %v4854_v53 = vpop.eup %4853  ;;  %v3685_v23 = vmul.f32 1.442695, %v6727_v44 }
 0x721   :  { %3747 = vadd.xlane.f32.xlu2 %v4854_v53  ;;  %v6732_v42 = vsel %vm3536_vm0, %v3517_v10, -1e+30 }
 0x722   :  { %4855 = vpow2.f32 %v3685_v23  ;;  %3619 = vmax.xlane.f32.xlu1 %v6732_v42 }
 0x725   :  { %v3592_v19 = vpop.xlane.xlu2 %3591 }
 0x726   :  { %v3519_v51 = vpop.f32.mrf.mxu3  ;;  %v6778_v48 = vsub.f32 %v6602_v33, %v3592_v19 }
 0x727   :  { %v3520_v12 = vadd.f32 %v3519_v51, %v3431_v24 }
 0x728   :  { %v4856_v49 = vpop.eup %4855  ;;  %v3687_v30 = vmul.f32 1.442695, %v6778_v48 }
 0x729   :  { %3749 = vadd.xlane.f32.xlu0 %v4856_v49  ;;  %v6738_v16 = vsel %vm3536_vm0, %v3520_v12, -1e+30 }
 0x72a   :  { %3621 = vmax.xlane.f32.xlu2 %v6738_v16 }
 0x72d   :  { %v3594_v9 = vpop.xlane.xlu0 %3593 }
 0x72e   :  { %v3521_v61 = vpop.f32.mrf.mxu3  ;;  %v6754_v40 = vsub.f32 %v6609_v7, %v3594_v9 }
 0x72f   :  { %v3522_v18 = vadd.f32 %v3521_v61, %v3433_v29 }
 0x730   :  { %v3689_v35 = vmul.f32 1.442695, %v6754_v40 }
 0x731   :  { %v6744_v54 = vsel %vm3536_vm0, %v3522_v18, -1e+30 }
 0x732   :  { %3623 = vmax.xlane.f32.xlu0 %v6744_v54  ;;  %4857 = vpow2.f32 %v3689_v35 }
 0x735   :  { %v3596_v63 = vpop.xlane.xlu1 %3595 }
 0x736   :  { %v3524_v38 = vpop.f32.mrf.mxu3  ;;  %v6765_v7 = vsub.f32 %v6615_v55, %v3596_v63  ;;  %v3442_v55 = vpop.f32.mrf.mxu2 }
 0x737   :  { %v3525_v56 = vadd.f32 %v3524_v38, %v3436_v6  ;;  %v3443_v24 = vadd.f32 %v6520_v58, %v3442_v55 }
 0x738   :  { %v3691_v20 = vmul.f32 1.442695, %v6765_v7  ;;  %v4858_v53 = vpop.eup %4857 }
 0x739   :  { %v6750_v0 = vsel %vm3536_vm0, %v3525_v56, -1e+30 }
 0x73a   :  { %3625 = vmax.xlane.f32.xlu1 %v6750_v0 }
 0x73d   :  { %v3598_v50 = vpop.xlane.xlu2 %3597 }
 0x73e   :  { %v3526_v21 = vpop.f32.mrf.mxu3 }
 0x73f   :  { %v3527_v46 = vadd.f32 %v3526_v21, %v3438_v15 }
 0x741   :  { %v6760_v60 = vsel %vm3536_vm0, %v3527_v46, -1e+30 }
 0x742   :  { %3627 = vmax.xlane.f32.xlu2 %v6760_v60 }
 0x745   :  { %v3600_v43 = vpop.xlane.xlu0 %3599 }
 0x746   :  { %v3529_v13 = vpop.f32.mrf.mxu3  ;;  %v6768_v37 = vsub.f32 %v6632_v32, %v3600_v43 }
 0x747   :  { %v3530_v1 = vadd.f32 %v3529_v13, %v3441_v2 }
 0x748   :  { %v3695_v10 = vmul.f32 1.442695, %v6768_v37 }
 0x749   :  { %v6774_v23 = vsel %vm3536_vm0, %v3530_v1, -1e+30 }
 0x74a   :  { %4859 = vpow2.f32 %v3695_v10  ;;  %3629 = vmax.xlane.f32.xlu0 %v6774_v23  ;;  %3753 = vadd.xlane.f32.xlu2 %v4858_v53 }
 0x74b   :  { %4861 = vpow2.f32 %v3691_v20 }
 0x74c   :  { %v3730_v32 = vpop.xlane.xlu2 %3729 }
 0x74d   :  { %4863 = vlog2.f32 %v3730_v32  ;;  %v3602_v51 = vpop.xlane.xlu1 %3601 }
 0x74e   :  { %v3531_v12 = vpop.f32.mrf.mxu3  ;;  %v6782_v49 = vsub.f32 %v6642_v28, %v3602_v51  ;;  %v6792_v28 = vsub.f32 %v6622_v34, %v3598_v50 }
 0x74f   :  { %v3532_v29 = vadd.f32 %v3531_v12, %v3443_v24 }
 0x750   :  { %v4860_v61 = vpop.eup %4859  ;;  %v3697_v18 = vmul.f32 1.442695, %v6782_v49  ;;  %v3693_v9 = vmul.f32 1.442695, %v6792_v28 }
 0x751   :  { %v4862_v6 = vpop.eup %4861  ;;  %v6788_v33 = vsel %vm3536_vm0, %v3532_v29, -1e+30 }
 0x752   :  { %4865 = vpow2.f32 %v3697_v18  ;;  %3631 = vmax.xlane.f32.xlu1 %v6788_v33  ;;  %3755 = vadd.xlane.f32.xlu0 %v4862_v6 }
 0x753   :  { %v4864_v58 = vpop.eup %4863  ;;  %4867 = vpow2.f32 %v3687_v30  ;;  %3759 = vadd.xlane.f32.xlu2 %v4860_v61 }
 0x754   :  { %v3794_v38 = vmul.f32 0.6931472, %v4864_v58  ;;  %v3732_v31 = vpop.xlane.xlu0 %3731 }
 0x755   :  { %4869 = vlog2.f32 %v3732_v31  ;;  %v3604_v19 = vpop.xlane.xlu2 %3603 }
 0x756   :  { %v3857_v56 = vsub.f32 %v6627_v52, %v3794_v38  ;;  %4871 = vpow2.f32 %v3693_v9  ;;  %v6797_v46 = vsub.f32 %v6652_v41, %v3604_v19 }
 0x758   :  { %v4866_v59 = vpop.eup %4865  ;;  %3889 = vst [vmem:[#allocation11] sm:$0xff] %v3857_v56  ;;  %v3699_v2 = vmul.f32 1.442695, %v6797_v46 }
 0x759   :  { %v4868_v15 = vpop.eup %4867 }
 0x75a   :  { %3751 = vadd.xlane.f32.xlu1 %v4868_v15  ;;  %3761 = vadd.xlane.f32.xlu0 %v4866_v59 }
 0x75b   :  { %v4870_v21 = vpop.eup %4869 }
 0x75c   :  { %v3796_v34 = vmul.f32 0.6931472, %v4870_v21  ;;  %v3734_v35 = vpop.xlane.xlu1 %3733  ;;  %v4872_v43 = vpop.eup %4871 }
 0x75d   :  { %4873 = vlog2.f32 %v3734_v35  ;;  %v3606_v25 = vpop.xlane.xlu0 %3605 }
 0x75e   :  { %v3858_v63 = vsub.f32 %v6637_v17, %v3796_v34  ;;  %v6801_v52 = vsub.f32 %v6662_v36, %v3606_v25 }
 0x760   :  { %3890 = vst [vmem:[#allocation11 + $0x8] sm:$0xff] %v3858_v63  ;;  %v3701_v50 = vmul.f32 1.442695, %v6801_v52 }
 0x762   :  { %4875 = vpow2.f32 %v3701_v50  ;;  %3757 = vadd.xlane.f32.xlu1 %v4872_v43 }
 0x763   :  { %v4874_v13 = vpop.eup %4873  ;;  %4877 = vpow2.f32 %v3699_v2 }
 0x764   :  { %v3798_v41 = vmul.f32 0.6931472, %v4874_v13  ;;  %v3736_v1 = vpop.xlane.xlu2 %3735 }
 0x765   :  { %4879 = vlog2.f32 %v3736_v1  ;;  %v3608_v20 = vpop.xlane.xlu1 %3607 }
 0x766   :  { %v3859_v10 = vsub.f32 %v6647_v62, %v3798_v41  ;;  %v6807_v17 = vsub.f32 %v6672_v14, %v3608_v20 }
 0x768   :  { %v4876_v36 = vpop.eup %4875  ;;  %3891 = vst [vmem:[#allocation11 + $0x10] sm:$0xff] %v3859_v10  ;;  %v3703_v53 = vmul.f32 1.442695, %v6807_v17 }
 0x769   :  { %v4878_v55 = vpop.eup %4877  ;;  %3765 = vadd.xlane.f32.xlu2 %v4876_v36 }
 0x76a   :  { %4881 = vpow2.f32 %v3703_v53  ;;  %3763 = vadd.xlane.f32.xlu1 %v4878_v55 }
 0x76b   :  { %v4880_v32 = vpop.eup %4879 }
 0x76c   :  { %v3800_v24 = vmul.f32 0.6931472, %v4880_v32  ;;  %v3738_v51 = vpop.xlane.xlu0 %3737 }
 0x76d   :  { %4883 = vlog2.f32 %v3738_v51  ;;  %v3610_v12 = vpop.xlane.xlu2 %3609 }
 0x76e   :  { %v3860_v30 = vsub.f32 %v6657_v27, %v3800_v24  ;;  %v6812_v62 = vsub.f32 %v6682_v4, %v3610_v12 }
 0x770   :  { %v4882_v14 = vpop.eup %4881  ;;  %3892 = vst [vmem:[#allocation11 + $0x18] sm:$0xff] %v3860_v30  ;;  %v3705_v29 = vmul.f32 1.442695, %v6812_v62 }
 0x771   :  { %3767 = vadd.xlane.f32.xlu0 %v4882_v14 }
 0x772   :  { %4885 = vpow2.f32 %v3705_v29 }
 0x773   :  { %v4884_v61 = vpop.eup %4883 }
 0x774   :  { %v3802_v18 = vmul.f32 0.6931472, %v4884_v61  ;;  %v3740_v6 = vpop.xlane.xlu1 %3739 }
 0x775   :  { %4887 = vlog2.f32 %v3740_v6  ;;  %v3612_v58 = vpop.xlane.xlu0 %3611 }
 0x776   :  { %v3861_v38 = vsub.f32 %v6667_v39, %v3802_v18  ;;  %v6817_v31 = vsub.f32 %v6692_v45, %v3612_v58 }
 0x778   :  { %v4886_v27 = vpop.eup %4885  ;;  %3893 = vst [vmem:[#allocation11 + $0x20] sm:$0xff] %v3861_v38  ;;  %v3707_v4 = vmul.f32 1.442695, %v6817_v31 }
 0x779   :  { %3769 = vadd.xlane.f32.xlu1 %v4886_v27 }
 0x77a   :  { %4889 = vpow2.f32 %v3707_v4 }
 0x77b   :  { %v4888_v56 = vpop.eup %4887 }
 0x77c   :  { %v3804_v9 = vmul.f32 0.6931472, %v4888_v56  ;;  %v3742_v59 = vpop.xlane.xlu2 %3741 }
 0x77d   :  { %4891 = vlog2.f32 %v3742_v59  ;;  %v3614_v19 = vpop.xlane.xlu1 %3613 }
 0x77e   :  { %v3862_v15 = vsub.f32 %v6677_v11, %v3804_v9  ;;  %v6822_v21 = vsub.f32 %v6702_v3, %v3614_v19 }
 0x780   :  { %v4890_v39 = vpop.eup %4889  ;;  %3894 = vst [vmem:[#allocation11 + $0x28] sm:$0xff] %v3862_v15  ;;  %v3709_v45 = vmul.f32 1.442695, %v6822_v21 }
 0x781   :  { %3771 = vadd.xlane.f32.xlu2 %v4890_v39 }
 0x782   :  { %4893 = vpow2.f32 %v3709_v45 }
 0x783   :  { %v4892_v34 = vpop.eup %4891 }
 0x784   :  { %v3806_v35 = vmul.f32 0.6931472, %v4892_v34  ;;  %v3744_v25 = vpop.xlane.xlu0 %3743 }
 0x785   :  { %4895 = vlog2.f32 %v3744_v25  ;;  %v3616_v63 = vpop.xlane.xlu2 %3615 }
 0x786   :  { %v3863_v2 = vsub.f32 %v6687_v8, %v3806_v35  ;;  %v6827_v50 = vsub.f32 %v6712_v5, %v3616_v63 }
 0x788   :  { %v4894_v11 = vpop.eup %4893  ;;  %3895 = vst [vmem:[#allocation11 + $0x30] sm:$0xff] %v3863_v2  ;;  %v3711_v3 = vmul.f32 1.442695, %v6827_v50 }
 0x789   :  { %3773 = vadd.xlane.f32.xlu0 %v4894_v11 }
 0x78a   :  { %4897 = vpow2.f32 %v3711_v3 }
 0x78b   :  { %v4896_v43 = vpop.eup %4895 }
 0x78c   :  { %v3808_v13 = vmul.f32 0.6931472, %v4896_v43  ;;  %v3746_v41 = vpop.xlane.xlu1 %3745 }
 0x78d   :  { %4899 = vlog2.f32 %v3746_v41  ;;  %v3618_v1 = vpop.xlane.xlu0 %3617 }
 0x78e   :  { %v3864_v20 = vsub.f32 %v6697_v47, %v3808_v13  ;;  %v6832_v10 = vsub.f32 %v6722_v26, %v3618_v1 }
 0x790   :  { %v4898_v8 = vpop.eup %4897  ;;  %3896 = vst [vmem:[#allocation11 + $0x38] sm:$0xff] %v3864_v20  ;;  %v3713_v5 = vmul.f32 1.442695, %v6832_v10 }
 0x791   :  { %3775 = vadd.xlane.f32.xlu1 %v4898_v8 }
 0x792   :  { %4901 = vpow2.f32 %v3713_v5 }
 0x793   :  { %v4900_v36 = vpop.eup %4899 }
 0x794   :  { %v3810_v53 = vmul.f32 0.6931472, %v4900_v36  ;;  %v3748_v55 = vpop.xlane.xlu2 %3747 }
 0x795   :  { %4903 = vlog2.f32 %v3748_v55  ;;  %v3620_v32 = vpop.xlane.xlu1 %3619 }
 0x796   :  { %v3865_v24 = vsub.f32 %v6707_v22, %v3810_v53  ;;  %v6837_v51 = vsub.f32 %v6732_v42, %v3620_v32 }
 0x798   :  { %v4902_v47 = vpop.eup %4901  ;;  %3897 = vst [vmem:[#allocation11 + $0x40] sm:$0xff] %v3865_v24  ;;  %v3715_v26 = vmul.f32 1.442695, %v6837_v51 }
 0x799   :  { %3777 = vadd.xlane.f32.xlu2 %v4902_v47 }
 0x79a   :  { %4905 = vpow2.f32 %v3715_v26 }
 0x79b   :  { %v4904_v12 = vpop.eup %4903 }
 0x79c   :  { %v3812_v30 = vmul.f32 0.6931472, %v4904_v12  ;;  %v3750_v14 = vpop.xlane.xlu0 %3749 }
 0x79d   :  { %4907 = vlog2.f32 %v3750_v14  ;;  %v3622_v29 = vpop.xlane.xlu2 %3621 }
 0x79e   :  { %v3866_v61 = vsub.f32 %v6717_v57, %v3812_v30  ;;  %v6842_v18 = vsub.f32 %v6738_v16, %v3622_v29 }
 0x7a0   :  { %v4906_v22 = vpop.eup %4905  ;;  %3898 = vst [vmem:[#allocation11 + $0x48] sm:$0xff] %v3866_v61  ;;  %v3717_v42 = vmul.f32 1.442695, %v6842_v18 }
 0x7a1   :  { %3779 = vadd.xlane.f32.xlu0 %v4906_v22 }
 0x7a2   :  { %4909 = vpow2.f32 %v3717_v42 }
 0x7a3   :  { %v4908_v6 = vpop.eup %4907 }
 0x7a4   :  { %v3814_v58 = vmul.f32 0.6931472, %v4908_v6 }
 0x7a5   :  { %v3624_v38 = vpop.xlane.xlu0 %3623 }
 0x7a6   :  { %v3867_v27 = vsub.f32 %v6727_v44, %v3814_v58  ;;  %v6847_v4 = vsub.f32 %v6744_v54, %v3624_v38 }
 0x7a8   :  { %v4910_v56 = vpop.eup %4909  ;;  %3899 = vst [vmem:[#allocation11 + $0x50] sm:$0xff] %v3867_v27  ;;  %v3719_v57 = vmul.f32 1.442695, %v6847_v4 }
 0x7a9   :  { %3781 = vadd.xlane.f32.xlu1 %v4910_v56 }
 0x7aa   :  { %4911 = vpow2.f32 %v3719_v57 }
 0x7ad   :  { %v3626_v16 = vpop.xlane.xlu1 %3625 }
 0x7ae   :  { %v6851_v9 = vsub.f32 %v6750_v0, %v3626_v16 }
 0x7b0   :  { %v4912_v59 = vpop.eup %4911  ;;  %v3721_v19 = vmul.f32 1.442695, %v6851_v9 }
 0x7b1   :  { %3783 = vadd.xlane.f32.xlu2 %v4912_v59 }
 0x7b2   :  { %4913 = vpow2.f32 %v3721_v19 }
 0x7b5   :  { %v3628_v15 = vpop.xlane.xlu2 %3627 }
 0x7b6   :  { %v6855_v44 = vsub.f32 %v6760_v60, %v3628_v15 }
 0x7b8   :  { %v4914_v54 = vpop.eup %4913  ;;  %v3723_v39 = vmul.f32 1.442695, %v6855_v44 }
 0x7b9   :  { %3785 = vadd.xlane.f32.xlu0 %v4914_v54 }
 0x7ba   :  { %4915 = vpow2.f32 %v3723_v39 }
 0x7bd   :  { %v3754_v45 = vpop.xlane.xlu2 %3753  ;;  %v3630_v34 = vpop.xlane.xlu0 %3629 }
 0x7be   :  { %4917 = vlog2.f32 %v3754_v45  ;;  %v6859_v0 = vsub.f32 %v6774_v23, %v3630_v34 }
 0x7c0   :  { %v4916_v35 = vpop.eup %4915  ;;  %v3725_v25 = vmul.f32 1.442695, %v6859_v0 }
 0x7c1   :  { %3787 = vadd.xlane.f32.xlu1 %v4916_v35 }
 0x7c2   :  { %4919 = vpow2.f32 %v3725_v25 }
 0x7c4   :  { %v4918_v63 = vpop.eup %4917 }
 0x7c5   :  { %v3818_v2 = vmul.f32 0.6931472, %v4918_v63  ;;  %v3632_v60 = vpop.xlane.xlu1 %3631  ;;  %v3756_v11 = vpop.xlane.xlu0 %3755 }
 0x7c6   :  { %v6863_v3 = vsub.f32 %v6788_v33, %v3632_v60  ;;  %v3760_v43 = vpop.xlane.xlu2 %3759  ;;  %4921 = vlog2.f32 %v3756_v11 }
 0x7c7   :  { %v3869_v13 = vsub.f32 %v6754_v40, %v3818_v2  ;;  %4923 = vlog2.f32 %v3760_v43 }
 0x7c8   :  { %v4920_v41 = vpop.eup %4919  ;;  %v3727_v23 = vmul.f32 1.442695, %v6863_v3 }
 0x7c9   :  { %3901 = vst [vmem:[#allocation11 + $0x60] sm:$0xff] %v3869_v13  ;;  %3789 = vadd.xlane.f32.xlu2 %v4920_v41 }
 0x7ca   :  { %4925 = vpow2.f32 %v3727_v23 }
 0x7cc   :  { %v4922_v1 = vpop.eup %4921 }
 0x7cd   :  { %v4924_v20 = vpop.eup %4923  ;;  %v3820_v8 = vmul.f32 0.6931472, %v4922_v1  ;;  %v3752_v5 = vpop.xlane.xlu1 %3751 }
 0x7ce   :  { %v3762_v36 = vpop.xlane.xlu0 %3761  ;;  %v3824_v53 = vmul.f32 0.6931472, %v4924_v20  ;;  %4927 = vlog2.f32 %v3752_v5 }
 0x7cf   :  { %v3870_v33 = vsub.f32 %v6765_v7, %v3820_v8  ;;  %4929 = vlog2.f32 %v3762_v36 }
 0x7d0   :  { %v4926_v55 = vpop.eup %4925  ;;  %v3872_v40 = vsub.f32 %v6768_v37, %v3824_v53 }
 0x7d1   :  { %3902 = vst [vmem:[#allocation11 + $0x68] sm:$0xff] %v3870_v33  ;;  %3791 = vadd.xlane.f32.xlu0 %v4926_v55 }
 0x7d2   :  { %3904 = vst [vmem:[#allocation11 + $0x78] sm:$0xff] %v3872_v40 }
 0x7d4   :  { %v4928_v32 = vpop.eup %4927 }
 0x7d5   :  { %v4930_v24 = vpop.eup %4929  ;;  %v3816_v47 = vmul.f32 0.6931472, %v4928_v32  ;;  %v3758_v26 = vpop.xlane.xlu1 %3757 }
 0x7d6   :  { %v3826_v12 = vmul.f32 0.6931472, %v4930_v24  ;;  %4931 = vlog2.f32 %v3758_v26 }
 0x7d7   :  { %v3868_v30 = vsub.f32 %v6778_v48, %v3816_v47 }
 0x7d8   :  { %v3873_v14 = vsub.f32 %v6782_v49, %v3826_v12 }
 0x7d9   :  { %3900 = vst [vmem:[#allocation11 + $0x58] sm:$0xff] %v3868_v30 }
 0x7da   :  { %3905 = vst [vmem:[#allocation11 + $0x80] sm:$0xff] %v3873_v14 }
 0x7dc   :  { %v4932_v7 = vpop.eup %4931  ;;  %v3766_v29 = vpop.xlane.xlu2 %3765 }
 0x7dd   :  { %v3822_v61 = vmul.f32 0.6931472, %v4932_v7  ;;  %4933 = vlog2.f32 %v3766_v29  ;;  %v3764_v37 = vpop.xlane.xlu1 %3763 }
 0x7de   :  { %4935 = vlog2.f32 %v3764_v37 }
 0x7df   :  { %v3871_v22 = vsub.f32 %v6792_v28, %v3822_v61 }
 0x7e1   :  { %3903 = vst [vmem:[#allocation11 + $0x70] sm:$0xff] %v3871_v22 }
 0x7e3   :  { %v4934_v42 = vpop.eup %4933 }
 0x7e4   :  { %v4936_v6 = vpop.eup %4935  ;;  %v3830_v58 = vmul.f32 0.6931472, %v4934_v42  ;;  %v3768_v38 = vpop.xlane.xlu0 %3767 }
 0x7e5   :  { %v3828_v27 = vmul.f32 0.6931472, %v4936_v6  ;;  %4937 = vlog2.f32 %v3768_v38 }
 0x7e6   :  { %v3875_v48 = vsub.f32 %v6801_v52, %v3830_v58 }
 0x7e7   :  { %v3874_v49 = vsub.f32 %v6797_v46, %v3828_v27 }
 0x7e8   :  { %3907 = vst [vmem:[#allocation11 + $0x90] sm:$0xff] %v3875_v48 }
 0x7e9   :  { %3906 = vst [vmem:[#allocation11 + $0x88] sm:$0xff] %v3874_v49 }
 0x7eb   :  { %v4938_v56 = vpop.eup %4937 }
 0x7ec   :  { %v3832_v57 = vmul.f32 0.6931472, %v4938_v56  ;;  %v3770_v16 = vpop.xlane.xlu1 %3769 }
 0x7ed   :  { %4939 = vlog2.f32 %v3770_v16 }
 0x7ee   :  { %v3876_v59 = vsub.f32 %v6807_v17, %v3832_v57 }
 0x7f0   :  { %3908 = vst [vmem:[#allocation11 + $0x98] sm:$0xff] %v3876_v59 }
 0x7f3   :  { %v4940_v28 = vpop.eup %4939 }
 0x7f4   :  { %v3834_v19 = vmul.f32 0.6931472, %v4940_v28  ;;  %v3772_v15 = vpop.xlane.xlu2 %3771 }
 0x7f5   :  { %4941 = vlog2.f32 %v3772_v15 }
 0x7f6   :  { %v3877_v54 = vsub.f32 %v6812_v62, %v3834_v19 }
 0x7f8   :  { %3909 = vst [vmem:[#allocation11 + $0xa0] sm:$0xff] %v3877_v54 }
 0x7fb   :  { %v4942_v39 = vpop.eup %4941 }
 0x7fc   :  { %v3836_v52 = vmul.f32 0.6931472, %v4942_v39  ;;  %v3774_v45 = vpop.xlane.xlu0 %3773 }
 0x7fd   :  { %4943 = vlog2.f32 %v3774_v45 }
 0x7fe   :  { %v3878_v46 = vsub.f32 %v6817_v31, %v3836_v52 }
 0x800   :  { %3910 = vst [vmem:[#allocation11 + $0xa8] sm:$0xff] %v3878_v46 }
 0x803   :  { %v4944_v34 = vpop.eup %4943 }
 0x804   :  { %v3838_v35 = vmul.f32 0.6931472, %v4944_v34  ;;  %v3776_v25 = vpop.xlane.xlu1 %3775 }
 0x805   :  { %4945 = vlog2.f32 %v3776_v25 }
 0x806   :  { %v3879_v17 = vsub.f32 %v6822_v21, %v3838_v35 }
 0x808   :  { %3911 = vst [vmem:[#allocation11 + $0xb0] sm:$0xff] %v3879_v17 }
 0x80b   :  { %v4946_v63 = vpop.eup %4945 }
 0x80c   :  { %v3840_v2 = vmul.f32 0.6931472, %v4946_v63  ;;  %v3778_v60 = vpop.xlane.xlu2 %3777 }
 0x80d   :  { %4947 = vlog2.f32 %v3778_v60 }
 0x80e   :  { %v3880_v62 = vsub.f32 %v6827_v50, %v3840_v2 }
 0x810   :  { %3912 = vst [vmem:[#allocation11 + $0xb8] sm:$0xff] %v3880_v62 }
 0x813   :  { %v4948_v11 = vpop.eup %4947 }
 0x814   :  { %v3842_v43 = vmul.f32 0.6931472, %v4948_v11  ;;  %v3780_v13 = vpop.xlane.xlu0 %3779 }
 0x815   :  { %4949 = vlog2.f32 %v3780_v13 }
 0x816   :  { %v3881_v31 = vsub.f32 %v6832_v10, %v3842_v43 }
 0x818   :  { %3913 = vst [vmem:[#allocation11 + $0xc0] sm:$0xff] %v3881_v31 }
 0x81b   :  { %v4950_v41 = vpop.eup %4949 }
 0x81c   :  { %v3844_v23 = vmul.f32 0.6931472, %v4950_v41  ;;  %v3782_v1 = vpop.xlane.xlu1 %3781 }
 0x81d   :  { %4951 = vlog2.f32 %v3782_v1 }
 0x81e   :  { %v3882_v21 = vsub.f32 %v6837_v51, %v3844_v23 }
 0x820   :  { %3914 = vst [vmem:[#allocation11 + $0xc8] sm:$0xff] %v3882_v21 }
 0x823   :  { %v4952_v20 = vpop.eup %4951 }
 0x824   :  { %v3846_v8 = vmul.f32 0.6931472, %v4952_v20  ;;  %v3784_v5 = vpop.xlane.xlu2 %3783 }
 0x825   :  { %4953 = vlog2.f32 %v3784_v5 }
 0x826   :  { %v3883_v50 = vsub.f32 %v6842_v18, %v3846_v8 }
 0x828   :  { %3915 = vst [vmem:[#allocation11 + $0xd0] sm:$0xff] %v3883_v50 }
 0x82b   :  { %v4954_v36 = vpop.eup %4953 }
 0x82c   :  { %v3848_v53 = vmul.f32 0.6931472, %v4954_v36  ;;  %v3786_v33 = vpop.xlane.xlu0 %3785 }
 0x82d   :  { %4955 = vlog2.f32 %v3786_v33 }
 0x82e   :  { %v3884_v10 = vsub.f32 %v6847_v4, %v3848_v53 }
 0x830   :  { %3916 = vst [vmem:[#allocation11 + $0xd8] sm:$0xff] %v3884_v10 }
 0x833   :  { %v4956_v55 = vpop.eup %4955 }
 0x834   :  { %v3850_v40 = vmul.f32 0.6931472, %v4956_v55  ;;  %v3788_v32 = vpop.xlane.xlu1 %3787 }
 0x835   :  { %4957 = vlog2.f32 %v3788_v32 }
 0x836   :  { %v3885_v51 = vsub.f32 %v6851_v9, %v3850_v40 }
 0x838   :  { %3917 = vst [vmem:[#allocation11 + $0xe0] sm:$0xff] %v3885_v51 }
 0x83b   :  { %v4958_v24 = vpop.eup %4957 }
 0x83c   :  { %v3852_v47 = vmul.f32 0.6931472, %v4958_v24  ;;  %v3790_v26 = vpop.xlane.xlu2 %3789 }
 0x83d   :  { %4959 = vlog2.f32 %v3790_v26 }
 0x83e   :  { %v3886_v18 = vsub.f32 %v6855_v44, %v3852_v47 }
 0x840   :  { %3918 = vst [vmem:[#allocation11 + $0xe8] sm:$0xff] %v3886_v18 }
 0x843   :  { %v4960_v12 = vpop.eup %4959 }
 0x844   :  { %v3854_v30 = vmul.f32 0.6931472, %v4960_v12  ;;  %v3792_v14 = vpop.xlane.xlu0 %3791 }
 0x845   :  { %4961 = vlog2.f32 %v3792_v14 }
 0x846   :  { %v3887_v4 = vsub.f32 %v6859_v0, %v3854_v30 }
 0x848   :  { %3919 = vst [vmem:[#allocation11 + $0xf0] sm:$0xff] %v3887_v4 }
 0x84b   :  { %v4962_v7 = vpop.eup %4961 }
 0x84c   :  { %v3856_v9 = vmul.f32 0.6931472, %v4962_v7 }
 0x84e   :  { %v3888_v29 = vsub.f32 %v6863_v3, %v3856_v9 }
 0x850   :  { %3920 = vst [vmem:[#allocation11 + $0xf8] sm:$0xff] %v3888_v29 }
 0x851   :  { %3933 = dma.vmem_to_hbm [thread:$0]  %s3926_s25, 4096, %s3928_s28, [#allocation4], %s5121_s15, %s5121_s15, %s5122_s16  }
 0x852   :  { %5114 = dma.done.wait [#allocation4], 4096  }
 0x853   :  { %5115 = vsyncadd [#allocation4], 4294963200 }
 0x854   :  { %3938 = vsyncpa [#allocation3], 1 }
 0x855   :  { %3939 = vsyncpa [#allocation6], 1 }
 0x856   :  { %3940 = vsyncpa [#allocation9], 1 }
 0x857   :  { %3941 = vsyncpa [#allocation4], 1 }

</bundles_post_ra>
